<compile_context>
chip_gen: v7x
topology: tpu7x:2x2x1
jax: 0.10.0
libtpu: 0.0.40
codegen_flags: <defaults>
</compile_context>

<pallas_src>
import numpy as np
import jax
import jax.numpy as jnp
from jax import lax
from jax.experimental import pallas as pl
from jax.experimental.pallas import tpu as pltpu


# ---------------------------------------------------------------------------
# Fused kernel: encoder (2 stacked LSTM layers) + autoregressive decoder
# (2 stacked LSTM layers) + Linear head, all in one invocation (no grid).
# ---------------------------------------------------------------------------
def _lstm_soh_kernel(x_ref,
                     e_wih0_ref, e_whh0_ref, e_b0_ref,
                     e_wih1_ref, e_whh1_ref, e_b1_ref,
                     d_wih0_ref, d_whh0_ref, d_b0_ref,
                     d_wih1_ref, d_whh1_ref, d_b1_ref,
                     fcw_ref, fcb_ref,
                     preds_ref):
    T, B, _ = x_ref.shape
    H = e_whh0_ref.shape[0]
    pred_len = preds_ref.shape[1]

    def cell(x_contrib, h, c, whh_ref, b_ref):
        # Fused gate pre-activation: one lane-dense (B, 4H) tile per cell.
        z = (x_contrib
             + jnp.dot(h, whh_ref[...], preferred_element_type=jnp.float32)
             + b_ref[...])
        i = jax.nn.sigmoid(z[:, 0 * H:1 * H])
        f = jax.nn.sigmoid(z[:, 1 * H:2 * H])
        g = jnp.tanh(z[:, 2 * H:3 * H])
        o = jax.nn.sigmoid(z[:, 3 * H:4 * H])
        c_new = f * c + i * g
        h_new = o * jnp.tanh(c_new)
        return h_new, c_new

    # ---------------- encoder: both layers fused per time step --------------
    zeros = jnp.zeros((B, H), jnp.float32)

    def enc_step(t, carry):
        h0, c0, h1, c1 = carry
        x_t = x_ref[t]                                                   # (B, D)
        xc0 = jnp.dot(x_t, e_wih0_ref[...], preferred_element_type=jnp.float32)
        h0, c0 = cell(xc0, h0, c0, e_whh0_ref, e_b0_ref)
        xc1 = jnp.dot(h0, e_wih1_ref[...], preferred_element_type=jnp.float32)
        h1, c1 = cell(xc1, h1, c1, e_whh1_ref, e_b1_ref)
        return h0, c0, h1, c1

    h0, c0, h1, c1 = lax.fori_loop(
        0, T, enc_step, (zeros, zeros, zeros, zeros), unroll=True)

    # ---------------- decoder: autoregressive, state carried in vregs -------
    fcw = fcw_ref[...]                                                   # (1, H)
    fcb = fcb_ref[0, 0]                                                  # scalar (SMEM)
    d_wih0_row0 = d_wih0_ref[0:1, :]                                     # (1, 4H)

    # Step 0 decoder input is x[:, -1, :]; later steps only column 0 is nonzero.
    x_last = x_ref[T - 1]                                                # (B, D)
    xc = jnp.dot(x_last, d_wih0_ref[...], preferred_element_type=jnp.float32)

    preds = []
    for _ in range(pred_len):
        h0, c0 = cell(xc, h0, c0, d_whh0_ref, d_b0_ref)
        xc1 = jnp.dot(h0, d_wih1_ref[...], preferred_element_type=jnp.float32)
        h1, c1 = cell(xc1, h1, c1, d_whh1_ref, d_b1_ref)
        pred = jnp.sum(h1 * fcw, axis=-1, keepdims=True) + fcb           # (B, 1) via VPU/XLU
        preds.append(pred)
        # next decoder input = [pred, 0, ..., 0]  =>  x @ Wih == pred * Wih[0, :]
        xc = pred * d_wih0_row0                                          # (B, 4H), VPU only

    preds_ref[...] = jnp.concatenate(preds, axis=-1)                     # single store


def lstm_soh_forward(x, enc_params, dec_params, fc_w_row, fc_b, pred_len):
    """x: (B, T, D) batch-first like PyTorch.  Returns (B, pred_len)."""
    assert len(enc_params) == 2 and len(dec_params) == 2, \
        "kernel is specialized to num_layers=2"
    B, T, D = x.shape
    x_tm = jnp.transpose(x, (1, 0, 2))          # time-major for per-step slicing

    flat = []
    for (wih, whh, b) in (*enc_params, *dec_params):
        flat += [wih, whh, b]

    vmem = pl.BlockSpec(memory_space=pltpu.MemorySpace.VMEM)
    smem = pl.BlockSpec(memory_space=pltpu.MemorySpace.SMEM)

    preds = pl.pallas_call(
        _lstm_soh_kernel,
        out_shape=jax.ShapeDtypeStruct((B, pred_len), jnp.float32),
        in_specs=[vmem] * 14 + [smem],          # x, 12 packed LSTM tensors, fc_w | fc_b
        out_specs=vmem,
    )(x_tm, *flat, fc_w_row, fc_b)
    return preds


# ---------------------------------------------------------------------------
# Pure-JAX reference (same math, no Pallas) for verification.
# ---------------------------------------------------------------------------
def _cell_ref(x, h, c, wih, whh, b):
    H = whh.shape[0]
    z = x @ wih + h @ whh + b
    i = jax.nn.sigmoid(z[:, 0 * H:1 * H])
    f = jax.nn.sigmoid(z[:, 1 * H:2 * H])
    g = jnp.tanh(z[:, 2 * H:3 * H])
    o = jax.nn.sigmoid(z[:, 3 * H:4 * H])
    c_new = f * c + i * g
    h_new = o * jnp.tanh(c_new)
    return h_new, c_new


def lstm_soh_ref(x, enc_params, dec_params, fc_w_row, fc_b, pred_len):
    B, T, D = x.shape
    H = enc_params[0][1].shape[0]
    L = len(enc_params)
    h = [jnp.zeros((B, H), jnp.float32) for _ in range(L)]
    c = [jnp.zeros((B, H), jnp.float32) for _ in range(L)]
    for t in range(T):
        layer_in = x[:, t]
        for l, (wih, whh, b) in enumerate(enc_params):
            h[l], c[l] = _cell_ref(layer_in, h[l], c[l], wih, whh, b)
            layer_in = h[l]
    dec_in = x[:, -1, :]
    preds = []
    for _ in range(pred_len):
        layer_in = dec_in
        for l, (wih, whh, b) in enumerate(dec_params):
            h[l], c[l] = _cell_ref(layer_in, h[l], c[l], wih, whh, b)
            layer_in = h[l]
        pred = jnp.sum(layer_in * fc_w_row, axis=-1, keepdims=True) + fc_b[0, 0]
        preds.append(pred[:, 0])
        dec_in = jnp.concatenate([pred, jnp.zeros((B, D - 1), jnp.float32)], axis=1)
    return jnp.stack(preds, axis=1)


# ---------------------------------------------------------------------------
# Deterministic parameter init (PyTorch nn.LSTM uniform(-1/sqrt(H), 1/sqrt(H))),
# pre-packed into the fused per-layer layout: (Din,4H), (H,4H), (1,4H).
# ---------------------------------------------------------------------------
def init_lstm_params(key, input_dim, hidden_dim, num_layers):
    params = []
    bound = 1.0 / np.sqrt(hidden_dim)
    for layer in range(num_layers):
        d_in = input_dim if layer == 0 else hidden_dim
        key, k1, k2, k3, k4 = jax.random.split(key, 5)
        w_ih = jax.random.uniform(k1, (4 * hidden_dim, d_in), jnp.float32, -bound, bound)
        w_hh = jax.random.uniform(k2, (4 * hidden_dim, hidden_dim), jnp.float32, -bound, bound)
        b_ih = jax.random.uniform(k3, (4 * hidden_dim,), jnp.float32, -bound, bound)
        b_hh = jax.random.uniform(k4, (4 * hidden_dim,), jnp.float32, -bound, bound)
        wih_f = jnp.transpose(w_ih)                            # (d_in, 4H), gates [i,f,g,o]
        whh_f = jnp.transpose(w_hh)                            # (H, 4H)
        b_f = (b_ih + b_hh).reshape(1, 4 * hidden_dim)         # (1, 4H)
        params.append((wih_f, whh_f, b_f))
    return key, params


if __name__ == "__main__":
    B, T, D, H, L, PRED = 8, 8, 4, 32, 2, 6     # 4H = 128 -> one lane-dense vreg per cell

    key = jax.random.PRNGKey(0)
    key, kx = jax.random.split(key)
    x = jax.random.normal(kx, (B, T, D), jnp.float32)

    key, enc_params = init_lstm_params(key, D, H, L)
    key, dec_params = init_lstm_params(key, D, H, L)

    bound = 1.0 / np.sqrt(H)
    key, kfw, kfb = jax.random.split(key, 3)
    fc_w_row = jax.random.uniform(kfw, (1, H), jnp.float32, -bound, bound)   # Linear(H,1).weight
    fc_b = jax.random.uniform(kfb, (1, 1), jnp.float32, -bound, bound)       # Linear(H,1).bias

    preds = lstm_soh_forward(x, enc_params, dec_params, fc_w_row, fc_b, PRED)
    preds = jax.block_until_ready(preds)
    assert preds.shape == (B, PRED)

    ref = lstm_soh_ref(x, enc_params, dec_params, fc_w_row, fc_b, PRED)
    np.testing.assert_allclose(np.asarray(preds), np.asarray(ref), rtol=2e-3, atol=2e-3)

    print("KERNEL_OK")
</pallas_src>

<mosaic_0001>
module attributes {stable_mosaic.version = 11 : i64} {
  func.func @_lstm_soh_kernel(%arg0: memref<8x8x4xf32, #tpu.memory_space<vmem>>, %arg1: memref<4x128xf32, #tpu.memory_space<vmem>>, %arg2: memref<32x128xf32, #tpu.memory_space<vmem>>, %arg3: memref<1x128xf32, #tpu.memory_space<vmem>>, %arg4: memref<32x128xf32, #tpu.memory_space<vmem>>, %arg5: memref<32x128xf32, #tpu.memory_space<vmem>>, %arg6: memref<1x128xf32, #tpu.memory_space<vmem>>, %arg7: memref<4x128xf32, #tpu.memory_space<vmem>>, %arg8: memref<32x128xf32, #tpu.memory_space<vmem>>, %arg9: memref<1x128xf32, #tpu.memory_space<vmem>>, %arg10: memref<32x128xf32, #tpu.memory_space<vmem>>, %arg11: memref<32x128xf32, #tpu.memory_space<vmem>>, %arg12: memref<1x128xf32, #tpu.memory_space<vmem>>, %arg13: memref<1x32xf32, #tpu.memory_space<vmem>>, %arg14: memref<1x1xf32, #tpu.memory_space<smem>>, %arg15: memref<8x6xf32, #tpu.memory_space<vmem>>) attributes {dimension_semantics = [], scalar_prefetch = 0 : i64, scratch_operands = 0 : i64, tpu.core_type = #tpu.core_type<tc>} {
    %cst = arith.constant 0.000000e+00 : f32
    %0 = vector.broadcast %cst : f32 to vector<8x32xf32>
    %c0_i32 = arith.constant 0 : i32
    %1 = arith.index_cast %c0_i32 : i32 to index
    %c0 = arith.constant 0 : index
    %c0_0 = arith.constant 0 : index
    %2 = vector.load %arg0[%1, %c0, %c0_0] : memref<8x8x4xf32, #tpu.memory_space<vmem>>, vector<1x8x4xf32>
    %3 = vector.shape_cast %2 : vector<1x8x4xf32> to vector<8x4xf32>
    %c0_1 = arith.constant 0 : index
    %c0_2 = arith.constant 0 : index
    %4 = vector.load %arg1[%c0_1, %c0_2] : memref<4x128xf32, #tpu.memory_space<vmem>>, vector<4x128xf32>
    %cst_3 = arith.constant dense<0.000000e+00> : vector<8x128xf32>
    %5 = tpu.matmul %3, %4, %cst_3 {dimension_numbers = #tpu.dot_dimension_numbers<[1], [0], [0], [1], [0, 0, 1, 1], [], []>} : vector<8x4xf32>, vector<4x128xf32>, vector<8x128xf32> -> vector<8x128xf32>
    %c0_4 = arith.constant 0 : index
    %c0_5 = arith.constant 0 : index
    %6 = vector.load %arg2[%c0_4, %c0_5] : memref<32x128xf32, #tpu.memory_space<vmem>>, vector<32x128xf32>
    %cst_6 = arith.constant dense<0.000000e+00> : vector<8x128xf32>
    %7 = tpu.matmul %0, %6, %cst_6 {dimension_numbers = #tpu.dot_dimension_numbers<[1], [0], [0], [1], [0, 0, 1, 1], [], []>} : vector<8x32xf32>, vector<32x128xf32>, vector<8x128xf32> -> vector<8x128xf32>
    %8 = arith.addf %5, %7 : vector<8x128xf32>
    %c0_7 = arith.constant 0 : index
    %c0_8 = arith.constant 0 : index
    %9 = vector.load %arg3[%c0_7, %c0_8] : memref<1x128xf32, #tpu.memory_space<vmem>>, vector<1x128xf32>
    %10 = vector.broadcast %9 : vector<1x128xf32> to vector<8x128xf32>
    %11 = arith.addf %8, %10 : vector<8x128xf32>
    %12 = vector.extract_strided_slice %11 {offsets = [0, 0], sizes = [8, 32], strides = [1, 1]} : vector<8x128xf32> to vector<8x32xf32>
    %13 = arith.negf %12 : vector<8x32xf32>
    %14 = math.exp %13 : vector<8x32xf32>
    %cst_9 = arith.constant 1.000000e+00 : f32
    %15 = vector.broadcast %cst_9 : f32 to vector<8x32xf32>
    %16 = arith.addf %15, %14 : vector<8x32xf32>
    %17 = arith.divf %15, %16 : vector<8x32xf32>
    %18 = vector.extract_strided_slice %11 {offsets = [0, 32], sizes = [8, 32], strides = [1, 1]} : vector<8x128xf32> to vector<8x32xf32>
    %19 = arith.negf %18 : vector<8x32xf32>
    %20 = math.exp %19 : vector<8x32xf32>
    %cst_10 = arith.constant 1.000000e+00 : f32
    %21 = vector.broadcast %cst_10 : f32 to vector<8x32xf32>
    %22 = arith.addf %21, %20 : vector<8x32xf32>
    %23 = arith.divf %21, %22 : vector<8x32xf32>
    %24 = vector.extract_strided_slice %11 {offsets = [0, 64], sizes = [8, 32], strides = [1, 1]} : vector<8x128xf32> to vector<8x32xf32>
    %25 = math.tanh %24 : vector<8x32xf32>
    %26 = vector.extract_strided_slice %11 {offsets = [0, 96], sizes = [8, 32], strides = [1, 1]} : vector<8x128xf32> to vector<8x32xf32>
    %27 = arith.negf %26 : vector<8x32xf32>
    %28 = math.exp %27 : vector<8x32xf32>
    %cst_11 = arith.constant 1.000000e+00 : f32
    %29 = vector.broadcast %cst_11 : f32 to vector<8x32xf32>
    %30 = arith.addf %29, %28 : vector<8x32xf32>
    %31 = arith.divf %29, %30 : vector<8x32xf32>
    %32 = arith.mulf %23, %0 : vector<8x32xf32>
    %33 = arith.mulf %17, %25 : vector<8x32xf32>
    %34 = arith.addf %32, %33 : vector<8x32xf32>
    %35 = math.tanh %34 : vector<8x32xf32>
    %36 = arith.mulf %31, %35 : vector<8x32xf32>
    %c0_12 = arith.constant 0 : index
    %c0_13 = arith.constant 0 : index
    %37 = vector.load %arg4[%c0_12, %c0_13] : memref<32x128xf32, #tpu.memory_space<vmem>>, vector<32x128xf32>
    %cst_14 = arith.constant dense<0.000000e+00> : vector<8x128xf32>
    %38 = tpu.matmul %36, %37, %cst_14 {dimension_numbers = #tpu.dot_dimension_numbers<[1], [0], [0], [1], [0, 0, 1, 1], [], []>} : vector<8x32xf32>, vector<32x128xf32>, vector<8x128xf32> -> vector<8x128xf32>
    %c0_15 = arith.constant 0 : index
    %c0_16 = arith.constant 0 : index
    %39 = vector.load %arg5[%c0_15, %c0_16] : memref<32x128xf32, #tpu.memory_space<vmem>>, vector<32x128xf32>
    %cst_17 = arith.constant dense<0.000000e+00> : vector<8x128xf32>
    %40 = tpu.matmul %0, %39, %cst_17 {dimension_numbers = #tpu.dot_dimension_numbers<[1], [0], [0], [1], [0, 0, 1, 1], [], []>} : vector<8x32xf32>, vector<32x128xf32>, vector<8x128xf32> -> vector<8x128xf32>
    %41 = arith.addf %38, %40 : vector<8x128xf32>
    %c0_18 = arith.constant 0 : index
    %c0_19 = arith.constant 0 : index
    %42 = vector.load %arg6[%c0_18, %c0_19] : memref<1x128xf32, #tpu.memory_space<vmem>>, vector<1x128xf32>
    %43 = vector.broadcast %42 : vector<1x128xf32> to vector<8x128xf32>
    %44 = arith.addf %41, %43 : vector<8x128xf32>
    %45 = vector.extract_strided_slice %44 {offsets = [0, 0], sizes = [8, 32], strides = [1, 1]} : vector<8x128xf32> to vector<8x32xf32>
    %46 = arith.negf %45 : vector<8x32xf32>
    %47 = math.exp %46 : vector<8x32xf32>
    %cst_20 = arith.constant 1.000000e+00 : f32
    %48 = vector.broadcast %cst_20 : f32 to vector<8x32xf32>
    %49 = arith.addf %48, %47 : vector<8x32xf32>
    %50 = arith.divf %48, %49 : vector<8x32xf32>
    %51 = vector.extract_strided_slice %44 {offsets = [0, 32], sizes = [8, 32], strides = [1, 1]} : vector<8x128xf32> to vector<8x32xf32>
    %52 = arith.negf %51 : vector<8x32xf32>
    %53 = math.exp %52 : vector<8x32xf32>
    %cst_21 = arith.constant 1.000000e+00 : f32
    %54 = vector.broadcast %cst_21 : f32 to vector<8x32xf32>
    %55 = arith.addf %54, %53 : vector<8x32xf32>
    %56 = arith.divf %54, %55 : vector<8x32xf32>
    %57 = vector.extract_strided_slice %44 {offsets = [0, 64], sizes = [8, 32], strides = [1, 1]} : vector<8x128xf32> to vector<8x32xf32>
    %58 = math.tanh %57 : vector<8x32xf32>
    %59 = vector.extract_strided_slice %44 {offsets = [0, 96], sizes = [8, 32], strides = [1, 1]} : vector<8x128xf32> to vector<8x32xf32>
    %60 = arith.negf %59 : vector<8x32xf32>
    %61 = math.exp %60 : vector<8x32xf32>
    %cst_22 = arith.constant 1.000000e+00 : f32
    %62 = vector.broadcast %cst_22 : f32 to vector<8x32xf32>
    %63 = arith.addf %62, %61 : vector<8x32xf32>
    %64 = arith.divf %62, %63 : vector<8x32xf32>
    %65 = arith.mulf %56, %0 : vector<8x32xf32>
    %66 = arith.mulf %50, %58 : vector<8x32xf32>
    %67 = arith.addf %65, %66 : vector<8x32xf32>
    %68 = math.tanh %67 : vector<8x32xf32>
    %69 = arith.mulf %64, %68 : vector<8x32xf32>
    %c1_i32 = arith.constant 1 : i32
    %70 = arith.index_cast %c1_i32 : i32 to index
    %c0_23 = arith.constant 0 : index
    %c0_24 = arith.constant 0 : index
    %71 = vector.load %arg0[%70, %c0_23, %c0_24] : memref<8x8x4xf32, #tpu.memory_space<vmem>>, vector<1x8x4xf32>
    %72 = vector.shape_cast %71 : vector<1x8x4xf32> to vector<8x4xf32>
    %c0_25 = arith.constant 0 : index
    %c0_26 = arith.constant 0 : index
    %73 = vector.load %arg1[%c0_25, %c0_26] : memref<4x128xf32, #tpu.memory_space<vmem>>, vector<4x128xf32>
    %cst_27 = arith.constant dense<0.000000e+00> : vector<8x128xf32>
    %74 = tpu.matmul %72, %73, %cst_27 {dimension_numbers = #tpu.dot_dimension_numbers<[1], [0], [0], [1], [0, 0, 1, 1], [], []>} : vector<8x4xf32>, vector<4x128xf32>, vector<8x128xf32> -> vector<8x128xf32>
    %c0_28 = arith.constant 0 : index
    %c0_29 = arith.constant 0 : index
    %75 = vector.load %arg2[%c0_28, %c0_29] : memref<32x128xf32, #tpu.memory_space<vmem>>, vector<32x128xf32>
    %cst_30 = arith.constant dense<0.000000e+00> : vector<8x128xf32>
    %76 = tpu.matmul %36, %75, %cst_30 {dimension_numbers = #tpu.dot_dimension_numbers<[1], [0], [0], [1], [0, 0, 1, 1], [], []>} : vector<8x32xf32>, vector<32x128xf32>, vector<8x128xf32> -> vector<8x128xf32>
    %77 = arith.addf %74, %76 : vector<8x128xf32>
    %c0_31 = arith.constant 0 : index
    %c0_32 = arith.constant 0 : index
    %78 = vector.load %arg3[%c0_31, %c0_32] : memref<1x128xf32, #tpu.memory_space<vmem>>, vector<1x128xf32>
    %79 = vector.broadcast %78 : vector<1x128xf32> to vector<8x128xf32>
    %80 = arith.addf %77, %79 : vector<8x128xf32>
    %81 = vector.extract_strided_slice %80 {offsets = [0, 0], sizes = [8, 32], strides = [1, 1]} : vector<8x128xf32> to vector<8x32xf32>
    %82 = arith.negf %81 : vector<8x32xf32>
    %83 = math.exp %82 : vector<8x32xf32>
    %cst_33 = arith.constant 1.000000e+00 : f32
    %84 = vector.broadcast %cst_33 : f32 to vector<8x32xf32>
    %85 = arith.addf %84, %83 : vector<8x32xf32>
    %86 = arith.divf %84, %85 : vector<8x32xf32>
    %87 = vector.extract_strided_slice %80 {offsets = [0, 32], sizes = [8, 32], strides = [1, 1]} : vector<8x128xf32> to vector<8x32xf32>
    %88 = arith.negf %87 : vector<8x32xf32>
    %89 = math.exp %88 : vector<8x32xf32>
    %cst_34 = arith.constant 1.000000e+00 : f32
    %90 = vector.broadcast %cst_34 : f32 to vector<8x32xf32>
    %91 = arith.addf %90, %89 : vector<8x32xf32>
    %92 = arith.divf %90, %91 : vector<8x32xf32>
    %93 = vector.extract_strided_slice %80 {offsets = [0, 64], sizes = [8, 32], strides = [1, 1]} : vector<8x128xf32> to vector<8x32xf32>
    %94 = math.tanh %93 : vector<8x32xf32>
    %95 = vector.extract_strided_slice %80 {offsets = [0, 96], sizes = [8, 32], strides = [1, 1]} : vector<8x128xf32> to vector<8x32xf32>
    %96 = arith.negf %95 : vector<8x32xf32>
    %97 = math.exp %96 : vector<8x32xf32>
    %cst_35 = arith.constant 1.000000e+00 : f32
    %98 = vector.broadcast %cst_35 : f32 to vector<8x32xf32>
    %99 = arith.addf %98, %97 : vector<8x32xf32>
    %100 = arith.divf %98, %99 : vector<8x32xf32>
    %101 = arith.mulf %92, %34 : vector<8x32xf32>
    %102 = arith.mulf %86, %94 : vector<8x32xf32>
    %103 = arith.addf %101, %102 : vector<8x32xf32>
    %104 = math.tanh %103 : vector<8x32xf32>
    %105 = arith.mulf %100, %104 : vector<8x32xf32>
    %c0_36 = arith.constant 0 : index
    %c0_37 = arith.constant 0 : index
    %106 = vector.load %arg4[%c0_36, %c0_37] : memref<32x128xf32, #tpu.memory_space<vmem>>, vector<32x128xf32>
    %cst_38 = arith.constant dense<0.000000e+00> : vector<8x128xf32>
    %107 = tpu.matmul %105, %106, %cst_38 {dimension_numbers = #tpu.dot_dimension_numbers<[1], [0], [0], [1], [0, 0, 1, 1], [], []>} : vector<8x32xf32>, vector<32x128xf32>, vector<8x128xf32> -> vector<8x128xf32>
    %c0_39 = arith.constant 0 : index
    %c0_40 = arith.constant 0 : index
    %108 = vector.load %arg5[%c0_39, %c0_40] : memref<32x128xf32, #tpu.memory_space<vmem>>, vector<32x128xf32>
    %cst_41 = arith.constant dense<0.000000e+00> : vector<8x128xf32>
    %109 = tpu.matmul %69, %108, %cst_41 {dimension_numbers = #tpu.dot_dimension_numbers<[1], [0], [0], [1], [0, 0, 1, 1], [], []>} : vector<8x32xf32>, vector<32x128xf32>, vector<8x128xf32> -> vector<8x128xf32>
    %110 = arith.addf %107, %109 : vector<8x128xf32>
    %c0_42 = arith.constant 0 : index
    %c0_43 = arith.constant 0 : index
    %111 = vector.load %arg6[%c0_42, %c0_43] : memref<1x128xf32, #tpu.memory_space<vmem>>, vector<1x128xf32>
    %112 = vector.broadcast %111 : vector<1x128xf32> to vector<8x128xf32>
    %113 = arith.addf %110, %112 : vector<8x128xf32>
    %114 = vector.extract_strided_slice %113 {offsets = [0, 0], sizes = [8, 32], strides = [1, 1]} : vector<8x128xf32> to vector<8x32xf32>
    %115 = arith.negf %114 : vector<8x32xf32>
    %116 = math.exp %115 : vector<8x32xf32>
    %cst_44 = arith.constant 1.000000e+00 : f32
    %117 = vector.broadcast %cst_44 : f32 to vector<8x32xf32>
    %118 = arith.addf %117, %116 : vector<8x32xf32>
    %119 = arith.divf %117, %118 : vector<8x32xf32>
    %120 = vector.extract_strided_slice %113 {offsets = [0, 32], sizes = [8, 32], strides = [1, 1]} : vector<8x128xf32> to vector<8x32xf32>
    %121 = arith.negf %120 : vector<8x32xf32>
    %122 = math.exp %121 : vector<8x32xf32>
    %cst_45 = arith.constant 1.000000e+00 : f32
    %123 = vector.broadcast %cst_45 : f32 to vector<8x32xf32>
    %124 = arith.addf %123, %122 : vector<8x32xf32>
    %125 = arith.divf %123, %124 : vector<8x32xf32>
    %126 = vector.extract_strided_slice %113 {offsets = [0, 64], sizes = [8, 32], strides = [1, 1]} : vector<8x128xf32> to vector<8x32xf32>
    %127 = math.tanh %126 : vector<8x32xf32>
    %128 = vector.extract_strided_slice %113 {offsets = [0, 96], sizes = [8, 32], strides = [1, 1]} : vector<8x128xf32> to vector<8x32xf32>
    %129 = arith.negf %128 : vector<8x32xf32>
    %130 = math.exp %129 : vector<8x32xf32>
    %cst_46 = arith.constant 1.000000e+00 : f32
    %131 = vector.broadcast %cst_46 : f32 to vector<8x32xf32>
    %132 = arith.addf %131, %130 : vector<8x32xf32>
    %133 = arith.divf %131, %132 : vector<8x32xf32>
    %134 = arith.mulf %125, %67 : vector<8x32xf32>
    %135 = arith.mulf %119, %127 : vector<8x32xf32>
    %136 = arith.addf %134, %135 : vector<8x32xf32>
    %137 = math.tanh %136 : vector<8x32xf32>
    %138 = arith.mulf %133, %137 : vector<8x32xf32>
    %c2_i32 = arith.constant 2 : i32
    %139 = arith.index_cast %c2_i32 : i32 to index
    %c0_47 = arith.constant 0 : index
    %c0_48 = arith.constant 0 : index
    %140 = vector.load %arg0[%139, %c0_47, %c0_48] : memref<8x8x4xf32, #tpu.memory_space<vmem>>, vector<1x8x4xf32>
    %141 = vector.shape_cast %140 : vector<1x8x4xf32> to vector<8x4xf32>
    %c0_49 = arith.constant 0 : index
    %c0_50 = arith.constant 0 : index
    %142 = vector.load %arg1[%c0_49, %c0_50] : memref<4x128xf32, #tpu.memory_space<vmem>>, vector<4x128xf32>
    %cst_51 = arith.constant dense<0.000000e+00> : vector<8x128xf32>
    %143 = tpu.matmul %141, %142, %cst_51 {dimension_numbers = #tpu.dot_dimension_numbers<[1], [0], [0], [1], [0, 0, 1, 1], [], []>} : vector<8x4xf32>, vector<4x128xf32>, vector<8x128xf32> -> vector<8x128xf32>
    %c0_52 = arith.constant 0 : index
    %c0_53 = arith.constant 0 : index
    %144 = vector.load %arg2[%c0_52, %c0_53] : memref<32x128xf32, #tpu.memory_space<vmem>>, vector<32x128xf32>
    %cst_54 = arith.constant dense<0.000000e+00> : vector<8x128xf32>
    %145 = tpu.matmul %105, %144, %cst_54 {dimension_numbers = #tpu.dot_dimension_numbers<[1], [0], [0], [1], [0, 0, 1, 1], [], []>} : vector<8x32xf32>, vector<32x128xf32>, vector<8x128xf32> -> vector<8x128xf32>
    %146 = arith.addf %143, %145 : vector<8x128xf32>
    %c0_55 = arith.constant 0 : index
    %c0_56 = arith.constant 0 : index
    %147 = vector.load %arg3[%c0_55, %c0_56] : memref<1x128xf32, #tpu.memory_space<vmem>>, vector<1x128xf32>
    %148 = vector.broadcast %147 : vector<1x128xf32> to vector<8x128xf32>
    %149 = arith.addf %146, %148 : vector<8x128xf32>
    %150 = vector.extract_strided_slice %149 {offsets = [0, 0], sizes = [8, 32], strides = [1, 1]} : vector<8x128xf32> to vector<8x32xf32>
    %151 = arith.negf %150 : vector<8x32xf32>
    %152 = math.exp %151 : vector<8x32xf32>
    %cst_57 = arith.constant 1.000000e+00 : f32
    %153 = vector.broadcast %cst_57 : f32 to vector<8x32xf32>
    %154 = arith.addf %153, %152 : vector<8x32xf32>
    %155 = arith.divf %153, %154 : vector<8x32xf32>
    %156 = vector.extract_strided_slice %149 {offsets = [0, 32], sizes = [8, 32], strides = [1, 1]} : vector<8x128xf32> to vector<8x32xf32>
    %157 = arith.negf %156 : vector<8x32xf32>
    %158 = math.exp %157 : vector<8x32xf32>
    %cst_58 = arith.constant 1.000000e+00 : f32
    %159 = vector.broadcast %cst_58 : f32 to vector<8x32xf32>
    %160 = arith.addf %159, %158 : vector<8x32xf32>
    %161 = arith.divf %159, %160 : vector<8x32xf32>
    %162 = vector.extract_strided_slice %149 {offsets = [0, 64], sizes = [8, 32], strides = [1, 1]} : vector<8x128xf32> to vector<8x32xf32>
    %163 = math.tanh %162 : vector<8x32xf32>
    %164 = vector.extract_strided_slice %149 {offsets = [0, 96], sizes = [8, 32], strides = [1, 1]} : vector<8x128xf32> to vector<8x32xf32>
    %165 = arith.negf %164 : vector<8x32xf32>
    %166 = math.exp %165 : vector<8x32xf32>
    %cst_59 = arith.constant 1.000000e+00 : f32
    %167 = vector.broadcast %cst_59 : f32 to vector<8x32xf32>
    %168 = arith.addf %167, %166 : vector<8x32xf32>
    %169 = arith.divf %167, %168 : vector<8x32xf32>
    %170 = arith.mulf %161, %103 : vector<8x32xf32>
    %171 = arith.mulf %155, %163 : vector<8x32xf32>
    %172 = arith.addf %170, %171 : vector<8x32xf32>
    %173 = math.tanh %172 : vector<8x32xf32>
    %174 = arith.mulf %169, %173 : vector<8x32xf32>
    %c0_60 = arith.constant 0 : index
    %c0_61 = arith.constant 0 : index
    %175 = vector.load %arg4[%c0_60, %c0_61] : memref<32x128xf32, #tpu.memory_space<vmem>>, vector<32x128xf32>
    %cst_62 = arith.constant dense<0.000000e+00> : vector<8x128xf32>
    %176 = tpu.matmul %174, %175, %cst_62 {dimension_numbers = #tpu.dot_dimension_numbers<[1], [0], [0], [1], [0, 0, 1, 1], [], []>} : vector<8x32xf32>, vector<32x128xf32>, vector<8x128xf32> -> vector<8x128xf32>
    %c0_63 = arith.constant 0 : index
    %c0_64 = arith.constant 0 : index
    %177 = vector.load %arg5[%c0_63, %c0_64] : memref<32x128xf32, #tpu.memory_space<vmem>>, vector<32x128xf32>
    %cst_65 = arith.constant dense<0.000000e+00> : vector<8x128xf32>
    %178 = tpu.matmul %138, %177, %cst_65 {dimension_numbers = #tpu.dot_dimension_numbers<[1], [0], [0], [1], [0, 0, 1, 1], [], []>} : vector<8x32xf32>, vector<32x128xf32>, vector<8x128xf32> -> vector<8x128xf32>
    %179 = arith.addf %176, %178 : vector<8x128xf32>
    %c0_66 = arith.constant 0 : index
    %c0_67 = arith.constant 0 : index
    %180 = vector.load %arg6[%c0_66, %c0_67] : memref<1x128xf32, #tpu.memory_space<vmem>>, vector<1x128xf32>
    %181 = vector.broadcast %180 : vector<1x128xf32> to vector<8x128xf32>
    %182 = arith.addf %179, %181 : vector<8x128xf32>
    %183 = vector.extract_strided_slice %182 {offsets = [0, 0], sizes = [8, 32], strides = [1, 1]} : vector<8x128xf32> to vector<8x32xf32>
    %184 = arith.negf %183 : vector<8x32xf32>
    %185 = math.exp %184 : vector<8x32xf32>
    %cst_68 = arith.constant 1.000000e+00 : f32
    %186 = vector.broadcast %cst_68 : f32 to vector<8x32xf32>
    %187 = arith.addf %186, %185 : vector<8x32xf32>
    %188 = arith.divf %186, %187 : vector<8x32xf32>
    %189 = vector.extract_strided_slice %182 {offsets = [0, 32], sizes = [8, 32], strides = [1, 1]} : vector<8x128xf32> to vector<8x32xf32>
    %190 = arith.negf %189 : vector<8x32xf32>
    %191 = math.exp %190 : vector<8x32xf32>
    %cst_69 = arith.constant 1.000000e+00 : f32
    %192 = vector.broadcast %cst_69 : f32 to vector<8x32xf32>
    %193 = arith.addf %192, %191 : vector<8x32xf32>
    %194 = arith.divf %192, %193 : vector<8x32xf32>
    %195 = vector.extract_strided_slice %182 {offsets = [0, 64], sizes = [8, 32], strides = [1, 1]} : vector<8x128xf32> to vector<8x32xf32>
    %196 = math.tanh %195 : vector<8x32xf32>
    %197 = vector.extract_strided_slice %182 {offsets = [0, 96], sizes = [8, 32], strides = [1, 1]} : vector<8x128xf32> to vector<8x32xf32>
    %198 = arith.negf %197 : vector<8x32xf32>
    %199 = math.exp %198 : vector<8x32xf32>
    %cst_70 = arith.constant 1.000000e+00 : f32
    %200 = vector.broadcast %cst_70 : f32 to vector<8x32xf32>
    %201 = arith.addf %200, %199 : vector<8x32xf32>
    %202 = arith.divf %200, %201 : vector<8x32xf32>
    %203 = arith.mulf %194, %136 : vector<8x32xf32>
    %204 = arith.mulf %188, %196 : vector<8x32xf32>
    %205 = arith.addf %203, %204 : vector<8x32xf32>
    %206 = math.tanh %205 : vector<8x32xf32>
    %207 = arith.mulf %202, %206 : vector<8x32xf32>
    %c3_i32 = arith.constant 3 : i32
    %208 = arith.index_cast %c3_i32 : i32 to index
    %c0_71 = arith.constant 0 : index
    %c0_72 = arith.constant 0 : index
    %209 = vector.load %arg0[%208, %c0_71, %c0_72] : memref<8x8x4xf32, #tpu.memory_space<vmem>>, vector<1x8x4xf32>
    %210 = vector.shape_cast %209 : vector<1x8x4xf32> to vector<8x4xf32>
    %c0_73 = arith.constant 0 : index
    %c0_74 = arith.constant 0 : index
    %211 = vector.load %arg1[%c0_73, %c0_74] : memref<4x128xf32, #tpu.memory_space<vmem>>, vector<4x128xf32>
    %cst_75 = arith.constant dense<0.000000e+00> : vector<8x128xf32>
    %212 = tpu.matmul %210, %211, %cst_75 {dimension_numbers = #tpu.dot_dimension_numbers<[1], [0], [0], [1], [0, 0, 1, 1], [], []>} : vector<8x4xf32>, vector<4x128xf32>, vector<8x128xf32> -> vector<8x128xf32>
    %c0_76 = arith.constant 0 : index
    %c0_77 = arith.constant 0 : index
    %213 = vector.load %arg2[%c0_76, %c0_77] : memref<32x128xf32, #tpu.memory_space<vmem>>, vector<32x128xf32>
    %cst_78 = arith.constant dense<0.000000e+00> : vector<8x128xf32>
    %214 = tpu.matmul %174, %213, %cst_78 {dimension_numbers = #tpu.dot_dimension_numbers<[1], [0], [0], [1], [0, 0, 1, 1], [], []>} : vector<8x32xf32>, vector<32x128xf32>, vector<8x128xf32> -> vector<8x128xf32>
    %215 = arith.addf %212, %214 : vector<8x128xf32>
    %c0_79 = arith.constant 0 : index
    %c0_80 = arith.constant 0 : index
    %216 = vector.load %arg3[%c0_79, %c0_80] : memref<1x128xf32, #tpu.memory_space<vmem>>, vector<1x128xf32>
    %217 = vector.broadcast %216 : vector<1x128xf32> to vector<8x128xf32>
    %218 = arith.addf %215, %217 : vector<8x128xf32>
    %219 = vector.extract_strided_slice %218 {offsets = [0, 0], sizes = [8, 32], strides = [1, 1]} : vector<8x128xf32> to vector<8x32xf32>
    %220 = arith.negf %219 : vector<8x32xf32>
    %221 = math.exp %220 : vector<8x32xf32>
    %cst_81 = arith.constant 1.000000e+00 : f32
    %222 = vector.broadcast %cst_81 : f32 to vector<8x32xf32>
    %223 = arith.addf %222, %221 : vector<8x32xf32>
    %224 = arith.divf %222, %223 : vector<8x32xf32>
    %225 = vector.extract_strided_slice %218 {offsets = [0, 32], sizes = [8, 32], strides = [1, 1]} : vector<8x128xf32> to vector<8x32xf32>
    %226 = arith.negf %225 : vector<8x32xf32>
    %227 = math.exp %226 : vector<8x32xf32>
    %cst_82 = arith.constant 1.000000e+00 : f32
    %228 = vector.broadcast %cst_82 : f32 to vector<8x32xf32>
    %229 = arith.addf %228, %227 : vector<8x32xf32>
    %230 = arith.divf %228, %229 : vector<8x32xf32>
    %231 = vector.extract_strided_slice %218 {offsets = [0, 64], sizes = [8, 32], strides = [1, 1]} : vector<8x128xf32> to vector<8x32xf32>
    %232 = math.tanh %231 : vector<8x32xf32>
    %233 = vector.extract_strided_slice %218 {offsets = [0, 96], sizes = [8, 32], strides = [1, 1]} : vector<8x128xf32> to vector<8x32xf32>
    %234 = arith.negf %233 : vector<8x32xf32>
    %235 = math.exp %234 : vector<8x32xf32>
    %cst_83 = arith.constant 1.000000e+00 : f32
    %236 = vector.broadcast %cst_83 : f32 to vector<8x32xf32>
    %237 = arith.addf %236, %235 : vector<8x32xf32>
    %238 = arith.divf %236, %237 : vector<8x32xf32>
    %239 = arith.mulf %230, %172 : vector<8x32xf32>
    %240 = arith.mulf %224, %232 : vector<8x32xf32>
    %241 = arith.addf %239, %240 : vector<8x32xf32>
    %242 = math.tanh %241 : vector<8x32xf32>
    %243 = arith.mulf %238, %242 : vector<8x32xf32>
    %c0_84 = arith.constant 0 : index
    %c0_85 = arith.constant 0 : index
    %244 = vector.load %arg4[%c0_84, %c0_85] : memref<32x128xf32, #tpu.memory_space<vmem>>, vector<32x128xf32>
    %cst_86 = arith.constant dense<0.000000e+00> : vector<8x128xf32>
    %245 = tpu.matmul %243, %244, %cst_86 {dimension_numbers = #tpu.dot_dimension_numbers<[1], [0], [0], [1], [0, 0, 1, 1], [], []>} : vector<8x32xf32>, vector<32x128xf32>, vector<8x128xf32> -> vector<8x128xf32>
    %c0_87 = arith.constant 0 : index
    %c0_88 = arith.constant 0 : index
    %246 = vector.load %arg5[%c0_87, %c0_88] : memref<32x128xf32, #tpu.memory_space<vmem>>, vector<32x128xf32>
    %cst_89 = arith.constant dense<0.000000e+00> : vector<8x128xf32>
    %247 = tpu.matmul %207, %246, %cst_89 {dimension_numbers = #tpu.dot_dimension_numbers<[1], [0], [0], [1], [0, 0, 1, 1], [], []>} : vector<8x32xf32>, vector<32x128xf32>, vector<8x128xf32> -> vector<8x128xf32>
    %248 = arith.addf %245, %247 : vector<8x128xf32>
    %c0_90 = arith.constant 0 : index
    %c0_91 = arith.constant 0 : index
    %249 = vector.load %arg6[%c0_90, %c0_91] : memref<1x128xf32, #tpu.memory_space<vmem>>, vector<1x128xf32>
    %250 = vector.broadcast %249 : vector<1x128xf32> to vector<8x128xf32>
    %251 = arith.addf %248, %250 : vector<8x128xf32>
    %252 = vector.extract_strided_slice %251 {offsets = [0, 0], sizes = [8, 32], strides = [1, 1]} : vector<8x128xf32> to vector<8x32xf32>
    %253 = arith.negf %252 : vector<8x32xf32>
    %254 = math.exp %253 : vector<8x32xf32>
    %cst_92 = arith.constant 1.000000e+00 : f32
    %255 = vector.broadcast %cst_92 : f32 to vector<8x32xf32>
    %256 = arith.addf %255, %254 : vector<8x32xf32>
    %257 = arith.divf %255, %256 : vector<8x32xf32>
    %258 = vector.extract_strided_slice %251 {offsets = [0, 32], sizes = [8, 32], strides = [1, 1]} : vector<8x128xf32> to vector<8x32xf32>
    %259 = arith.negf %258 : vector<8x32xf32>
    %260 = math.exp %259 : vector<8x32xf32>
    %cst_93 = arith.constant 1.000000e+00 : f32
    %261 = vector.broadcast %cst_93 : f32 to vector<8x32xf32>
    %262 = arith.addf %261, %260 : vector<8x32xf32>
    %263 = arith.divf %261, %262 : vector<8x32xf32>
    %264 = vector.extract_strided_slice %251 {offsets = [0, 64], sizes = [8, 32], strides = [1, 1]} : vector<8x128xf32> to vector<8x32xf32>
    %265 = math.tanh %264 : vector<8x32xf32>
    %266 = vector.extract_strided_slice %251 {offsets = [0, 96], sizes = [8, 32], strides = [1, 1]} : vector<8x128xf32> to vector<8x32xf32>
    %267 = arith.negf %266 : vector<8x32xf32>
    %268 = math.exp %267 : vector<8x32xf32>
    %cst_94 = arith.constant 1.000000e+00 : f32
    %269 = vector.broadcast %cst_94 : f32 to vector<8x32xf32>
    %270 = arith.addf %269, %268 : vector<8x32xf32>
    %271 = arith.divf %269, %270 : vector<8x32xf32>
    %272 = arith.mulf %263, %205 : vector<8x32xf32>
    %273 = arith.mulf %257, %265 : vector<8x32xf32>
    %274 = arith.addf %272, %273 : vector<8x32xf32>
    %275 = math.tanh %274 : vector<8x32xf32>
    %276 = arith.mulf %271, %275 : vector<8x32xf32>
    %c4_i32 = arith.constant 4 : i32
    %277 = arith.index_cast %c4_i32 : i32 to index
    %c0_95 = arith.constant 0 : index
    %c0_96 = arith.constant 0 : index
    %278 = vector.load %arg0[%277, %c0_95, %c0_96] : memref<8x8x4xf32, #tpu.memory_space<vmem>>, vector<1x8x4xf32>
    %279 = vector.shape_cast %278 : vector<1x8x4xf32> to vector<8x4xf32>
    %c0_97 = arith.constant 0 : index
    %c0_98 = arith.constant 0 : index
    %280 = vector.load %arg1[%c0_97, %c0_98] : memref<4x128xf32, #tpu.memory_space<vmem>>, vector<4x128xf32>
    %cst_99 = arith.constant dense<0.000000e+00> : vector<8x128xf32>
    %281 = tpu.matmul %279, %280, %cst_99 {dimension_numbers = #tpu.dot_dimension_numbers<[1], [0], [0], [1], [0, 0, 1, 1], [], []>} : vector<8x4xf32>, vector<4x128xf32>, vector<8x128xf32> -> vector<8x128xf32>
    %c0_100 = arith.constant 0 : index
    %c0_101 = arith.constant 0 : index
    %282 = vector.load %arg2[%c0_100, %c0_101] : memref<32x128xf32, #tpu.memory_space<vmem>>, vector<32x128xf32>
    %cst_102 = arith.constant dense<0.000000e+00> : vector<8x128xf32>
    %283 = tpu.matmul %243, %282, %cst_102 {dimension_numbers = #tpu.dot_dimension_numbers<[1], [0], [0], [1], [0, 0, 1, 1], [], []>} : vector<8x32xf32>, vector<32x128xf32>, vector<8x128xf32> -> vector<8x128xf32>
    %284 = arith.addf %281, %283 : vector<8x128xf32>
    %c0_103 = arith.constant 0 : index
    %c0_104 = arith.constant 0 : index
    %285 = vector.load %arg3[%c0_103, %c0_104] : memref<1x128xf32, #tpu.memory_space<vmem>>, vector<1x128xf32>
    %286 = vector.broadcast %285 : vector<1x128xf32> to vector<8x128xf32>
    %287 = arith.addf %284, %286 : vector<8x128xf32>
    %288 = vector.extract_strided_slice %287 {offsets = [0, 0], sizes = [8, 32], strides = [1, 1]} : vector<8x128xf32> to vector<8x32xf32>
    %289 = arith.negf %288 : vector<8x32xf32>
    %290 = math.exp %289 : vector<8x32xf32>
    %cst_105 = arith.constant 1.000000e+00 : f32
    %291 = vector.broadcast %cst_105 : f32 to vector<8x32xf32>
    %292 = arith.addf %291, %290 : vector<8x32xf32>
    %293 = arith.divf %291, %292 : vector<8x32xf32>
    %294 = vector.extract_strided_slice %287 {offsets = [0, 32], sizes = [8, 32], strides = [1, 1]} : vector<8x128xf32> to vector<8x32xf32>
    %295 = arith.negf %294 : vector<8x32xf32>
    %296 = math.exp %295 : vector<8x32xf32>
    %cst_106 = arith.constant 1.000000e+00 : f32
    %297 = vector.broadcast %cst_106 : f32 to vector<8x32xf32>
    %298 = arith.addf %297, %296 : vector<8x32xf32>
    %299 = arith.divf %297, %298 : vector<8x32xf32>
    %300 = vector.extract_strided_slice %287 {offsets = [0, 64], sizes = [8, 32], strides = [1, 1]} : vector<8x128xf32> to vector<8x32xf32>
    %301 = math.tanh %300 : vector<8x32xf32>
    %302 = vector.extract_strided_slice %287 {offsets = [0, 96], sizes = [8, 32], strides = [1, 1]} : vector<8x128xf32> to vector<8x32xf32>
    %303 = arith.negf %302 : vector<8x32xf32>
    %304 = math.exp %303 : vector<8x32xf32>
    %cst_107 = arith.constant 1.000000e+00 : f32
    %305 = vector.broadcast %cst_107 : f32 to vector<8x32xf32>
    %306 = arith.addf %305, %304 : vector<8x32xf32>
    %307 = arith.divf %305, %306 : vector<8x32xf32>
    %308 = arith.mulf %299, %241 : vector<8x32xf32>
    %309 = arith.mulf %293, %301 : vector<8x32xf32>
    %310 = arith.addf %308, %309 : vector<8x32xf32>
    %311 = math.tanh %310 : vector<8x32xf32>
    %312 = arith.mulf %307, %311 : vector<8x32xf32>
    %c0_108 = arith.constant 0 : index
    %c0_109 = arith.constant 0 : index
    %313 = vector.load %arg4[%c0_108, %c0_109] : memref<32x128xf32, #tpu.memory_space<vmem>>, vector<32x128xf32>
    %cst_110 = arith.constant dense<0.000000e+00> : vector<8x128xf32>
    %314 = tpu.matmul %312, %313, %cst_110 {dimension_numbers = #tpu.dot_dimension_numbers<[1], [0], [0], [1], [0, 0, 1, 1], [], []>} : vector<8x32xf32>, vector<32x128xf32>, vector<8x128xf32> -> vector<8x128xf32>
    %c0_111 = arith.constant 0 : index
    %c0_112 = arith.constant 0 : index
    %315 = vector.load %arg5[%c0_111, %c0_112] : memref<32x128xf32, #tpu.memory_space<vmem>>, vector<32x128xf32>
    %cst_113 = arith.constant dense<0.000000e+00> : vector<8x128xf32>
    %316 = tpu.matmul %276, %315, %cst_113 {dimension_numbers = #tpu.dot_dimension_numbers<[1], [0], [0], [1], [0, 0, 1, 1], [], []>} : vector<8x32xf32>, vector<32x128xf32>, vector<8x128xf32> -> vector<8x128xf32>
    %317 = arith.addf %314, %316 : vector<8x128xf32>
    %c0_114 = arith.constant 0 : index
    %c0_115 = arith.constant 0 : index
    %318 = vector.load %arg6[%c0_114, %c0_115] : memref<1x128xf32, #tpu.memory_space<vmem>>, vector<1x128xf32>
    %319 = vector.broadcast %318 : vector<1x128xf32> to vector<8x128xf32>
    %320 = arith.addf %317, %319 : vector<8x128xf32>
    %321 = vector.extract_strided_slice %320 {offsets = [0, 0], sizes = [8, 32], strides = [1, 1]} : vector<8x128xf32> to vector<8x32xf32>
    %322 = arith.negf %321 : vector<8x32xf32>
    %323 = math.exp %322 : vector<8x32xf32>
    %cst_116 = arith.constant 1.000000e+00 : f32
    %324 = vector.broadcast %cst_116 : f32 to vector<8x32xf32>
    %325 = arith.addf %324, %323 : vector<8x32xf32>
    %326 = arith.divf %324, %325 : vector<8x32xf32>
    %327 = vector.extract_strided_slice %320 {offsets = [0, 32], sizes = [8, 32], strides = [1, 1]} : vector<8x128xf32> to vector<8x32xf32>
    %328 = arith.negf %327 : vector<8x32xf32>
    %329 = math.exp %328 : vector<8x32xf32>
    %cst_117 = arith.constant 1.000000e+00 : f32
    %330 = vector.broadcast %cst_117 : f32 to vector<8x32xf32>
    %331 = arith.addf %330, %329 : vector<8x32xf32>
    %332 = arith.divf %330, %331 : vector<8x32xf32>
    %333 = vector.extract_strided_slice %320 {offsets = [0, 64], sizes = [8, 32], strides = [1, 1]} : vector<8x128xf32> to vector<8x32xf32>
    %334 = math.tanh %333 : vector<8x32xf32>
    %335 = vector.extract_strided_slice %320 {offsets = [0, 96], sizes = [8, 32], strides = [1, 1]} : vector<8x128xf32> to vector<8x32xf32>
    %336 = arith.negf %335 : vector<8x32xf32>
    %337 = math.exp %336 : vector<8x32xf32>
    %cst_118 = arith.constant 1.000000e+00 : f32
    %338 = vector.broadcast %cst_118 : f32 to vector<8x32xf32>
    %339 = arith.addf %338, %337 : vector<8x32xf32>
    %340 = arith.divf %338, %339 : vector<8x32xf32>
    %341 = arith.mulf %332, %274 : vector<8x32xf32>
    %342 = arith.mulf %326, %334 : vector<8x32xf32>
    %343 = arith.addf %341, %342 : vector<8x32xf32>
    %344 = math.tanh %343 : vector<8x32xf32>
    %345 = arith.mulf %340, %344 : vector<8x32xf32>
    %c5_i32 = arith.constant 5 : i32
    %346 = arith.index_cast %c5_i32 : i32 to index
    %c0_119 = arith.constant 0 : index
    %c0_120 = arith.constant 0 : index
    %347 = vector.load %arg0[%346, %c0_119, %c0_120] : memref<8x8x4xf32, #tpu.memory_space<vmem>>, vector<1x8x4xf32>
    %348 = vector.shape_cast %347 : vector<1x8x4xf32> to vector<8x4xf32>
    %c0_121 = arith.constant 0 : index
    %c0_122 = arith.constant 0 : index
    %349 = vector.load %arg1[%c0_121, %c0_122] : memref<4x128xf32, #tpu.memory_space<vmem>>, vector<4x128xf32>
    %cst_123 = arith.constant dense<0.000000e+00> : vector<8x128xf32>
    %350 = tpu.matmul %348, %349, %cst_123 {dimension_numbers = #tpu.dot_dimension_numbers<[1], [0], [0], [1], [0, 0, 1, 1], [], []>} : vector<8x4xf32>, vector<4x128xf32>, vector<8x128xf32> -> vector<8x128xf32>
    %c0_124 = arith.constant 0 : index
    %c0_125 = arith.constant 0 : index
    %351 = vector.load %arg2[%c0_124, %c0_125] : memref<32x128xf32, #tpu.memory_space<vmem>>, vector<32x128xf32>
    %cst_126 = arith.constant dense<0.000000e+00> : vector<8x128xf32>
    %352 = tpu.matmul %312, %351, %cst_126 {dimension_numbers = #tpu.dot_dimension_numbers<[1], [0], [0], [1], [0, 0, 1, 1], [], []>} : vector<8x32xf32>, vector<32x128xf32>, vector<8x128xf32> -> vector<8x128xf32>
    %353 = arith.addf %350, %352 : vector<8x128xf32>
    %c0_127 = arith.constant 0 : index
    %c0_128 = arith.constant 0 : index
    %354 = vector.load %arg3[%c0_127, %c0_128] : memref<1x128xf32, #tpu.memory_space<vmem>>, vector<1x128xf32>
    %355 = vector.broadcast %354 : vector<1x128xf32> to vector<8x128xf32>
    %356 = arith.addf %353, %355 : vector<8x128xf32>
    %357 = vector.extract_strided_slice %356 {offsets = [0, 0], sizes = [8, 32], strides = [1, 1]} : vector<8x128xf32> to vector<8x32xf32>
    %358 = arith.negf %357 : vector<8x32xf32>
    %359 = math.exp %358 : vector<8x32xf32>
    %cst_129 = arith.constant 1.000000e+00 : f32
    %360 = vector.broadcast %cst_129 : f32 to vector<8x32xf32>
    %361 = arith.addf %360, %359 : vector<8x32xf32>
    %362 = arith.divf %360, %361 : vector<8x32xf32>
    %363 = vector.extract_strided_slice %356 {offsets = [0, 32], sizes = [8, 32], strides = [1, 1]} : vector<8x128xf32> to vector<8x32xf32>
    %364 = arith.negf %363 : vector<8x32xf32>
    %365 = math.exp %364 : vector<8x32xf32>
    %cst_130 = arith.constant 1.000000e+00 : f32
    %366 = vector.broadcast %cst_130 : f32 to vector<8x32xf32>
    %367 = arith.addf %366, %365 : vector<8x32xf32>
    %368 = arith.divf %366, %367 : vector<8x32xf32>
    %369 = vector.extract_strided_slice %356 {offsets = [0, 64], sizes = [8, 32], strides = [1, 1]} : vector<8x128xf32> to vector<8x32xf32>
    %370 = math.tanh %369 : vector<8x32xf32>
    %371 = vector.extract_strided_slice %356 {offsets = [0, 96], sizes = [8, 32], strides = [1, 1]} : vector<8x128xf32> to vector<8x32xf32>
    %372 = arith.negf %371 : vector<8x32xf32>
    %373 = math.exp %372 : vector<8x32xf32>
    %cst_131 = arith.constant 1.000000e+00 : f32
    %374 = vector.broadcast %cst_131 : f32 to vector<8x32xf32>
    %375 = arith.addf %374, %373 : vector<8x32xf32>
    %376 = arith.divf %374, %375 : vector<8x32xf32>
    %377 = arith.mulf %368, %310 : vector<8x32xf32>
    %378 = arith.mulf %362, %370 : vector<8x32xf32>
    %379 = arith.addf %377, %378 : vector<8x32xf32>
    %380 = math.tanh %379 : vector<8x32xf32>
    %381 = arith.mulf %376, %380 : vector<8x32xf32>
    %c0_132 = arith.constant 0 : index
    %c0_133 = arith.constant 0 : index
    %382 = vector.load %arg4[%c0_132, %c0_133] : memref<32x128xf32, #tpu.memory_space<vmem>>, vector<32x128xf32>
    %cst_134 = arith.constant dense<0.000000e+00> : vector<8x128xf32>
    %383 = tpu.matmul %381, %382, %cst_134 {dimension_numbers = #tpu.dot_dimension_numbers<[1], [0], [0], [1], [0, 0, 1, 1], [], []>} : vector<8x32xf32>, vector<32x128xf32>, vector<8x128xf32> -> vector<8x128xf32>
    %c0_135 = arith.constant 0 : index
    %c0_136 = arith.constant 0 : index
    %384 = vector.load %arg5[%c0_135, %c0_136] : memref<32x128xf32, #tpu.memory_space<vmem>>, vector<32x128xf32>
    %cst_137 = arith.constant dense<0.000000e+00> : vector<8x128xf32>
    %385 = tpu.matmul %345, %384, %cst_137 {dimension_numbers = #tpu.dot_dimension_numbers<[1], [0], [0], [1], [0, 0, 1, 1], [], []>} : vector<8x32xf32>, vector<32x128xf32>, vector<8x128xf32> -> vector<8x128xf32>
    %386 = arith.addf %383, %385 : vector<8x128xf32>
    %c0_138 = arith.constant 0 : index
    %c0_139 = arith.constant 0 : index
    %387 = vector.load %arg6[%c0_138, %c0_139] : memref<1x128xf32, #tpu.memory_space<vmem>>, vector<1x128xf32>
    %388 = vector.broadcast %387 : vector<1x128xf32> to vector<8x128xf32>
    %389 = arith.addf %386, %388 : vector<8x128xf32>
    %390 = vector.extract_strided_slice %389 {offsets = [0, 0], sizes = [8, 32], strides = [1, 1]} : vector<8x128xf32> to vector<8x32xf32>
    %391 = arith.negf %390 : vector<8x32xf32>
    %392 = math.exp %391 : vector<8x32xf32>
    %cst_140 = arith.constant 1.000000e+00 : f32
    %393 = vector.broadcast %cst_140 : f32 to vector<8x32xf32>
    %394 = arith.addf %393, %392 : vector<8x32xf32>
    %395 = arith.divf %393, %394 : vector<8x32xf32>
    %396 = vector.extract_strided_slice %389 {offsets = [0, 32], sizes = [8, 32], strides = [1, 1]} : vector<8x128xf32> to vector<8x32xf32>
    %397 = arith.negf %396 : vector<8x32xf32>
    %398 = math.exp %397 : vector<8x32xf32>
    %cst_141 = arith.constant 1.000000e+00 : f32
    %399 = vector.broadcast %cst_141 : f32 to vector<8x32xf32>
    %400 = arith.addf %399, %398 : vector<8x32xf32>
    %401 = arith.divf %399, %400 : vector<8x32xf32>
    %402 = vector.extract_strided_slice %389 {offsets = [0, 64], sizes = [8, 32], strides = [1, 1]} : vector<8x128xf32> to vector<8x32xf32>
    %403 = math.tanh %402 : vector<8x32xf32>
    %404 = vector.extract_strided_slice %389 {offsets = [0, 96], sizes = [8, 32], strides = [1, 1]} : vector<8x128xf32> to vector<8x32xf32>
    %405 = arith.negf %404 : vector<8x32xf32>
    %406 = math.exp %405 : vector<8x32xf32>
    %cst_142 = arith.constant 1.000000e+00 : f32
    %407 = vector.broadcast %cst_142 : f32 to vector<8x32xf32>
    %408 = arith.addf %407, %406 : vector<8x32xf32>
    %409 = arith.divf %407, %408 : vector<8x32xf32>
    %410 = arith.mulf %401, %343 : vector<8x32xf32>
    %411 = arith.mulf %395, %403 : vector<8x32xf32>
    %412 = arith.addf %410, %411 : vector<8x32xf32>
    %413 = math.tanh %412 : vector<8x32xf32>
    %414 = arith.mulf %409, %413 : vector<8x32xf32>
    %c6_i32 = arith.constant 6 : i32
    %415 = arith.index_cast %c6_i32 : i32 to index
    %c0_143 = arith.constant 0 : index
    %c0_144 = arith.constant 0 : index
    %416 = vector.load %arg0[%415, %c0_143, %c0_144] : memref<8x8x4xf32, #tpu.memory_space<vmem>>, vector<1x8x4xf32>
    %417 = vector.shape_cast %416 : vector<1x8x4xf32> to vector<8x4xf32>
    %c0_145 = arith.constant 0 : index
    %c0_146 = arith.constant 0 : index
    %418 = vector.load %arg1[%c0_145, %c0_146] : memref<4x128xf32, #tpu.memory_space<vmem>>, vector<4x128xf32>
    %cst_147 = arith.constant dense<0.000000e+00> : vector<8x128xf32>
    %419 = tpu.matmul %417, %418, %cst_147 {dimension_numbers = #tpu.dot_dimension_numbers<[1], [0], [0], [1], [0, 0, 1, 1], [], []>} : vector<8x4xf32>, vector<4x128xf32>, vector<8x128xf32> -> vector<8x128xf32>
    %c0_148 = arith.constant 0 : index
    %c0_149 = arith.constant 0 : index
    %420 = vector.load %arg2[%c0_148, %c0_149] : memref<32x128xf32, #tpu.memory_space<vmem>>, vector<32x128xf32>
    %cst_150 = arith.constant dense<0.000000e+00> : vector<8x128xf32>
    %421 = tpu.matmul %381, %420, %cst_150 {dimension_numbers = #tpu.dot_dimension_numbers<[1], [0], [0], [1], [0, 0, 1, 1], [], []>} : vector<8x32xf32>, vector<32x128xf32>, vector<8x128xf32> -> vector<8x128xf32>
    %422 = arith.addf %419, %421 : vector<8x128xf32>
    %c0_151 = arith.constant 0 : index
    %c0_152 = arith.constant 0 : index
    %423 = vector.load %arg3[%c0_151, %c0_152] : memref<1x128xf32, #tpu.memory_space<vmem>>, vector<1x128xf32>
    %424 = vector.broadcast %423 : vector<1x128xf32> to vector<8x128xf32>
    %425 = arith.addf %422, %424 : vector<8x128xf32>
    %426 = vector.extract_strided_slice %425 {offsets = [0, 0], sizes = [8, 32], strides = [1, 1]} : vector<8x128xf32> to vector<8x32xf32>
    %427 = arith.negf %426 : vector<8x32xf32>
    %428 = math.exp %427 : vector<8x32xf32>
    %cst_153 = arith.constant 1.000000e+00 : f32
    %429 = vector.broadcast %cst_153 : f32 to vector<8x32xf32>
    %430 = arith.addf %429, %428 : vector<8x32xf32>
    %431 = arith.divf %429, %430 : vector<8x32xf32>
    %432 = vector.extract_strided_slice %425 {offsets = [0, 32], sizes = [8, 32], strides = [1, 1]} : vector<8x128xf32> to vector<8x32xf32>
    %433 = arith.negf %432 : vector<8x32xf32>
    %434 = math.exp %433 : vector<8x32xf32>
    %cst_154 = arith.constant 1.000000e+00 : f32
    %435 = vector.broadcast %cst_154 : f32 to vector<8x32xf32>
    %436 = arith.addf %435, %434 : vector<8x32xf32>
    %437 = arith.divf %435, %436 : vector<8x32xf32>
    %438 = vector.extract_strided_slice %425 {offsets = [0, 64], sizes = [8, 32], strides = [1, 1]} : vector<8x128xf32> to vector<8x32xf32>
    %439 = math.tanh %438 : vector<8x32xf32>
    %440 = vector.extract_strided_slice %425 {offsets = [0, 96], sizes = [8, 32], strides = [1, 1]} : vector<8x128xf32> to vector<8x32xf32>
    %441 = arith.negf %440 : vector<8x32xf32>
    %442 = math.exp %441 : vector<8x32xf32>
    %cst_155 = arith.constant 1.000000e+00 : f32
    %443 = vector.broadcast %cst_155 : f32 to vector<8x32xf32>
    %444 = arith.addf %443, %442 : vector<8x32xf32>
    %445 = arith.divf %443, %444 : vector<8x32xf32>
    %446 = arith.mulf %437, %379 : vector<8x32xf32>
    %447 = arith.mulf %431, %439 : vector<8x32xf32>
    %448 = arith.addf %446, %447 : vector<8x32xf32>
    %449 = math.tanh %448 : vector<8x32xf32>
    %450 = arith.mulf %445, %449 : vector<8x32xf32>
    %c0_156 = arith.constant 0 : index
    %c0_157 = arith.constant 0 : index
    %451 = vector.load %arg4[%c0_156, %c0_157] : memref<32x128xf32, #tpu.memory_space<vmem>>, vector<32x128xf32>
    %cst_158 = arith.constant dense<0.000000e+00> : vector<8x128xf32>
    %452 = tpu.matmul %450, %451, %cst_158 {dimension_numbers = #tpu.dot_dimension_numbers<[1], [0], [0], [1], [0, 0, 1, 1], [], []>} : vector<8x32xf32>, vector<32x128xf32>, vector<8x128xf32> -> vector<8x128xf32>
    %c0_159 = arith.constant 0 : index
    %c0_160 = arith.constant 0 : index
    %453 = vector.load %arg5[%c0_159, %c0_160] : memref<32x128xf32, #tpu.memory_space<vmem>>, vector<32x128xf32>
    %cst_161 = arith.constant dense<0.000000e+00> : vector<8x128xf32>
    %454 = tpu.matmul %414, %453, %cst_161 {dimension_numbers = #tpu.dot_dimension_numbers<[1], [0], [0], [1], [0, 0, 1, 1], [], []>} : vector<8x32xf32>, vector<32x128xf32>, vector<8x128xf32> -> vector<8x128xf32>
    %455 = arith.addf %452, %454 : vector<8x128xf32>
    %c0_162 = arith.constant 0 : index
    %c0_163 = arith.constant 0 : index
    %456 = vector.load %arg6[%c0_162, %c0_163] : memref<1x128xf32, #tpu.memory_space<vmem>>, vector<1x128xf32>
    %457 = vector.broadcast %456 : vector<1x128xf32> to vector<8x128xf32>
    %458 = arith.addf %455, %457 : vector<8x128xf32>
    %459 = vector.extract_strided_slice %458 {offsets = [0, 0], sizes = [8, 32], strides = [1, 1]} : vector<8x128xf32> to vector<8x32xf32>
    %460 = arith.negf %459 : vector<8x32xf32>
    %461 = math.exp %460 : vector<8x32xf32>
    %cst_164 = arith.constant 1.000000e+00 : f32
    %462 = vector.broadcast %cst_164 : f32 to vector<8x32xf32>
    %463 = arith.addf %462, %461 : vector<8x32xf32>
    %464 = arith.divf %462, %463 : vector<8x32xf32>
    %465 = vector.extract_strided_slice %458 {offsets = [0, 32], sizes = [8, 32], strides = [1, 1]} : vector<8x128xf32> to vector<8x32xf32>
    %466 = arith.negf %465 : vector<8x32xf32>
    %467 = math.exp %466 : vector<8x32xf32>
    %cst_165 = arith.constant 1.000000e+00 : f32
    %468 = vector.broadcast %cst_165 : f32 to vector<8x32xf32>
    %469 = arith.addf %468, %467 : vector<8x32xf32>
    %470 = arith.divf %468, %469 : vector<8x32xf32>
    %471 = vector.extract_strided_slice %458 {offsets = [0, 64], sizes = [8, 32], strides = [1, 1]} : vector<8x128xf32> to vector<8x32xf32>
    %472 = math.tanh %471 : vector<8x32xf32>
    %473 = vector.extract_strided_slice %458 {offsets = [0, 96], sizes = [8, 32], strides = [1, 1]} : vector<8x128xf32> to vector<8x32xf32>
    %474 = arith.negf %473 : vector<8x32xf32>
    %475 = math.exp %474 : vector<8x32xf32>
    %cst_166 = arith.constant 1.000000e+00 : f32
    %476 = vector.broadcast %cst_166 : f32 to vector<8x32xf32>
    %477 = arith.addf %476, %475 : vector<8x32xf32>
    %478 = arith.divf %476, %477 : vector<8x32xf32>
    %479 = arith.mulf %470, %412 : vector<8x32xf32>
    %480 = arith.mulf %464, %472 : vector<8x32xf32>
    %481 = arith.addf %479, %480 : vector<8x32xf32>
    %482 = math.tanh %481 : vector<8x32xf32>
    %483 = arith.mulf %478, %482 : vector<8x32xf32>
    %c7_i32 = arith.constant 7 : i32
    %484 = arith.index_cast %c7_i32 : i32 to index
    %c0_167 = arith.constant 0 : index
    %c0_168 = arith.constant 0 : index
    %485 = vector.load %arg0[%484, %c0_167, %c0_168] : memref<8x8x4xf32, #tpu.memory_space<vmem>>, vector<1x8x4xf32>
    %486 = vector.shape_cast %485 : vector<1x8x4xf32> to vector<8x4xf32>
    %c0_169 = arith.constant 0 : index
    %c0_170 = arith.constant 0 : index
    %487 = vector.load %arg1[%c0_169, %c0_170] : memref<4x128xf32, #tpu.memory_space<vmem>>, vector<4x128xf32>
    %cst_171 = arith.constant dense<0.000000e+00> : vector<8x128xf32>
    %488 = tpu.matmul %486, %487, %cst_171 {dimension_numbers = #tpu.dot_dimension_numbers<[1], [0], [0], [1], [0, 0, 1, 1], [], []>} : vector<8x4xf32>, vector<4x128xf32>, vector<8x128xf32> -> vector<8x128xf32>
    %c0_172 = arith.constant 0 : index
    %c0_173 = arith.constant 0 : index
    %489 = vector.load %arg2[%c0_172, %c0_173] : memref<32x128xf32, #tpu.memory_space<vmem>>, vector<32x128xf32>
    %cst_174 = arith.constant dense<0.000000e+00> : vector<8x128xf32>
    %490 = tpu.matmul %450, %489, %cst_174 {dimension_numbers = #tpu.dot_dimension_numbers<[1], [0], [0], [1], [0, 0, 1, 1], [], []>} : vector<8x32xf32>, vector<32x128xf32>, vector<8x128xf32> -> vector<8x128xf32>
    %491 = arith.addf %488, %490 : vector<8x128xf32>
    %c0_175 = arith.constant 0 : index
    %c0_176 = arith.constant 0 : index
    %492 = vector.load %arg3[%c0_175, %c0_176] : memref<1x128xf32, #tpu.memory_space<vmem>>, vector<1x128xf32>
    %493 = vector.broadcast %492 : vector<1x128xf32> to vector<8x128xf32>
    %494 = arith.addf %491, %493 : vector<8x128xf32>
    %495 = vector.extract_strided_slice %494 {offsets = [0, 0], sizes = [8, 32], strides = [1, 1]} : vector<8x128xf32> to vector<8x32xf32>
    %496 = arith.negf %495 : vector<8x32xf32>
    %497 = math.exp %496 : vector<8x32xf32>
    %cst_177 = arith.constant 1.000000e+00 : f32
    %498 = vector.broadcast %cst_177 : f32 to vector<8x32xf32>
    %499 = arith.addf %498, %497 : vector<8x32xf32>
    %500 = arith.divf %498, %499 : vector<8x32xf32>
    %501 = vector.extract_strided_slice %494 {offsets = [0, 32], sizes = [8, 32], strides = [1, 1]} : vector<8x128xf32> to vector<8x32xf32>
    %502 = arith.negf %501 : vector<8x32xf32>
    %503 = math.exp %502 : vector<8x32xf32>
    %cst_178 = arith.constant 1.000000e+00 : f32
    %504 = vector.broadcast %cst_178 : f32 to vector<8x32xf32>
    %505 = arith.addf %504, %503 : vector<8x32xf32>
    %506 = arith.divf %504, %505 : vector<8x32xf32>
    %507 = vector.extract_strided_slice %494 {offsets = [0, 64], sizes = [8, 32], strides = [1, 1]} : vector<8x128xf32> to vector<8x32xf32>
    %508 = math.tanh %507 : vector<8x32xf32>
    %509 = vector.extract_strided_slice %494 {offsets = [0, 96], sizes = [8, 32], strides = [1, 1]} : vector<8x128xf32> to vector<8x32xf32>
    %510 = arith.negf %509 : vector<8x32xf32>
    %511 = math.exp %510 : vector<8x32xf32>
    %cst_179 = arith.constant 1.000000e+00 : f32
    %512 = vector.broadcast %cst_179 : f32 to vector<8x32xf32>
    %513 = arith.addf %512, %511 : vector<8x32xf32>
    %514 = arith.divf %512, %513 : vector<8x32xf32>
    %515 = arith.mulf %506, %448 : vector<8x32xf32>
    %516 = arith.mulf %500, %508 : vector<8x32xf32>
    %517 = arith.addf %515, %516 : vector<8x32xf32>
    %518 = math.tanh %517 : vector<8x32xf32>
    %519 = arith.mulf %514, %518 : vector<8x32xf32>
    %c0_180 = arith.constant 0 : index
    %c0_181 = arith.constant 0 : index
    %520 = vector.load %arg4[%c0_180, %c0_181] : memref<32x128xf32, #tpu.memory_space<vmem>>, vector<32x128xf32>
    %cst_182 = arith.constant dense<0.000000e+00> : vector<8x128xf32>
    %521 = tpu.matmul %519, %520, %cst_182 {dimension_numbers = #tpu.dot_dimension_numbers<[1], [0], [0], [1], [0, 0, 1, 1], [], []>} : vector<8x32xf32>, vector<32x128xf32>, vector<8x128xf32> -> vector<8x128xf32>
    %c0_183 = arith.constant 0 : index
    %c0_184 = arith.constant 0 : index
    %522 = vector.load %arg5[%c0_183, %c0_184] : memref<32x128xf32, #tpu.memory_space<vmem>>, vector<32x128xf32>
    %cst_185 = arith.constant dense<0.000000e+00> : vector<8x128xf32>
    %523 = tpu.matmul %483, %522, %cst_185 {dimension_numbers = #tpu.dot_dimension_numbers<[1], [0], [0], [1], [0, 0, 1, 1], [], []>} : vector<8x32xf32>, vector<32x128xf32>, vector<8x128xf32> -> vector<8x128xf32>
    %524 = arith.addf %521, %523 : vector<8x128xf32>
    %c0_186 = arith.constant 0 : index
    %c0_187 = arith.constant 0 : index
    %525 = vector.load %arg6[%c0_186, %c0_187] : memref<1x128xf32, #tpu.memory_space<vmem>>, vector<1x128xf32>
    %526 = vector.broadcast %525 : vector<1x128xf32> to vector<8x128xf32>
    %527 = arith.addf %524, %526 : vector<8x128xf32>
    %528 = vector.extract_strided_slice %527 {offsets = [0, 0], sizes = [8, 32], strides = [1, 1]} : vector<8x128xf32> to vector<8x32xf32>
    %529 = arith.negf %528 : vector<8x32xf32>
    %530 = math.exp %529 : vector<8x32xf32>
    %cst_188 = arith.constant 1.000000e+00 : f32
    %531 = vector.broadcast %cst_188 : f32 to vector<8x32xf32>
    %532 = arith.addf %531, %530 : vector<8x32xf32>
    %533 = arith.divf %531, %532 : vector<8x32xf32>
    %534 = vector.extract_strided_slice %527 {offsets = [0, 32], sizes = [8, 32], strides = [1, 1]} : vector<8x128xf32> to vector<8x32xf32>
    %535 = arith.negf %534 : vector<8x32xf32>
    %536 = math.exp %535 : vector<8x32xf32>
    %cst_189 = arith.constant 1.000000e+00 : f32
    %537 = vector.broadcast %cst_189 : f32 to vector<8x32xf32>
    %538 = arith.addf %537, %536 : vector<8x32xf32>
    %539 = arith.divf %537, %538 : vector<8x32xf32>
    %540 = vector.extract_strided_slice %527 {offsets = [0, 64], sizes = [8, 32], strides = [1, 1]} : vector<8x128xf32> to vector<8x32xf32>
    %541 = math.tanh %540 : vector<8x32xf32>
    %542 = vector.extract_strided_slice %527 {offsets = [0, 96], sizes = [8, 32], strides = [1, 1]} : vector<8x128xf32> to vector<8x32xf32>
    %543 = arith.negf %542 : vector<8x32xf32>
    %544 = math.exp %543 : vector<8x32xf32>
    %cst_190 = arith.constant 1.000000e+00 : f32
    %545 = vector.broadcast %cst_190 : f32 to vector<8x32xf32>
    %546 = arith.addf %545, %544 : vector<8x32xf32>
    %547 = arith.divf %545, %546 : vector<8x32xf32>
    %548 = arith.mulf %539, %481 : vector<8x32xf32>
    %549 = arith.mulf %533, %541 : vector<8x32xf32>
    %550 = arith.addf %548, %549 : vector<8x32xf32>
    %551 = math.tanh %550 : vector<8x32xf32>
    %552 = arith.mulf %547, %551 : vector<8x32xf32>
    %c8_i32 = arith.constant 8 : i32
    %c0_191 = arith.constant 0 : index
    %c0_192 = arith.constant 0 : index
    %553 = vector.load %arg13[%c0_191, %c0_192] : memref<1x32xf32, #tpu.memory_space<vmem>>, vector<1x32xf32>
    %c0_193 = arith.constant 0 : index
    %c0_194 = arith.constant 0 : index
    %554 = memref.load %arg14[%c0_193, %c0_194] : memref<1x1xf32, #tpu.memory_space<smem>>
    %c0_195 = arith.constant 0 : index
    %c0_196 = arith.constant 0 : index
    %555 = vector.load %arg7[%c0_195, %c0_196] : memref<4x128xf32, #tpu.memory_space<vmem>>, vector<1x128xf32>
    %c7 = arith.constant 7 : index
    %c0_197 = arith.constant 0 : index
    %c0_198 = arith.constant 0 : index
    %556 = vector.load %arg0[%c7, %c0_197, %c0_198] : memref<8x8x4xf32, #tpu.memory_space<vmem>>, vector<1x8x4xf32>
    %557 = vector.shape_cast %556 : vector<1x8x4xf32> to vector<8x4xf32>
    %c0_199 = arith.constant 0 : index
    %c0_200 = arith.constant 0 : index
    %558 = vector.load %arg7[%c0_199, %c0_200] : memref<4x128xf32, #tpu.memory_space<vmem>>, vector<4x128xf32>
    %cst_201 = arith.constant dense<0.000000e+00> : vector<8x128xf32>
    %559 = tpu.matmul %557, %558, %cst_201 {dimension_numbers = #tpu.dot_dimension_numbers<[1], [0], [0], [1], [0, 0, 1, 1], [], []>} : vector<8x4xf32>, vector<4x128xf32>, vector<8x128xf32> -> vector<8x128xf32>
    %c0_202 = arith.constant 0 : index
    %c0_203 = arith.constant 0 : index
    %560 = vector.load %arg8[%c0_202, %c0_203] : memref<32x128xf32, #tpu.memory_space<vmem>>, vector<32x128xf32>
    %cst_204 = arith.constant dense<0.000000e+00> : vector<8x128xf32>
    %561 = tpu.matmul %519, %560, %cst_204 {dimension_numbers = #tpu.dot_dimension_numbers<[1], [0], [0], [1], [0, 0, 1, 1], [], []>} : vector<8x32xf32>, vector<32x128xf32>, vector<8x128xf32> -> vector<8x128xf32>
    %562 = arith.addf %559, %561 : vector<8x128xf32>
    %c0_205 = arith.constant 0 : index
    %c0_206 = arith.constant 0 : index
    %563 = vector.load %arg9[%c0_205, %c0_206] : memref<1x128xf32, #tpu.memory_space<vmem>>, vector<1x128xf32>
    %564 = vector.broadcast %563 : vector<1x128xf32> to vector<8x128xf32>
    %565 = arith.addf %562, %564 : vector<8x128xf32>
    %566 = vector.extract_strided_slice %565 {offsets = [0, 0], sizes = [8, 32], strides = [1, 1]} : vector<8x128xf32> to vector<8x32xf32>
    %567 = arith.negf %566 : vector<8x32xf32>
    %568 = math.exp %567 : vector<8x32xf32>
    %cst_207 = arith.constant 1.000000e+00 : f32
    %569 = vector.broadcast %cst_207 : f32 to vector<8x32xf32>
    %570 = arith.addf %569, %568 : vector<8x32xf32>
    %571 = arith.divf %569, %570 : vector<8x32xf32>
    %572 = vector.extract_strided_slice %565 {offsets = [0, 32], sizes = [8, 32], strides = [1, 1]} : vector<8x128xf32> to vector<8x32xf32>
    %573 = arith.negf %572 : vector<8x32xf32>
    %574 = math.exp %573 : vector<8x32xf32>
    %cst_208 = arith.constant 1.000000e+00 : f32
    %575 = vector.broadcast %cst_208 : f32 to vector<8x32xf32>
    %576 = arith.addf %575, %574 : vector<8x32xf32>
    %577 = arith.divf %575, %576 : vector<8x32xf32>
    %578 = vector.extract_strided_slice %565 {offsets = [0, 64], sizes = [8, 32], strides = [1, 1]} : vector<8x128xf32> to vector<8x32xf32>
    %579 = math.tanh %578 : vector<8x32xf32>
    %580 = vector.extract_strided_slice %565 {offsets = [0, 96], sizes = [8, 32], strides = [1, 1]} : vector<8x128xf32> to vector<8x32xf32>
    %581 = arith.negf %580 : vector<8x32xf32>
    %582 = math.exp %581 : vector<8x32xf32>
    %cst_209 = arith.constant 1.000000e+00 : f32
    %583 = vector.broadcast %cst_209 : f32 to vector<8x32xf32>
    %584 = arith.addf %583, %582 : vector<8x32xf32>
    %585 = arith.divf %583, %584 : vector<8x32xf32>
    %586 = arith.mulf %577, %517 : vector<8x32xf32>
    %587 = arith.mulf %571, %579 : vector<8x32xf32>
    %588 = arith.addf %586, %587 : vector<8x32xf32>
    %589 = math.tanh %588 : vector<8x32xf32>
    %590 = arith.mulf %585, %589 : vector<8x32xf32>
    %c0_210 = arith.constant 0 : index
    %c0_211 = arith.constant 0 : index
    %591 = vector.load %arg10[%c0_210, %c0_211] : memref<32x128xf32, #tpu.memory_space<vmem>>, vector<32x128xf32>
    %cst_212 = arith.constant dense<0.000000e+00> : vector<8x128xf32>
    %592 = tpu.matmul %590, %591, %cst_212 {dimension_numbers = #tpu.dot_dimension_numbers<[1], [0], [0], [1], [0, 0, 1, 1], [], []>} : vector<8x32xf32>, vector<32x128xf32>, vector<8x128xf32> -> vector<8x128xf32>
    %c0_213 = arith.constant 0 : index
    %c0_214 = arith.constant 0 : index
    %593 = vector.load %arg11[%c0_213, %c0_214] : memref<32x128xf32, #tpu.memory_space<vmem>>, vector<32x128xf32>
    %cst_215 = arith.constant dense<0.000000e+00> : vector<8x128xf32>
    %594 = tpu.matmul %552, %593, %cst_215 {dimension_numbers = #tpu.dot_dimension_numbers<[1], [0], [0], [1], [0, 0, 1, 1], [], []>} : vector<8x32xf32>, vector<32x128xf32>, vector<8x128xf32> -> vector<8x128xf32>
    %595 = arith.addf %592, %594 : vector<8x128xf32>
    %c0_216 = arith.constant 0 : index
    %c0_217 = arith.constant 0 : index
    %596 = vector.load %arg12[%c0_216, %c0_217] : memref<1x128xf32, #tpu.memory_space<vmem>>, vector<1x128xf32>
    %597 = vector.broadcast %596 : vector<1x128xf32> to vector<8x128xf32>
    %598 = arith.addf %595, %597 : vector<8x128xf32>
    %599 = vector.extract_strided_slice %598 {offsets = [0, 0], sizes = [8, 32], strides = [1, 1]} : vector<8x128xf32> to vector<8x32xf32>
    %600 = arith.negf %599 : vector<8x32xf32>
    %601 = math.exp %600 : vector<8x32xf32>
    %cst_218 = arith.constant 1.000000e+00 : f32
    %602 = vector.broadcast %cst_218 : f32 to vector<8x32xf32>
    %603 = arith.addf %602, %601 : vector<8x32xf32>
    %604 = arith.divf %602, %603 : vector<8x32xf32>
    %605 = vector.extract_strided_slice %598 {offsets = [0, 32], sizes = [8, 32], strides = [1, 1]} : vector<8x128xf32> to vector<8x32xf32>
    %606 = arith.negf %605 : vector<8x32xf32>
    %607 = math.exp %606 : vector<8x32xf32>
    %cst_219 = arith.constant 1.000000e+00 : f32
    %608 = vector.broadcast %cst_219 : f32 to vector<8x32xf32>
    %609 = arith.addf %608, %607 : vector<8x32xf32>
    %610 = arith.divf %608, %609 : vector<8x32xf32>
    %611 = vector.extract_strided_slice %598 {offsets = [0, 64], sizes = [8, 32], strides = [1, 1]} : vector<8x128xf32> to vector<8x32xf32>
    %612 = math.tanh %611 : vector<8x32xf32>
    %613 = vector.extract_strided_slice %598 {offsets = [0, 96], sizes = [8, 32], strides = [1, 1]} : vector<8x128xf32> to vector<8x32xf32>
    %614 = arith.negf %613 : vector<8x32xf32>
    %615 = math.exp %614 : vector<8x32xf32>
    %cst_220 = arith.constant 1.000000e+00 : f32
    %616 = vector.broadcast %cst_220 : f32 to vector<8x32xf32>
    %617 = arith.addf %616, %615 : vector<8x32xf32>
    %618 = arith.divf %616, %617 : vector<8x32xf32>
    %619 = arith.mulf %610, %550 : vector<8x32xf32>
    %620 = arith.mulf %604, %612 : vector<8x32xf32>
    %621 = arith.addf %619, %620 : vector<8x32xf32>
    %622 = math.tanh %621 : vector<8x32xf32>
    %623 = arith.mulf %618, %622 : vector<8x32xf32>
    %624 = vector.broadcast %553 : vector<1x32xf32> to vector<8x32xf32>
    %625 = arith.mulf %623, %624 : vector<8x32xf32>
    %cst_221 = arith.constant dense<0.000000e+00> : vector<8xf32>
    %626 = vector.multi_reduction <add>, %625, %cst_221 [1] : vector<8x32xf32> to vector<8xf32>
    %627 = vector.shape_cast %626 : vector<8xf32> to vector<8x1xf32>
    %628 = vector.broadcast %554 : f32 to vector<8x1xf32>
    %629 = arith.addf %627, %628 : vector<8x1xf32>
    %630 = vector.broadcast %629 : vector<8x1xf32> to vector<8x128xf32>
    %631 = vector.broadcast %555 : vector<1x128xf32> to vector<8x128xf32>
    %632 = arith.mulf %630, %631 : vector<8x128xf32>
    %c0_222 = arith.constant 0 : index
    %c0_223 = arith.constant 0 : index
    %633 = vector.load %arg8[%c0_222, %c0_223] : memref<32x128xf32, #tpu.memory_space<vmem>>, vector<32x128xf32>
    %cst_224 = arith.constant dense<0.000000e+00> : vector<8x128xf32>
    %634 = tpu.matmul %590, %633, %cst_224 {dimension_numbers = #tpu.dot_dimension_numbers<[1], [0], [0], [1], [0, 0, 1, 1], [], []>} : vector<8x32xf32>, vector<32x128xf32>, vector<8x128xf32> -> vector<8x128xf32>
    %635 = arith.addf %632, %634 : vector<8x128xf32>
    %c0_225 = arith.constant 0 : index
    %c0_226 = arith.constant 0 : index
    %636 = vector.load %arg9[%c0_225, %c0_226] : memref<1x128xf32, #tpu.memory_space<vmem>>, vector<1x128xf32>
    %637 = vector.broadcast %636 : vector<1x128xf32> to vector<8x128xf32>
    %638 = arith.addf %635, %637 : vector<8x128xf32>
    %639 = vector.extract_strided_slice %638 {offsets = [0, 0], sizes = [8, 32], strides = [1, 1]} : vector<8x128xf32> to vector<8x32xf32>
    %640 = arith.negf %639 : vector<8x32xf32>
    %641 = math.exp %640 : vector<8x32xf32>
    %cst_227 = arith.constant 1.000000e+00 : f32
    %642 = vector.broadcast %cst_227 : f32 to vector<8x32xf32>
    %643 = arith.addf %642, %641 : vector<8x32xf32>
    %644 = arith.divf %642, %643 : vector<8x32xf32>
    %645 = vector.extract_strided_slice %638 {offsets = [0, 32], sizes = [8, 32], strides = [1, 1]} : vector<8x128xf32> to vector<8x32xf32>
    %646 = arith.negf %645 : vector<8x32xf32>
    %647 = math.exp %646 : vector<8x32xf32>
    %cst_228 = arith.constant 1.000000e+00 : f32
    %648 = vector.broadcast %cst_228 : f32 to vector<8x32xf32>
    %649 = arith.addf %648, %647 : vector<8x32xf32>
    %650 = arith.divf %648, %649 : vector<8x32xf32>
    %651 = vector.extract_strided_slice %638 {offsets = [0, 64], sizes = [8, 32], strides = [1, 1]} : vector<8x128xf32> to vector<8x32xf32>
    %652 = math.tanh %651 : vector<8x32xf32>
    %653 = vector.extract_strided_slice %638 {offsets = [0, 96], sizes = [8, 32], strides = [1, 1]} : vector<8x128xf32> to vector<8x32xf32>
    %654 = arith.negf %653 : vector<8x32xf32>
    %655 = math.exp %654 : vector<8x32xf32>
    %cst_229 = arith.constant 1.000000e+00 : f32
    %656 = vector.broadcast %cst_229 : f32 to vector<8x32xf32>
    %657 = arith.addf %656, %655 : vector<8x32xf32>
    %658 = arith.divf %656, %657 : vector<8x32xf32>
    %659 = arith.mulf %650, %588 : vector<8x32xf32>
    %660 = arith.mulf %644, %652 : vector<8x32xf32>
    %661 = arith.addf %659, %660 : vector<8x32xf32>
    %662 = math.tanh %661 : vector<8x32xf32>
    %663 = arith.mulf %658, %662 : vector<8x32xf32>
    %c0_230 = arith.constant 0 : index
    %c0_231 = arith.constant 0 : index
    %664 = vector.load %arg10[%c0_230, %c0_231] : memref<32x128xf32, #tpu.memory_space<vmem>>, vector<32x128xf32>
    %cst_232 = arith.constant dense<0.000000e+00> : vector<8x128xf32>
    %665 = tpu.matmul %663, %664, %cst_232 {dimension_numbers = #tpu.dot_dimension_numbers<[1], [0], [0], [1], [0, 0, 1, 1], [], []>} : vector<8x32xf32>, vector<32x128xf32>, vector<8x128xf32> -> vector<8x128xf32>
    %c0_233 = arith.constant 0 : index
    %c0_234 = arith.constant 0 : index
    %666 = vector.load %arg11[%c0_233, %c0_234] : memref<32x128xf32, #tpu.memory_space<vmem>>, vector<32x128xf32>
    %cst_235 = arith.constant dense<0.000000e+00> : vector<8x128xf32>
    %667 = tpu.matmul %623, %666, %cst_235 {dimension_numbers = #tpu.dot_dimension_numbers<[1], [0], [0], [1], [0, 0, 1, 1], [], []>} : vector<8x32xf32>, vector<32x128xf32>, vector<8x128xf32> -> vector<8x128xf32>
    %668 = arith.addf %665, %667 : vector<8x128xf32>
    %c0_236 = arith.constant 0 : index
    %c0_237 = arith.constant 0 : index
    %669 = vector.load %arg12[%c0_236, %c0_237] : memref<1x128xf32, #tpu.memory_space<vmem>>, vector<1x128xf32>
    %670 = vector.broadcast %669 : vector<1x128xf32> to vector<8x128xf32>
    %671 = arith.addf %668, %670 : vector<8x128xf32>
    %672 = vector.extract_strided_slice %671 {offsets = [0, 0], sizes = [8, 32], strides = [1, 1]} : vector<8x128xf32> to vector<8x32xf32>
    %673 = arith.negf %672 : vector<8x32xf32>
    %674 = math.exp %673 : vector<8x32xf32>
    %cst_238 = arith.constant 1.000000e+00 : f32
    %675 = vector.broadcast %cst_238 : f32 to vector<8x32xf32>
    %676 = arith.addf %675, %674 : vector<8x32xf32>
    %677 = arith.divf %675, %676 : vector<8x32xf32>
    %678 = vector.extract_strided_slice %671 {offsets = [0, 32], sizes = [8, 32], strides = [1, 1]} : vector<8x128xf32> to vector<8x32xf32>
    %679 = arith.negf %678 : vector<8x32xf32>
    %680 = math.exp %679 : vector<8x32xf32>
    %cst_239 = arith.constant 1.000000e+00 : f32
    %681 = vector.broadcast %cst_239 : f32 to vector<8x32xf32>
    %682 = arith.addf %681, %680 : vector<8x32xf32>
    %683 = arith.divf %681, %682 : vector<8x32xf32>
    %684 = vector.extract_strided_slice %671 {offsets = [0, 64], sizes = [8, 32], strides = [1, 1]} : vector<8x128xf32> to vector<8x32xf32>
    %685 = math.tanh %684 : vector<8x32xf32>
    %686 = vector.extract_strided_slice %671 {offsets = [0, 96], sizes = [8, 32], strides = [1, 1]} : vector<8x128xf32> to vector<8x32xf32>
    %687 = arith.negf %686 : vector<8x32xf32>
    %688 = math.exp %687 : vector<8x32xf32>
    %cst_240 = arith.constant 1.000000e+00 : f32
    %689 = vector.broadcast %cst_240 : f32 to vector<8x32xf32>
    %690 = arith.addf %689, %688 : vector<8x32xf32>
    %691 = arith.divf %689, %690 : vector<8x32xf32>
    %692 = arith.mulf %683, %621 : vector<8x32xf32>
    %693 = arith.mulf %677, %685 : vector<8x32xf32>
    %694 = arith.addf %692, %693 : vector<8x32xf32>
    %695 = math.tanh %694 : vector<8x32xf32>
    %696 = arith.mulf %691, %695 : vector<8x32xf32>
    %697 = vector.broadcast %553 : vector<1x32xf32> to vector<8x32xf32>
    %698 = arith.mulf %696, %697 : vector<8x32xf32>
    %cst_241 = arith.constant dense<0.000000e+00> : vector<8xf32>
    %699 = vector.multi_reduction <add>, %698, %cst_241 [1] : vector<8x32xf32> to vector<8xf32>
    %700 = vector.shape_cast %699 : vector<8xf32> to vector<8x1xf32>
    %701 = vector.broadcast %554 : f32 to vector<8x1xf32>
    %702 = arith.addf %700, %701 : vector<8x1xf32>
    %703 = vector.broadcast %702 : vector<8x1xf32> to vector<8x128xf32>
    %704 = vector.broadcast %555 : vector<1x128xf32> to vector<8x128xf32>
    %705 = arith.mulf %703, %704 : vector<8x128xf32>
    %c0_242 = arith.constant 0 : index
    %c0_243 = arith.constant 0 : index
    %706 = vector.load %arg8[%c0_242, %c0_243] : memref<32x128xf32, #tpu.memory_space<vmem>>, vector<32x128xf32>
    %cst_244 = arith.constant dense<0.000000e+00> : vector<8x128xf32>
    %707 = tpu.matmul %663, %706, %cst_244 {dimension_numbers = #tpu.dot_dimension_numbers<[1], [0], [0], [1], [0, 0, 1, 1], [], []>} : vector<8x32xf32>, vector<32x128xf32>, vector<8x128xf32> -> vector<8x128xf32>
    %708 = arith.addf %705, %707 : vector<8x128xf32>
    %c0_245 = arith.constant 0 : index
    %c0_246 = arith.constant 0 : index
    %709 = vector.load %arg9[%c0_245, %c0_246] : memref<1x128xf32, #tpu.memory_space<vmem>>, vector<1x128xf32>
    %710 = vector.broadcast %709 : vector<1x128xf32> to vector<8x128xf32>
    %711 = arith.addf %708, %710 : vector<8x128xf32>
    %712 = vector.extract_strided_slice %711 {offsets = [0, 0], sizes = [8, 32], strides = [1, 1]} : vector<8x128xf32> to vector<8x32xf32>
    %713 = arith.negf %712 : vector<8x32xf32>
    %714 = math.exp %713 : vector<8x32xf32>
    %cst_247 = arith.constant 1.000000e+00 : f32
    %715 = vector.broadcast %cst_247 : f32 to vector<8x32xf32>
    %716 = arith.addf %715, %714 : vector<8x32xf32>
    %717 = arith.divf %715, %716 : vector<8x32xf32>
    %718 = vector.extract_strided_slice %711 {offsets = [0, 32], sizes = [8, 32], strides = [1, 1]} : vector<8x128xf32> to vector<8x32xf32>
    %719 = arith.negf %718 : vector<8x32xf32>
    %720 = math.exp %719 : vector<8x32xf32>
    %cst_248 = arith.constant 1.000000e+00 : f32
    %721 = vector.broadcast %cst_248 : f32 to vector<8x32xf32>
    %722 = arith.addf %721, %720 : vector<8x32xf32>
    %723 = arith.divf %721, %722 : vector<8x32xf32>
    %724 = vector.extract_strided_slice %711 {offsets = [0, 64], sizes = [8, 32], strides = [1, 1]} : vector<8x128xf32> to vector<8x32xf32>
    %725 = math.tanh %724 : vector<8x32xf32>
    %726 = vector.extract_strided_slice %711 {offsets = [0, 96], sizes = [8, 32], strides = [1, 1]} : vector<8x128xf32> to vector<8x32xf32>
    %727 = arith.negf %726 : vector<8x32xf32>
    %728 = math.exp %727 : vector<8x32xf32>
    %cst_249 = arith.constant 1.000000e+00 : f32
    %729 = vector.broadcast %cst_249 : f32 to vector<8x32xf32>
    %730 = arith.addf %729, %728 : vector<8x32xf32>
    %731 = arith.divf %729, %730 : vector<8x32xf32>
    %732 = arith.mulf %723, %661 : vector<8x32xf32>
    %733 = arith.mulf %717, %725 : vector<8x32xf32>
    %734 = arith.addf %732, %733 : vector<8x32xf32>
    %735 = math.tanh %734 : vector<8x32xf32>
    %736 = arith.mulf %731, %735 : vector<8x32xf32>
    %c0_250 = arith.constant 0 : index
    %c0_251 = arith.constant 0 : index
    %737 = vector.load %arg10[%c0_250, %c0_251] : memref<32x128xf32, #tpu.memory_space<vmem>>, vector<32x128xf32>
    %cst_252 = arith.constant dense<0.000000e+00> : vector<8x128xf32>
    %738 = tpu.matmul %736, %737, %cst_252 {dimension_numbers = #tpu.dot_dimension_numbers<[1], [0], [0], [1], [0, 0, 1, 1], [], []>} : vector<8x32xf32>, vector<32x128xf32>, vector<8x128xf32> -> vector<8x128xf32>
    %c0_253 = arith.constant 0 : index
    %c0_254 = arith.constant 0 : index
    %739 = vector.load %arg11[%c0_253, %c0_254] : memref<32x128xf32, #tpu.memory_space<vmem>>, vector<32x128xf32>
    %cst_255 = arith.constant dense<0.000000e+00> : vector<8x128xf32>
    %740 = tpu.matmul %696, %739, %cst_255 {dimension_numbers = #tpu.dot_dimension_numbers<[1], [0], [0], [1], [0, 0, 1, 1], [], []>} : vector<8x32xf32>, vector<32x128xf32>, vector<8x128xf32> -> vector<8x128xf32>
    %741 = arith.addf %738, %740 : vector<8x128xf32>
    %c0_256 = arith.constant 0 : index
    %c0_257 = arith.constant 0 : index
    %742 = vector.load %arg12[%c0_256, %c0_257] : memref<1x128xf32, #tpu.memory_space<vmem>>, vector<1x128xf32>
    %743 = vector.broadcast %742 : vector<1x128xf32> to vector<8x128xf32>
    %744 = arith.addf %741, %743 : vector<8x128xf32>
    %745 = vector.extract_strided_slice %744 {offsets = [0, 0], sizes = [8, 32], strides = [1, 1]} : vector<8x128xf32> to vector<8x32xf32>
    %746 = arith.negf %745 : vector<8x32xf32>
    %747 = math.exp %746 : vector<8x32xf32>
    %cst_258 = arith.constant 1.000000e+00 : f32
    %748 = vector.broadcast %cst_258 : f32 to vector<8x32xf32>
    %749 = arith.addf %748, %747 : vector<8x32xf32>
    %750 = arith.divf %748, %749 : vector<8x32xf32>
    %751 = vector.extract_strided_slice %744 {offsets = [0, 32], sizes = [8, 32], strides = [1, 1]} : vector<8x128xf32> to vector<8x32xf32>
    %752 = arith.negf %751 : vector<8x32xf32>
    %753 = math.exp %752 : vector<8x32xf32>
    %cst_259 = arith.constant 1.000000e+00 : f32
    %754 = vector.broadcast %cst_259 : f32 to vector<8x32xf32>
    %755 = arith.addf %754, %753 : vector<8x32xf32>
    %756 = arith.divf %754, %755 : vector<8x32xf32>
    %757 = vector.extract_strided_slice %744 {offsets = [0, 64], sizes = [8, 32], strides = [1, 1]} : vector<8x128xf32> to vector<8x32xf32>
    %758 = math.tanh %757 : vector<8x32xf32>
    %759 = vector.extract_strided_slice %744 {offsets = [0, 96], sizes = [8, 32], strides = [1, 1]} : vector<8x128xf32> to vector<8x32xf32>
    %760 = arith.negf %759 : vector<8x32xf32>
    %761 = math.exp %760 : vector<8x32xf32>
    %cst_260 = arith.constant 1.000000e+00 : f32
    %762 = vector.broadcast %cst_260 : f32 to vector<8x32xf32>
    %763 = arith.addf %762, %761 : vector<8x32xf32>
    %764 = arith.divf %762, %763 : vector<8x32xf32>
    %765 = arith.mulf %756, %694 : vector<8x32xf32>
    %766 = arith.mulf %750, %758 : vector<8x32xf32>
    %767 = arith.addf %765, %766 : vector<8x32xf32>
    %768 = math.tanh %767 : vector<8x32xf32>
    %769 = arith.mulf %764, %768 : vector<8x32xf32>
    %770 = vector.broadcast %553 : vector<1x32xf32> to vector<8x32xf32>
    %771 = arith.mulf %769, %770 : vector<8x32xf32>
    %cst_261 = arith.constant dense<0.000000e+00> : vector<8xf32>
    %772 = vector.multi_reduction <add>, %771, %cst_261 [1] : vector<8x32xf32> to vector<8xf32>
    %773 = vector.shape_cast %772 : vector<8xf32> to vector<8x1xf32>
    %774 = vector.broadcast %554 : f32 to vector<8x1xf32>
    %775 = arith.addf %773, %774 : vector<8x1xf32>
    %776 = vector.broadcast %775 : vector<8x1xf32> to vector<8x128xf32>
    %777 = vector.broadcast %555 : vector<1x128xf32> to vector<8x128xf32>
    %778 = arith.mulf %776, %777 : vector<8x128xf32>
    %c0_262 = arith.constant 0 : index
    %c0_263 = arith.constant 0 : index
    %779 = vector.load %arg8[%c0_262, %c0_263] : memref<32x128xf32, #tpu.memory_space<vmem>>, vector<32x128xf32>
    %cst_264 = arith.constant dense<0.000000e+00> : vector<8x128xf32>
    %780 = tpu.matmul %736, %779, %cst_264 {dimension_numbers = #tpu.dot_dimension_numbers<[1], [0], [0], [1], [0, 0, 1, 1], [], []>} : vector<8x32xf32>, vector<32x128xf32>, vector<8x128xf32> -> vector<8x128xf32>
    %781 = arith.addf %778, %780 : vector<8x128xf32>
    %c0_265 = arith.constant 0 : index
    %c0_266 = arith.constant 0 : index
    %782 = vector.load %arg9[%c0_265, %c0_266] : memref<1x128xf32, #tpu.memory_space<vmem>>, vector<1x128xf32>
    %783 = vector.broadcast %782 : vector<1x128xf32> to vector<8x128xf32>
    %784 = arith.addf %781, %783 : vector<8x128xf32>
    %785 = vector.extract_strided_slice %784 {offsets = [0, 0], sizes = [8, 32], strides = [1, 1]} : vector<8x128xf32> to vector<8x32xf32>
    %786 = arith.negf %785 : vector<8x32xf32>
    %787 = math.exp %786 : vector<8x32xf32>
    %cst_267 = arith.constant 1.000000e+00 : f32
    %788 = vector.broadcast %cst_267 : f32 to vector<8x32xf32>
    %789 = arith.addf %788, %787 : vector<8x32xf32>
    %790 = arith.divf %788, %789 : vector<8x32xf32>
    %791 = vector.extract_strided_slice %784 {offsets = [0, 32], sizes = [8, 32], strides = [1, 1]} : vector<8x128xf32> to vector<8x32xf32>
    %792 = arith.negf %791 : vector<8x32xf32>
    %793 = math.exp %792 : vector<8x32xf32>
    %cst_268 = arith.constant 1.000000e+00 : f32
    %794 = vector.broadcast %cst_268 : f32 to vector<8x32xf32>
    %795 = arith.addf %794, %793 : vector<8x32xf32>
    %796 = arith.divf %794, %795 : vector<8x32xf32>
    %797 = vector.extract_strided_slice %784 {offsets = [0, 64], sizes = [8, 32], strides = [1, 1]} : vector<8x128xf32> to vector<8x32xf32>
    %798 = math.tanh %797 : vector<8x32xf32>
    %799 = vector.extract_strided_slice %784 {offsets = [0, 96], sizes = [8, 32], strides = [1, 1]} : vector<8x128xf32> to vector<8x32xf32>
    %800 = arith.negf %799 : vector<8x32xf32>
    %801 = math.exp %800 : vector<8x32xf32>
    %cst_269 = arith.constant 1.000000e+00 : f32
    %802 = vector.broadcast %cst_269 : f32 to vector<8x32xf32>
    %803 = arith.addf %802, %801 : vector<8x32xf32>
    %804 = arith.divf %802, %803 : vector<8x32xf32>
    %805 = arith.mulf %796, %734 : vector<8x32xf32>
    %806 = arith.mulf %790, %798 : vector<8x32xf32>
    %807 = arith.addf %805, %806 : vector<8x32xf32>
    %808 = math.tanh %807 : vector<8x32xf32>
    %809 = arith.mulf %804, %808 : vector<8x32xf32>
    %c0_270 = arith.constant 0 : index
    %c0_271 = arith.constant 0 : index
    %810 = vector.load %arg10[%c0_270, %c0_271] : memref<32x128xf32, #tpu.memory_space<vmem>>, vector<32x128xf32>
    %cst_272 = arith.constant dense<0.000000e+00> : vector<8x128xf32>
    %811 = tpu.matmul %809, %810, %cst_272 {dimension_numbers = #tpu.dot_dimension_numbers<[1], [0], [0], [1], [0, 0, 1, 1], [], []>} : vector<8x32xf32>, vector<32x128xf32>, vector<8x128xf32> -> vector<8x128xf32>
    %c0_273 = arith.constant 0 : index
    %c0_274 = arith.constant 0 : index
    %812 = vector.load %arg11[%c0_273, %c0_274] : memref<32x128xf32, #tpu.memory_space<vmem>>, vector<32x128xf32>
    %cst_275 = arith.constant dense<0.000000e+00> : vector<8x128xf32>
    %813 = tpu.matmul %769, %812, %cst_275 {dimension_numbers = #tpu.dot_dimension_numbers<[1], [0], [0], [1], [0, 0, 1, 1], [], []>} : vector<8x32xf32>, vector<32x128xf32>, vector<8x128xf32> -> vector<8x128xf32>
    %814 = arith.addf %811, %813 : vector<8x128xf32>
    %c0_276 = arith.constant 0 : index
    %c0_277 = arith.constant 0 : index
    %815 = vector.load %arg12[%c0_276, %c0_277] : memref<1x128xf32, #tpu.memory_space<vmem>>, vector<1x128xf32>
    %816 = vector.broadcast %815 : vector<1x128xf32> to vector<8x128xf32>
    %817 = arith.addf %814, %816 : vector<8x128xf32>
    %818 = vector.extract_strided_slice %817 {offsets = [0, 0], sizes = [8, 32], strides = [1, 1]} : vector<8x128xf32> to vector<8x32xf32>
    %819 = arith.negf %818 : vector<8x32xf32>
    %820 = math.exp %819 : vector<8x32xf32>
    %cst_278 = arith.constant 1.000000e+00 : f32
    %821 = vector.broadcast %cst_278 : f32 to vector<8x32xf32>
    %822 = arith.addf %821, %820 : vector<8x32xf32>
    %823 = arith.divf %821, %822 : vector<8x32xf32>
    %824 = vector.extract_strided_slice %817 {offsets = [0, 32], sizes = [8, 32], strides = [1, 1]} : vector<8x128xf32> to vector<8x32xf32>
    %825 = arith.negf %824 : vector<8x32xf32>
    %826 = math.exp %825 : vector<8x32xf32>
    %cst_279 = arith.constant 1.000000e+00 : f32
    %827 = vector.broadcast %cst_279 : f32 to vector<8x32xf32>
    %828 = arith.addf %827, %826 : vector<8x32xf32>
    %829 = arith.divf %827, %828 : vector<8x32xf32>
    %830 = vector.extract_strided_slice %817 {offsets = [0, 64], sizes = [8, 32], strides = [1, 1]} : vector<8x128xf32> to vector<8x32xf32>
    %831 = math.tanh %830 : vector<8x32xf32>
    %832 = vector.extract_strided_slice %817 {offsets = [0, 96], sizes = [8, 32], strides = [1, 1]} : vector<8x128xf32> to vector<8x32xf32>
    %833 = arith.negf %832 : vector<8x32xf32>
    %834 = math.exp %833 : vector<8x32xf32>
    %cst_280 = arith.constant 1.000000e+00 : f32
    %835 = vector.broadcast %cst_280 : f32 to vector<8x32xf32>
    %836 = arith.addf %835, %834 : vector<8x32xf32>
    %837 = arith.divf %835, %836 : vector<8x32xf32>
    %838 = arith.mulf %829, %767 : vector<8x32xf32>
    %839 = arith.mulf %823, %831 : vector<8x32xf32>
    %840 = arith.addf %838, %839 : vector<8x32xf32>
    %841 = math.tanh %840 : vector<8x32xf32>
    %842 = arith.mulf %837, %841 : vector<8x32xf32>
    %843 = vector.broadcast %553 : vector<1x32xf32> to vector<8x32xf32>
    %844 = arith.mulf %842, %843 : vector<8x32xf32>
    %cst_281 = arith.constant dense<0.000000e+00> : vector<8xf32>
    %845 = vector.multi_reduction <add>, %844, %cst_281 [1] : vector<8x32xf32> to vector<8xf32>
    %846 = vector.shape_cast %845 : vector<8xf32> to vector<8x1xf32>
    %847 = vector.broadcast %554 : f32 to vector<8x1xf32>
    %848 = arith.addf %846, %847 : vector<8x1xf32>
    %849 = vector.broadcast %848 : vector<8x1xf32> to vector<8x128xf32>
    %850 = vector.broadcast %555 : vector<1x128xf32> to vector<8x128xf32>
    %851 = arith.mulf %849, %850 : vector<8x128xf32>
    %c0_282 = arith.constant 0 : index
    %c0_283 = arith.constant 0 : index
    %852 = vector.load %arg8[%c0_282, %c0_283] : memref<32x128xf32, #tpu.memory_space<vmem>>, vector<32x128xf32>
    %cst_284 = arith.constant dense<0.000000e+00> : vector<8x128xf32>
    %853 = tpu.matmul %809, %852, %cst_284 {dimension_numbers = #tpu.dot_dimension_numbers<[1], [0], [0], [1], [0, 0, 1, 1], [], []>} : vector<8x32xf32>, vector<32x128xf32>, vector<8x128xf32> -> vector<8x128xf32>
    %854 = arith.addf %851, %853 : vector<8x128xf32>
    %c0_285 = arith.constant 0 : index
    %c0_286 = arith.constant 0 : index
    %855 = vector.load %arg9[%c0_285, %c0_286] : memref<1x128xf32, #tpu.memory_space<vmem>>, vector<1x128xf32>
    %856 = vector.broadcast %855 : vector<1x128xf32> to vector<8x128xf32>
    %857 = arith.addf %854, %856 : vector<8x128xf32>
    %858 = vector.extract_strided_slice %857 {offsets = [0, 0], sizes = [8, 32], strides = [1, 1]} : vector<8x128xf32> to vector<8x32xf32>
    %859 = arith.negf %858 : vector<8x32xf32>
    %860 = math.exp %859 : vector<8x32xf32>
    %cst_287 = arith.constant 1.000000e+00 : f32
    %861 = vector.broadcast %cst_287 : f32 to vector<8x32xf32>
    %862 = arith.addf %861, %860 : vector<8x32xf32>
    %863 = arith.divf %861, %862 : vector<8x32xf32>
    %864 = vector.extract_strided_slice %857 {offsets = [0, 32], sizes = [8, 32], strides = [1, 1]} : vector<8x128xf32> to vector<8x32xf32>
    %865 = arith.negf %864 : vector<8x32xf32>
    %866 = math.exp %865 : vector<8x32xf32>
    %cst_288 = arith.constant 1.000000e+00 : f32
    %867 = vector.broadcast %cst_288 : f32 to vector<8x32xf32>
    %868 = arith.addf %867, %866 : vector<8x32xf32>
    %869 = arith.divf %867, %868 : vector<8x32xf32>
    %870 = vector.extract_strided_slice %857 {offsets = [0, 64], sizes = [8, 32], strides = [1, 1]} : vector<8x128xf32> to vector<8x32xf32>
    %871 = math.tanh %870 : vector<8x32xf32>
    %872 = vector.extract_strided_slice %857 {offsets = [0, 96], sizes = [8, 32], strides = [1, 1]} : vector<8x128xf32> to vector<8x32xf32>
    %873 = arith.negf %872 : vector<8x32xf32>
    %874 = math.exp %873 : vector<8x32xf32>
    %cst_289 = arith.constant 1.000000e+00 : f32
    %875 = vector.broadcast %cst_289 : f32 to vector<8x32xf32>
    %876 = arith.addf %875, %874 : vector<8x32xf32>
    %877 = arith.divf %875, %876 : vector<8x32xf32>
    %878 = arith.mulf %869, %807 : vector<8x32xf32>
    %879 = arith.mulf %863, %871 : vector<8x32xf32>
    %880 = arith.addf %878, %879 : vector<8x32xf32>
    %881 = math.tanh %880 : vector<8x32xf32>
    %882 = arith.mulf %877, %881 : vector<8x32xf32>
    %c0_290 = arith.constant 0 : index
    %c0_291 = arith.constant 0 : index
    %883 = vector.load %arg10[%c0_290, %c0_291] : memref<32x128xf32, #tpu.memory_space<vmem>>, vector<32x128xf32>
    %cst_292 = arith.constant dense<0.000000e+00> : vector<8x128xf32>
    %884 = tpu.matmul %882, %883, %cst_292 {dimension_numbers = #tpu.dot_dimension_numbers<[1], [0], [0], [1], [0, 0, 1, 1], [], []>} : vector<8x32xf32>, vector<32x128xf32>, vector<8x128xf32> -> vector<8x128xf32>
    %c0_293 = arith.constant 0 : index
    %c0_294 = arith.constant 0 : index
    %885 = vector.load %arg11[%c0_293, %c0_294] : memref<32x128xf32, #tpu.memory_space<vmem>>, vector<32x128xf32>
    %cst_295 = arith.constant dense<0.000000e+00> : vector<8x128xf32>
    %886 = tpu.matmul %842, %885, %cst_295 {dimension_numbers = #tpu.dot_dimension_numbers<[1], [0], [0], [1], [0, 0, 1, 1], [], []>} : vector<8x32xf32>, vector<32x128xf32>, vector<8x128xf32> -> vector<8x128xf32>
    %887 = arith.addf %884, %886 : vector<8x128xf32>
    %c0_296 = arith.constant 0 : index
    %c0_297 = arith.constant 0 : index
    %888 = vector.load %arg12[%c0_296, %c0_297] : memref<1x128xf32, #tpu.memory_space<vmem>>, vector<1x128xf32>
    %889 = vector.broadcast %888 : vector<1x128xf32> to vector<8x128xf32>
    %890 = arith.addf %887, %889 : vector<8x128xf32>
    %891 = vector.extract_strided_slice %890 {offsets = [0, 0], sizes = [8, 32], strides = [1, 1]} : vector<8x128xf32> to vector<8x32xf32>
    %892 = arith.negf %891 : vector<8x32xf32>
    %893 = math.exp %892 : vector<8x32xf32>
    %cst_298 = arith.constant 1.000000e+00 : f32
    %894 = vector.broadcast %cst_298 : f32 to vector<8x32xf32>
    %895 = arith.addf %894, %893 : vector<8x32xf32>
    %896 = arith.divf %894, %895 : vector<8x32xf32>
    %897 = vector.extract_strided_slice %890 {offsets = [0, 32], sizes = [8, 32], strides = [1, 1]} : vector<8x128xf32> to vector<8x32xf32>
    %898 = arith.negf %897 : vector<8x32xf32>
    %899 = math.exp %898 : vector<8x32xf32>
    %cst_299 = arith.constant 1.000000e+00 : f32
    %900 = vector.broadcast %cst_299 : f32 to vector<8x32xf32>
    %901 = arith.addf %900, %899 : vector<8x32xf32>
    %902 = arith.divf %900, %901 : vector<8x32xf32>
    %903 = vector.extract_strided_slice %890 {offsets = [0, 64], sizes = [8, 32], strides = [1, 1]} : vector<8x128xf32> to vector<8x32xf32>
    %904 = math.tanh %903 : vector<8x32xf32>
    %905 = vector.extract_strided_slice %890 {offsets = [0, 96], sizes = [8, 32], strides = [1, 1]} : vector<8x128xf32> to vector<8x32xf32>
    %906 = arith.negf %905 : vector<8x32xf32>
    %907 = math.exp %906 : vector<8x32xf32>
    %cst_300 = arith.constant 1.000000e+00 : f32
    %908 = vector.broadcast %cst_300 : f32 to vector<8x32xf32>
    %909 = arith.addf %908, %907 : vector<8x32xf32>
    %910 = arith.divf %908, %909 : vector<8x32xf32>
    %911 = arith.mulf %902, %840 : vector<8x32xf32>
    %912 = arith.mulf %896, %904 : vector<8x32xf32>
    %913 = arith.addf %911, %912 : vector<8x32xf32>
    %914 = math.tanh %913 : vector<8x32xf32>
    %915 = arith.mulf %910, %914 : vector<8x32xf32>
    %916 = vector.broadcast %553 : vector<1x32xf32> to vector<8x32xf32>
    %917 = arith.mulf %915, %916 : vector<8x32xf32>
    %cst_301 = arith.constant dense<0.000000e+00> : vector<8xf32>
    %918 = vector.multi_reduction <add>, %917, %cst_301 [1] : vector<8x32xf32> to vector<8xf32>
    %919 = vector.shape_cast %918 : vector<8xf32> to vector<8x1xf32>
    %920 = vector.broadcast %554 : f32 to vector<8x1xf32>
    %921 = arith.addf %919, %920 : vector<8x1xf32>
    %922 = vector.broadcast %921 : vector<8x1xf32> to vector<8x128xf32>
    %923 = vector.broadcast %555 : vector<1x128xf32> to vector<8x128xf32>
    %924 = arith.mulf %922, %923 : vector<8x128xf32>
    %c0_302 = arith.constant 0 : index
    %c0_303 = arith.constant 0 : index
    %925 = vector.load %arg8[%c0_302, %c0_303] : memref<32x128xf32, #tpu.memory_space<vmem>>, vector<32x128xf32>
    %cst_304 = arith.constant dense<0.000000e+00> : vector<8x128xf32>
    %926 = tpu.matmul %882, %925, %cst_304 {dimension_numbers = #tpu.dot_dimension_numbers<[1], [0], [0], [1], [0, 0, 1, 1], [], []>} : vector<8x32xf32>, vector<32x128xf32>, vector<8x128xf32> -> vector<8x128xf32>
    %927 = arith.addf %924, %926 : vector<8x128xf32>
    %c0_305 = arith.constant 0 : index
    %c0_306 = arith.constant 0 : index
    %928 = vector.load %arg9[%c0_305, %c0_306] : memref<1x128xf32, #tpu.memory_space<vmem>>, vector<1x128xf32>
    %929 = vector.broadcast %928 : vector<1x128xf32> to vector<8x128xf32>
    %930 = arith.addf %927, %929 : vector<8x128xf32>
    %931 = vector.extract_strided_slice %930 {offsets = [0, 0], sizes = [8, 32], strides = [1, 1]} : vector<8x128xf32> to vector<8x32xf32>
    %932 = arith.negf %931 : vector<8x32xf32>
    %933 = math.exp %932 : vector<8x32xf32>
    %cst_307 = arith.constant 1.000000e+00 : f32
    %934 = vector.broadcast %cst_307 : f32 to vector<8x32xf32>
    %935 = arith.addf %934, %933 : vector<8x32xf32>
    %936 = arith.divf %934, %935 : vector<8x32xf32>
    %937 = vector.extract_strided_slice %930 {offsets = [0, 32], sizes = [8, 32], strides = [1, 1]} : vector<8x128xf32> to vector<8x32xf32>
    %938 = arith.negf %937 : vector<8x32xf32>
    %939 = math.exp %938 : vector<8x32xf32>
    %cst_308 = arith.constant 1.000000e+00 : f32
    %940 = vector.broadcast %cst_308 : f32 to vector<8x32xf32>
    %941 = arith.addf %940, %939 : vector<8x32xf32>
    %942 = arith.divf %940, %941 : vector<8x32xf32>
    %943 = vector.extract_strided_slice %930 {offsets = [0, 64], sizes = [8, 32], strides = [1, 1]} : vector<8x128xf32> to vector<8x32xf32>
    %944 = math.tanh %943 : vector<8x32xf32>
    %945 = vector.extract_strided_slice %930 {offsets = [0, 96], sizes = [8, 32], strides = [1, 1]} : vector<8x128xf32> to vector<8x32xf32>
    %946 = arith.negf %945 : vector<8x32xf32>
    %947 = math.exp %946 : vector<8x32xf32>
    %cst_309 = arith.constant 1.000000e+00 : f32
    %948 = vector.broadcast %cst_309 : f32 to vector<8x32xf32>
    %949 = arith.addf %948, %947 : vector<8x32xf32>
    %950 = arith.divf %948, %949 : vector<8x32xf32>
    %951 = arith.mulf %942, %880 : vector<8x32xf32>
    %952 = arith.mulf %936, %944 : vector<8x32xf32>
    %953 = arith.addf %951, %952 : vector<8x32xf32>
    %954 = math.tanh %953 : vector<8x32xf32>
    %955 = arith.mulf %950, %954 : vector<8x32xf32>
    %c0_310 = arith.constant 0 : index
    %c0_311 = arith.constant 0 : index
    %956 = vector.load %arg10[%c0_310, %c0_311] : memref<32x128xf32, #tpu.memory_space<vmem>>, vector<32x128xf32>
    %cst_312 = arith.constant dense<0.000000e+00> : vector<8x128xf32>
    %957 = tpu.matmul %955, %956, %cst_312 {dimension_numbers = #tpu.dot_dimension_numbers<[1], [0], [0], [1], [0, 0, 1, 1], [], []>} : vector<8x32xf32>, vector<32x128xf32>, vector<8x128xf32> -> vector<8x128xf32>
    %c0_313 = arith.constant 0 : index
    %c0_314 = arith.constant 0 : index
    %958 = vector.load %arg11[%c0_313, %c0_314] : memref<32x128xf32, #tpu.memory_space<vmem>>, vector<32x128xf32>
    %cst_315 = arith.constant dense<0.000000e+00> : vector<8x128xf32>
    %959 = tpu.matmul %915, %958, %cst_315 {dimension_numbers = #tpu.dot_dimension_numbers<[1], [0], [0], [1], [0, 0, 1, 1], [], []>} : vector<8x32xf32>, vector<32x128xf32>, vector<8x128xf32> -> vector<8x128xf32>
    %960 = arith.addf %957, %959 : vector<8x128xf32>
    %c0_316 = arith.constant 0 : index
    %c0_317 = arith.constant 0 : index
    %961 = vector.load %arg12[%c0_316, %c0_317] : memref<1x128xf32, #tpu.memory_space<vmem>>, vector<1x128xf32>
    %962 = vector.broadcast %961 : vector<1x128xf32> to vector<8x128xf32>
    %963 = arith.addf %960, %962 : vector<8x128xf32>
    %964 = vector.extract_strided_slice %963 {offsets = [0, 0], sizes = [8, 32], strides = [1, 1]} : vector<8x128xf32> to vector<8x32xf32>
    %965 = arith.negf %964 : vector<8x32xf32>
    %966 = math.exp %965 : vector<8x32xf32>
    %cst_318 = arith.constant 1.000000e+00 : f32
    %967 = vector.broadcast %cst_318 : f32 to vector<8x32xf32>
    %968 = arith.addf %967, %966 : vector<8x32xf32>
    %969 = arith.divf %967, %968 : vector<8x32xf32>
    %970 = vector.extract_strided_slice %963 {offsets = [0, 32], sizes = [8, 32], strides = [1, 1]} : vector<8x128xf32> to vector<8x32xf32>
    %971 = arith.negf %970 : vector<8x32xf32>
    %972 = math.exp %971 : vector<8x32xf32>
    %cst_319 = arith.constant 1.000000e+00 : f32
    %973 = vector.broadcast %cst_319 : f32 to vector<8x32xf32>
    %974 = arith.addf %973, %972 : vector<8x32xf32>
    %975 = arith.divf %973, %974 : vector<8x32xf32>
    %976 = vector.extract_strided_slice %963 {offsets = [0, 64], sizes = [8, 32], strides = [1, 1]} : vector<8x128xf32> to vector<8x32xf32>
    %977 = math.tanh %976 : vector<8x32xf32>
    %978 = vector.extract_strided_slice %963 {offsets = [0, 96], sizes = [8, 32], strides = [1, 1]} : vector<8x128xf32> to vector<8x32xf32>
    %979 = arith.negf %978 : vector<8x32xf32>
    %980 = math.exp %979 : vector<8x32xf32>
    %cst_320 = arith.constant 1.000000e+00 : f32
    %981 = vector.broadcast %cst_320 : f32 to vector<8x32xf32>
    %982 = arith.addf %981, %980 : vector<8x32xf32>
    %983 = arith.divf %981, %982 : vector<8x32xf32>
    %984 = arith.mulf %975, %913 : vector<8x32xf32>
    %985 = arith.mulf %969, %977 : vector<8x32xf32>
    %986 = arith.addf %984, %985 : vector<8x32xf32>
    %987 = math.tanh %986 : vector<8x32xf32>
    %988 = arith.mulf %983, %987 : vector<8x32xf32>
    %989 = vector.broadcast %553 : vector<1x32xf32> to vector<8x32xf32>
    %990 = arith.mulf %988, %989 : vector<8x32xf32>
    %cst_321 = arith.constant dense<0.000000e+00> : vector<8xf32>
    %991 = vector.multi_reduction <add>, %990, %cst_321 [1] : vector<8x32xf32> to vector<8xf32>
    %992 = vector.shape_cast %991 : vector<8xf32> to vector<8x1xf32>
    %993 = vector.broadcast %554 : f32 to vector<8x1xf32>
    %994 = arith.addf %992, %993 : vector<8x1xf32>
    %995 = tpu.concatenate %629, %702, %775, %848, %921, %994 in 1 : vector<8x1xf32>, vector<8x1xf32>, vector<8x1xf32>, vector<8x1xf32>, vector<8x1xf32>, vector<8x1xf32> -> vector<8x6xf32>
    %c0_322 = arith.constant 0 : index
    %c0_323 = arith.constant 0 : index
    %996 = vector.load %arg15[%c0_322, %c0_323] : memref<8x6xf32, #tpu.memory_space<vmem>>, vector<8x6xf32>
    tpu.vector_store %arg15[%c0_322, %c0_323], %995 {strides = array<i32>} : memref<8x6xf32, #tpu.memory_space<vmem>>, vector<8x6xf32>,
    return
  }
}

</mosaic_0001>

<bundles_post_ra>
// kernel: tpu_custom_call.1
= control target key start
LH: loop header
LB: loop body
LE: loop exit
PB: predicated region body
PF: predicated region fallthrough
CT: control target
= control target key end

     0   :  { %21 = vsyncpa [#allocation4], 0  ;;  %s7088_s0 = inlined_call_operand.vmem [shape: f32[8,8,4], index: 0, kind: input, shape index: {}]   ;;  %s7089_s1 = inlined_call_operand.hbm [shape: f32[4,128], index: 1, kind: input, shape index: {}]   ;;  %s7090_s2 = inlined_call_operand.vmem [shape: f32[32,128], index: 2, kind: input, shape index: {}]   ;;  %s7091_s3 = inlined_call_operand.vmem [shape: f32[1,128], index: 3, kind: input, shape index: {}]   ;;  %s7092_s4 = inlined_call_operand.vmem [shape: f32[32,128], index: 4, kind: input, shape index: {}]   ;;  %s7093_s5 = inlined_call_operand.vmem [shape: f32[32,128], index: 5, kind: input, shape index: {}]   ;;  %s7094_s6 = inlined_call_operand.vmem [shape: f32[1,128], index: 6, kind: input, shape index: {}]   ;;  %s7095_s7 = inlined_call_operand.hbm [shape: f32[4,128], index: 7, kind: input, shape index: {}]   ;;  %s7096_s8 = inlined_call_operand.vmem [shape: f32[32,128], index: 8, kind: input, shape index: {}]   ;;  %s7097_s9 = inlined_call_operand.vmem [shape: f32[1,128], index: 9, kind: input, shape index: {}]   ;;  %s7098_s10 = inlined_call_operand.hbm [shape: f32[32,128], index: 10, kind: input, shape index: {}]   ;;  %s7099_s11 = inlined_call_operand.hbm [shape: f32[32,128], index: 11, kind: input, shape index: {}]   ;;  %s7100_s12 = inlined_call_operand.vmem [shape: f32[1,128], index: 12, kind: input, shape index: {}]   ;;  %s7101_s13 = inlined_call_operand.vmem [shape: f32[1,32], index: 13, kind: input, shape index: {}]   ;;  %s7102_s14 = inlined_call_operand.<no memory space> [shape: f32[1,1], index: 14, kind: input, shape index: {}]   ;;  %s7103_s15 = inlined_call_operand.hbm [shape: f32[8,6], index: 15, kind: output, shape index: {}]  }
   0x1   :  { %22 = vsyncpa [#allocation7], 0 }
   0x2   :  { %23 = vsyncpa [#allocation10], 0 }
   0x3   :  { %24 = vsyncpa [#allocation5], 0  ;;  %s6165_s18 = smov [#allocation6]   ;;  %s6166_s20 = smov [#allocation3]  }
   0x4   :  { %s53_s19 = sshll.u32 %s6165_s18, 4  ;;  %s33_s21 = sshll.u32 %s6166_s20, 4  ;;  %s54_s19 = int_to_ptr.vmem [resolvable:$true] %s53_s19  ;;  %s34_s21 = int_to_ptr.vmem [resolvable:$true] %s33_s21 }
   0x5   :  { %s6047_s24 = scalar_lea.hbm %s7095_s7, 64 }
   0x6   :  { %p6048_p0 = scmp.ne.s32.totalorder %s7095_s7, %s6047_s24  ;;  %p6051_p1 = scmp.lt.u32.totalorder %s6047_s24, %s7095_s7 }
   0x8   :  { %p6053_p2 = pnand %p6051_p1, %p6048_p0 }
   0xa   :  { %6056 = shalt.err (!%p6053_p2)
}
   0xb   :  { %s6057_s29 = scalar_lea.vmem %s54_s19, 64  ;;  %p6062_p4 = scmp.lt.s32.totalorder %s54_s19, %s54_s19 }
   0xc   :  { %p6058_p3 = scmp.ne.s32.totalorder %s54_s19, %s6057_s29  ;;  %p6063_p5 = scmp.lt.s32.totalorder %s6057_s29, %s6057_s29 }
   0xe   :  { %p6064_p6 = por %p6063_p5, %p6062_p4 }
  0x10   :  { %p6065_p7 = pnand %p6064_p6, %p6058_p3 }
  0x12   :  { %6068 = shalt.err (!%p6065_p7)
}
  0x13   :  { %56 = dma.hbm_to_vmem [thread:$0]  %s7095_s7, 64, %s54_s19, [#allocation7]  }
  0x14   :  { %s6069_s20 = scalar_lea.hbm %s7089_s1, 64 }
  0x15   :  { %p6070_p8 = scmp.ne.s32.totalorder %s7089_s1, %s6069_s20  ;;  %p6073_p9 = scmp.lt.u32.totalorder %s6069_s20, %s7089_s1 }
  0x17   :  { %p6075_p10 = pnand %p6073_p9, %p6070_p8 }
  0x19   :  { %6078 = shalt.err (!%p6075_p10)
}
  0x1a   :  { %s6079_s26 = scalar_lea.vmem %s34_s21, 64  ;;  %p6084_p12 = scmp.lt.s32.totalorder %s34_s21, %s34_s21 }
  0x1b   :  { %p6080_p11 = scmp.ne.s32.totalorder %s34_s21, %s6079_s26  ;;  %p6085_p13 = scmp.lt.s32.totalorder %s6079_s26, %s6079_s26 }
  0x1d   :  { %p6086_p0 = por %p6085_p13, %p6084_p12 }
  0x1f   :  { %p6087_p1 = pnand %p6086_p0, %p6080_p11 }
  0x21   :  { %6090 = shalt.err (!%p6087_p1)
}
  0x22   :  { %36 = dma.hbm_to_vmem [thread:$0]  %s7089_s1, 64, %s34_s21, [#allocation4]  }
  0x23   :  { %s6167_s27 = smov [#allocation8]   ;;  %s6091_s16 = scalar_lea.hbm %s7098_s10, 512 }
  0x24   :  { %s66_s28 = sshll.u32 %s6167_s27, 4  ;;  %p6092_p2 = scmp.ne.s32.totalorder %s7098_s10, %s6091_s16  ;;  %s67_s28 = int_to_ptr.vmem [resolvable:$true] %s66_s28 }
  0x25   :  { %p6095_p3 = scmp.lt.u32.totalorder %s6091_s16, %s7098_s10 }
  0x27   :  { %p6097_p4 = pnand %p6095_p3, %p6092_p2 }
  0x29   :  { %6100 = shalt.err (!%p6097_p4)
}
  0x2a   :  { %s6101_s23 = scalar_lea.vmem %s67_s28, 512  ;;  %p6106_p6 = scmp.lt.s32.totalorder %s67_s28, %s67_s28 }
  0x2b   :  { %p6102_p5 = scmp.ne.s32.totalorder %s67_s28, %s6101_s23  ;;  %p6107_p7 = scmp.lt.s32.totalorder %s6101_s23, %s6101_s23 }
  0x2d   :  { %p6108_p8 = por %p6107_p7, %p6106_p6 }
  0x2f   :  { %p6109_p9 = pnand %p6108_p8, %p6102_p5 }
  0x31   :  { %6112 = shalt.err (!%p6109_p9)
}
  0x32   :  { %s6168_s1 = smov 128   ;;  %s6169_s21 = smov 8  }
  0x33   :  { %72 = dma.hbm_to_vmem [thread:$0]  %s7098_s10, 512, %s67_s28, [#allocation7], %s6168_s1, %s6168_s1, %s6169_s21  }
  0x34   :  { %s6170_s26 = smov [#allocation9]   ;;  %s6113_s29 = scalar_lea.hbm %s7099_s11, 512 }
  0x35   :  { %s78_s7 = sshll.u32 %s6170_s26, 4  ;;  %p6114_p10 = scmp.ne.s32.totalorder %s7099_s11, %s6113_s29  ;;  %s79_s7 = int_to_ptr.vmem [resolvable:$true] %s78_s7 }
  0x36   :  { %p6117_p11 = scmp.lt.u32.totalorder %s6113_s29, %s7099_s11 }
  0x38   :  { %p6119_p12 = pnand %p6117_p11, %p6114_p10 }
  0x3a   :  { %6122 = shalt.err (!%p6119_p12)
}
  0x3b   :  { %s6123_s20 = scalar_lea.vmem %s79_s7, 512  ;;  %p6128_p0 = scmp.lt.s32.totalorder %s79_s7, %s79_s7 }
  0x3c   :  { %p6124_p13 = scmp.ne.s32.totalorder %s79_s7, %s6123_s20  ;;  %p6129_p1 = scmp.lt.s32.totalorder %s6123_s20, %s6123_s20 }
  0x3e   :  { %p6130_p2 = por %p6129_p1, %p6128_p0 }
  0x40   :  { %p6131_p3 = pnand %p6130_p2, %p6124_p13 }
  0x42   :  { %6134 = shalt.err (!%p6131_p3)
}
  0x43   :  { %84 = dma.hbm_to_vmem [thread:$0]  %s7099_s11, 512, %s79_s7, [#allocation10], %s6168_s1, %s6168_s1, %s6169_s21  }
  0x44   :  { %6157 = dma.done.wait [#allocation4], 64  }
  0x45   :  { %6158 = vsyncadd [#allocation4], 4294967232 }
  0x46   :  { %6159 = dma.done.wait [#allocation7], 576  }
  0x47   :  { %6160 = vsyncadd [#allocation7], 4294966720 }
  0x48   :  { %6161 = dma.done.wait [#allocation10], 512  }
  0x49   :  { %6162 = vsyncadd [#allocation10], 4294966784  ;;  %v6171_v0 = vmov 0.0|0.0   ;;  %v6172_v1 = vmov 0.0   ;;  %vm6173_vm0 = vmmov 0   ;;  %vm187_vm1 = vcmask 1043456  }
  0x4a   :  { %5555 = vmatprep.subr.bf16.mxu0 %v6171_v0  ;;  %5059 = vmatprep.subr.mxu1 %v6172_v1  ;;  %v105_v2 = vld [vmem:[%s7090_s2] sm:$0xff]  ;;  %v106_v3 = vld [vmem:[%s7090_s2 + $0x8] sm:$0xff]  ;;  %v107_v4 = vld [vmem:[%s7090_s2 + $0x10] sm:$0xff]  ;;  %vm183_vm2 = vcmask 31744   ;;  %s6174_s29 = smov 64   ;;  %s6175_s30 = smov 32  }
  0x4b   :  { %5061 = vmatprep.mubr.msk.f32.mxu1 %vm6173_vm0, %v6172_v1  ;;  %5056 = vmatprep.mubr.msk.f32.mxu0 %vm6173_vm0, %v6172_v1  ;;  %v6321_v5 = vpack.c.bf16 %v106_v3, %v105_v2  ;;  %v108_v6 = vld [vmem:[%s7090_s2 + $0x18] sm:$0xff]  ;;  %v6326_v7 = vld [vmem:[#allocation3] sm:$0xf]  ;;  %v298_v28 = vld [vmem:[%s7093_s5 + $0x8] sm:$0xff]  ;;  %vm109_vm3 = vcmask 261120   ;;  %s6176_s10 = smov 96  }
  0x4c   :  { %v103_v8 = vld [vmem:[%s7088_s0] sm:$0xff]  ;;  %5060 = vmatpush3.msk.msra.mxu1 %vm187_vm1, %v6326_v7  ;;  %v6334_v9 = vpack.c.bf16 %v108_v6, %v107_v4  ;;  %v299_v29 = vld [vmem:[%s7093_s5 + $0x10] sm:$0xff]  ;;  %v300_v31 = vld [vmem:[%s7093_s5 + $0x18] sm:$0xff]  ;;  %vm4693_vm4 = vcmask 7168   ;;  %vm4695_vm5 = vcmask 15360   ;;  %vm4697_vm6 = vcmask 23552  }
  0x4d   :  { %5557 = vmatpush3.bf16.msra.mxu0 %v6321_v5  ;;  %5062 = vmatmul.mubr.msk.f32.vlgmr.msra.gmra.mrb[0].mxu1 %vm183_vm2, %v103_v8  ;;  %v6349_v13 = vld [vmem:[%s7091_s3] ss:$0 sm:$0xff]  ;;  %v294_v33 = vld [vmem:[%s7092_s4 + $0x8] sm:$0xff]  ;;  %v295_v35 = vld [vmem:[%s7092_s4 + $0x10] sm:$0xff]  ;;  %v6386_v37 = vpack.c.bf16 %v300_v31, %v299_v29  ;;  %vm4700_vm7 = vcmask 39936   ;;  %vm4702_vm8 = vcmask 48128  }
  0x4e   :  { %5558 = vmatprep.subr.bf16.mxu0 %v6171_v0  ;;  %5561 = vmatprep.subr.bf16.mxu1 %v6171_v0  ;;  %v297_v27 = vld [vmem:[%s7093_s5] sm:$0xff]  ;;  %v296_v36 = vld [vmem:[%s7092_s4 + $0x18] sm:$0xff]  ;;  %v4728_v45 = vld [vmem:[%s7088_s0 + $0x8] sm:$0xff] }
  0x4f   :  { %5072 = vmatprep.mubr.msk.f32.mxu1 %vm6173_vm0, %v6172_v1  ;;  %v6366_v30 = vpack.c.bf16 %v298_v28, %v297_v27  ;;  %v293_v32 = vld [vmem:[%s7092_s4] sm:$0xff]  ;;  %v6390_v38 = vpack.c.bf16 %v296_v36, %v295_v35  ;;  %v4736_v27 = vld [vmem:[%s7088_s0 + $0x10] sm:$0xff] }
  0x50   :  { %v6377_v34 = vpack.c.bf16 %v294_v33, %v293_v32  ;;  %v6432_v47 = vld [vmem:[%s7094_s6] ss:$0 sm:$0xff] }
  0x51   :  { %5560 = vmatpush3.bf16.msra.mxu0 %v6334_v9  ;;  %5563 = vmatpush3.bf16.msra.mxu1 %v6366_v30 }
  0x52   :  { %5567 = vmatprep.subr.bf16.mxu0 %v6171_v0  ;;  %5564 = vmatprep.subr.bf16.mxu1 %v6171_v0 }
  0x54   :  { %5057 = vmatmul.mubr.f32.vlgmr.msra.gmra.mrb[0].mxu0 %v6172_v1 }
  0x55   :  { %5083 = vmatprep.mubr.msk.f32.mxu0 %vm6173_vm0, %v6172_v1  ;;  %5569 = vmatpush3.bf16.msra.mxu0 %v6377_v34 }
  0x56   :  { %5570 = vmatprep.subr.bf16.mxu0 %v6171_v0  ;;  %5566 = vmatpush3.bf16.msra.mxu1 %v6386_v37 }
  0x57   :  { %5573 = vmatprep.subr.bf16.mxu1 %v6171_v0 }
  0x59   :  { %5572 = vmatpush3.bf16.msra.mxu0 %v6390_v38  ;;  %5073 = vmatmul.mubr.f32.vlgmr.msra.gmra.mrb[2].mxu1 %v6172_v1 }
  0x5a   :  { %5585 = vmatprep.subr.bf16.mxu0 %v6171_v0  ;;  %5575 = vmatpush3.bf16.msra.mxu1 %v6321_v5 }
  0x5b   :  { %5576 = vmatprep.subr.bf16.mxu1 %v6171_v0  ;;  %5094 = vmatprep.mubr.msk.f32.mxu1 %vm6173_vm0, %v6172_v1 }
  0x5e   :  { %5578 = vmatpush3.bf16.msra.mxu1 %v6334_v9 }
  0x5f   :  { %5097 = vmatprep.subr.mxu1 %v6172_v1 }
 0x120   :  { %v257_v10 = vpop.f32.mrb[0].mxu1 }
 0x121   :  { %v5063_v11 = vpop.f32.mrb[1].mxu1 }
 0x127   :  { %v179_v12 = vpop.f32.mrb[0].mxu0 }
 0x128   :  { %v258_v14 = vadd.f32 %v257_v10, %v179_v12  ;;  %v5058_v15 = vpop.f32.mrb[1].mxu0 }
 0x12a   :  { %v268_v16 = vadd.f32 %v6349_v13, %v258_v14 }
 0x12c   :  { %5820 = vtanh.f32 %v268_v16  ;;  %v4724_v18 = vmul.f32 -1.442695, %v268_v16  ;;  %v367_v42 = vpop.f32.mrb[2].mxu1 }
 0x12d   :  { %v5074_v43 = vpop.f32.mrb[3].mxu1 }
 0x12e   :  { %5822 = vpow2.f32 %v4724_v18 }
 0x136   :  { %v5821_v17 = vpop.eup %5820 }
 0x137   :  { %278 = vrot.lane.b32.xlu0 %v5821_v17, %s6174_s29 }
 0x138   :  { %v5823_v19 = vpop.eup %5822 }
 0x139   :  { %v272_v20 = vadd.f32 1.0, %v5823_v19 }
 0x13b   :  { %5824 = vrcp.f32 %v272_v20 }
 0x145   :  { %v5825_v21 = vpop.eup %5824 }
 0x146   :  { %v276_v24 = vmul.f32 0.0, %v5825_v21 }
 0x1a9   :  { %v279_v22 = vpop.permute.xlu0 %278 }
 0x1aa   :  { %v281_v23 = vmul.f32 %v5825_v21, %v279_v22 }
 0x1ac   :  { %283 = vrot.lane.b32.xlu0 %v281_v23, %s6175_s30 }
 0x21e   :  { %v284_v25 = vpop.permute.xlu0 %283 }
 0x21f   :  { %v6354_v26 = vadd.f32 %v284_v25, %v276_v24 }
 0x221   :  { %5826 = vtanh.f32 %v6354_v26 }
 0x22b   :  { %v5827_v39 = vpop.eup %5826 }
 0x22c   :  { %289 = vrot.lane.b32.xlu1 %v5827_v39, %s6174_s29 }
 0x29e   :  { %v290_v40 = vpop.permute.xlu1 %289 }
 0x29f   :  { %v292_v41 = vmul.f32 %v5825_v21, %v290_v40 }
 0x2a1   :  { %372 = vrot.lane.b32.xlu1 %v292_v41, %s6175_s30 }
 0x313   :  { %v373_v44 = vpop.permute.xlu1 %372 }
 0x314   :  { %5084 = vmatmul.mubr.msk.f32.vlgmr.msra.gmra.mrb[2].mxu0 %vm109_vm3, %v373_v44  ;;  %5095 = vmatmul.mubr.msk.f32.vlgmr.msra.gmra.mrb[4].mxu1 %vm109_vm3, %v373_v44 }
 0x315   :  { %5098 = vmatpush3.msk.msra.mxu1 %vm187_vm1, %v6326_v7  ;;  %5099 = vmatprep.mubr.msk.f32.mxu1 %vm6173_vm0, %v6172_v1 }
 0x316   :  { %5579 = vmatprep.subr.bf16.mxu1 %v6171_v0  ;;  %5587 = vmatpush3.bf16.msra.mxu0 %v6377_v34 }
 0x317   :  { %5588 = vmatprep.subr.bf16.mxu0 %v6171_v0  ;;  %5121 = vmatprep.mubr.msk.f32.mxu0 %vm6173_vm0, %v6172_v1 }
 0x318   :  { %5100 = vmatmul.mubr.msk.f32.vlgmr.msra.gmra.mrb[6].mxu1 %vm183_vm2, %v4728_v45 }
 0x319   :  { %5581 = vmatpush3.bf16.msra.mxu1 %v6366_v30  ;;  %5110 = vmatprep.mubr.msk.f32.mxu1 %vm6173_vm0, %v6172_v1 }
 0x31a   :  { %5582 = vmatprep.subr.bf16.mxu1 %v6171_v0  ;;  %5590 = vmatpush3.bf16.msra.mxu0 %v6390_v38 }
 0x31b   :  { %5135 = vmatprep.subr.mxu0 %v6172_v1 }
 0x31d   :  { %5584 = vmatpush3.bf16.msra.mxu1 %v6386_v37 }
 0x31e   :  { %5591 = vmatprep.subr.bf16.mxu1 %v6171_v0 }
 0x3e7   :  { %v442_v46 = vpop.f32.mrb[2].mxu0  ;;  %v546_v48 = vpop.f32.mrb[4].mxu1 }
 0x3e8   :  { %v443_v49 = vadd.f32 %v442_v46, %v367_v42  ;;  %v5085_v50 = vpop.f32.mrb[3].mxu0  ;;  %v5096_v51 = vpop.f32.mrb[5].mxu1 }
 0x3ea   :  { %v453_v52 = vadd.f32 %v6432_v47, %v443_v49 }
 0x3eb   :  { %v619_v53 = vpop.f32.mrb[6].mxu1 }
 0x3ec   :  { %5828 = vtanh.f32 %v453_v52  ;;  %v620_v54 = vadd.f32 %v619_v53, %v546_v48  ;;  %v5101_v55 = vpop.f32.mrb[7].mxu1  ;;  %v4727_v59 = vmul.f32 -1.442695, %v453_v52 }
 0x3ee   :  { %v623_v56 = vadd.f32 %v6349_v13, %v620_v54 }
 0x3f0   :  { %5830 = vtanh.f32 %v623_v56  ;;  %v4732_v60 = vmul.f32 -1.442695, %v623_v56 }
 0x3f1   :  { %5832 = vpow2.f32 %v4727_v59 }
 0x3f2   :  { %5834 = vpow2.f32 %v4732_v60 }
 0x3f6   :  { %v5829_v57 = vpop.eup %5828 }
 0x3f7   :  { %463 = vrot.lane.b32.xlu0 %v5829_v57, %s6174_s29 }
 0x3fa   :  { %v5831_v58 = vpop.eup %5830 }
 0x3fb   :  { %633 = vrot.lane.b32.xlu1 %v5831_v58, %s6174_s29  ;;  %v5833_v61 = vpop.eup %5832 }
 0x3fc   :  { %v457_v62 = vadd.f32 1.0, %v5833_v61  ;;  %v5835_v63 = vpop.eup %5834 }
 0x3fd   :  { %v627_v2 = vadd.f32 1.0, %v5835_v63 }
 0x3fe   :  { %5836 = vrcp.f32 %v457_v62 }
 0x3ff   :  { %5838 = vrcp.f32 %v627_v2 }
 0x408   :  { %v5837_v3 = vpop.eup %5836 }
 0x409   :  { %v5839_v8 = vpop.eup %5838  ;;  %v461_v12 = vmul.f32 0.0, %v5837_v3 }
 0x40a   :  { %v631_v16 = vmul.f32 %v5839_v8, %v6354_v26 }
 0x469   :  { %v464_v4 = vpop.permute.xlu0 %463 }
 0x46a   :  { %v466_v6 = vmul.f32 %v5837_v3, %v464_v4 }
 0x46c   :  { %468 = vrot.lane.b32.xlu0 %v466_v6, %s6175_s30 }
 0x46d   :  { %v634_v10 = vpop.permute.xlu1 %633 }
 0x46e   :  { %v636_v11 = vmul.f32 %v5839_v8, %v634_v10 }
 0x470   :  { %638 = vrot.lane.b32.xlu1 %v636_v11, %s6175_s30 }
 0x4de   :  { %v469_v14 = vpop.permute.xlu0 %468 }
 0x4df   :  { %v6440_v15 = vadd.f32 %v469_v14, %v461_v12 }
 0x4e1   :  { %5840 = vtanh.f32 %v6440_v15 }
 0x4e2   :  { %v639_v17 = vpop.permute.xlu1 %638 }
 0x4e3   :  { %v6444_v18 = vadd.f32 %v639_v17, %v631_v16 }
 0x4e5   :  { %5842 = vtanh.f32 %v6444_v18 }
 0x4eb   :  { %v5841_v19 = vpop.eup %5840 }
 0x4ec   :  { %474 = vrot.lane.b32.xlu0 %v5841_v19, %s6174_s29 }
 0x4ef   :  { %v5843_v20 = vpop.eup %5842 }
 0x4f0   :  { %644 = vrot.lane.b32.xlu1 %v5843_v20, %s6174_s29 }
 0x55e   :  { %v475_v21 = vpop.permute.xlu0 %474 }
 0x55f   :  { %v477_v22 = vmul.f32 %v5837_v3, %v475_v21 }
 0x561   :  { %649 = vrot.lane.b32.xlu0 %v477_v22, %s6175_s30 }
 0x562   :  { %v645_v23 = vpop.permute.xlu1 %644 }
 0x563   :  { %v647_v24 = vmul.f32 %v5839_v8, %v645_v23 }
 0x565   :  { %724 = vrot.lane.b32.xlu1 %v647_v24, %s6175_s30 }
 0x5d3   :  { %v650_v25 = vpop.permute.xlu0 %649 }
 0x5d4   :  { %5111 = vmatmul.mubr.msk.f32.vlgmr.msra.gmra.mrb[8].mxu1 %vm109_vm3, %v650_v25 }
 0x5d5   :  { %5593 = vmatpush3.bf16.msra.mxu1 %v6321_v5  ;;  %5132 = vmatprep.mubr.msk.f32.mxu1 %vm6173_vm0, %v6172_v1 }
 0x5d6   :  { %5594 = vmatprep.subr.bf16.mxu1 %v6171_v0 }
 0x5d7   :  { %v725_v26 = vpop.permute.xlu1 %724 }
 0x5d8   :  { %5122 = vmatmul.mubr.msk.f32.vlgmr.msra.gmra.mrb[4].mxu0 %vm109_vm3, %v725_v26 }
 0x5d9   :  { %5596 = vmatpush3.bf16.msra.mxu1 %v6334_v9  ;;  %5136 = vmatpush3.msk.msra.mxu0 %vm187_vm1, %v6326_v7 }
 0x5da   :  { %5137 = vmatprep.mubr.msk.f32.mxu0 %vm6173_vm0, %v6172_v1  ;;  %5597 = vmatprep.subr.bf16.mxu0 %v6171_v0 }
 0x5db   :  { %5603 = vmatprep.subr.bf16.mxu1 %v6171_v0 }
 0x5dc   :  { %5133 = vmatmul.mubr.msk.f32.vlgmr.msra.gmra.mrb[10].mxu1 %vm109_vm3, %v725_v26  ;;  %5138 = vmatmul.mubr.msk.f32.vlgmr.msra.gmra.mrb[6].mxu0 %vm183_vm2, %v4736_v27 }
 0x5dd   :  { %5599 = vmatpush3.bf16.msra.mxu0 %v6366_v30  ;;  %5605 = vmatpush3.bf16.msra.mxu1 %v6377_v34 }
 0x5de   :  { %5600 = vmatprep.subr.bf16.mxu0 %v6171_v0  ;;  %5148 = vmatprep.mubr.msk.f32.mxu0 %vm6173_vm0, %v6172_v1 }
 0x5df   :  { %5606 = vmatprep.subr.bf16.mxu1 %v6171_v0  ;;  %5159 = vmatprep.mubr.msk.f32.mxu1 %vm6173_vm0, %v6172_v1 }
 0x5e1   :  { %5602 = vmatpush3.bf16.msra.mxu0 %v6386_v37  ;;  %5608 = vmatpush3.bf16.msra.mxu1 %v6390_v38 }
 0x5e2   :  { %5609 = vmatprep.subr.bf16.mxu0 %v6171_v0  ;;  %5173 = vmatprep.subr.mxu1 %v6172_v1 }
 0x6a7   :  { %v719_v28 = vpop.f32.mrb[8].mxu1 }
 0x6a8   :  { %v5112_v29 = vpop.f32.mrb[9].mxu1 }
 0x6ab   :  { %v794_v31 = vpop.f32.mrb[4].mxu0 }
 0x6ac   :  { %v795_v32 = vadd.f32 %v794_v31, %v719_v28  ;;  %v5123_v33 = vpop.f32.mrb[5].mxu0 }
 0x6ae   :  { %v798_v35 = vadd.f32 %v6432_v47, %v795_v32 }
 0x6af   :  { %v891_v36 = vpop.f32.mrb[10].mxu1  ;;  %v964_v39 = vpop.f32.mrb[6].mxu0 }
 0x6b0   :  { %5844 = vtanh.f32 %v798_v35  ;;  %v5134_v40 = vpop.f32.mrb[11].mxu1  ;;  %v965_v41 = vadd.f32 %v964_v39, %v891_v36  ;;  %v5139_v42 = vpop.f32.mrb[7].mxu0  ;;  %v4735_v46 = vmul.f32 -1.442695, %v798_v35 }
 0x6b2   :  { %v968_v43 = vadd.f32 %v6349_v13, %v965_v41 }
 0x6b4   :  { %5846 = vtanh.f32 %v968_v43  ;;  %v4740_v48 = vmul.f32 -1.442695, %v968_v43 }
 0x6b5   :  { %5848 = vpow2.f32 %v4735_v46 }
 0x6b6   :  { %5850 = vpow2.f32 %v4740_v48 }
 0x6ba   :  { %v5845_v44 = vpop.eup %5844 }
 0x6bb   :  { %808 = vrot.lane.b32.xlu0 %v5845_v44, %s6174_s29 }
 0x6be   :  { %v5847_v45 = vpop.eup %5846 }
 0x6bf   :  { %978 = vrot.lane.b32.xlu1 %v5847_v45, %s6174_s29  ;;  %v5849_v49 = vpop.eup %5848 }
 0x6c0   :  { %v802_v50 = vadd.f32 1.0, %v5849_v49  ;;  %v5851_v51 = vpop.eup %5850 }
 0x6c1   :  { %v972_v52 = vadd.f32 1.0, %v5851_v51 }
 0x6c2   :  { %5852 = vrcp.f32 %v802_v50 }
 0x6c3   :  { %5854 = vrcp.f32 %v972_v52 }
 0x6cc   :  { %v5853_v53 = vpop.eup %5852 }
 0x6cd   :  { %v5855_v56 = vpop.eup %5854  ;;  %v806_v59 = vmul.f32 %v5853_v53, %v6440_v15  ;;  %v4744_v15 = vld [vmem:[%s7088_s0 + $0x18] sm:$0xff] }
 0x6ce   :  { %v976_v62 = vmul.f32 %v5855_v56, %v6444_v18 }
 0x72d   :  { %v809_v54 = vpop.permute.xlu0 %808 }
 0x72e   :  { %v811_v55 = vmul.f32 %v5853_v53, %v809_v54 }
 0x730   :  { %813 = vrot.lane.b32.xlu0 %v811_v55, %s6175_s30 }
 0x731   :  { %v979_v57 = vpop.permute.xlu1 %978 }
 0x732   :  { %v981_v58 = vmul.f32 %v5855_v56, %v979_v57 }
 0x734   :  { %983 = vrot.lane.b32.xlu1 %v981_v58, %s6175_s30 }
 0x7a2   :  { %v814_v60 = vpop.permute.xlu0 %813 }
 0x7a3   :  { %v6488_v61 = vadd.f32 %v814_v60, %v806_v59 }
 0x7a5   :  { %5856 = vtanh.f32 %v6488_v61 }
 0x7a6   :  { %v984_v63 = vpop.permute.xlu1 %983 }
 0x7a7   :  { %v6492_v2 = vadd.f32 %v984_v63, %v976_v62 }
 0x7a9   :  { %5858 = vtanh.f32 %v6492_v2 }
 0x7af   :  { %v5857_v3 = vpop.eup %5856 }
 0x7b0   :  { %819 = vrot.lane.b32.xlu0 %v5857_v3, %s6174_s29 }
 0x7b3   :  { %v5859_v4 = vpop.eup %5858 }
 0x7b4   :  { %989 = vrot.lane.b32.xlu1 %v5859_v4, %s6174_s29 }
 0x822   :  { %v820_v6 = vpop.permute.xlu0 %819 }
 0x823   :  { %v822_v8 = vmul.f32 %v5853_v53, %v820_v6 }
 0x825   :  { %994 = vrot.lane.b32.xlu0 %v822_v8, %s6175_s30 }
 0x826   :  { %v990_v10 = vpop.permute.xlu1 %989 }
 0x827   :  { %v992_v11 = vmul.f32 %v5855_v56, %v990_v10 }
 0x829   :  { %1069 = vrot.lane.b32.xlu1 %v992_v11, %s6175_s30 }
 0x897   :  { %v995_v12 = vpop.permute.xlu0 %994 }
 0x898   :  { %5149 = vmatmul.mubr.msk.f32.vlgmr.msra.gmra.mrb[8].mxu0 %vm109_vm3, %v995_v12 }
 0x899   :  { %5611 = vmatpush3.bf16.msra.mxu0 %v6321_v5  ;;  %5170 = vmatprep.mubr.msk.f32.mxu0 %vm6173_vm0, %v6172_v1 }
 0x89a   :  { %5612 = vmatprep.subr.bf16.mxu0 %v6171_v0 }
 0x89b   :  { %v1070_v14 = vpop.permute.xlu1 %1069 }
 0x89c   :  { %5160 = vmatmul.mubr.msk.f32.vlgmr.msra.gmra.mrb[12].mxu1 %vm109_vm3, %v1070_v14 }
 0x89d   :  { %5614 = vmatpush3.bf16.msra.mxu0 %v6334_v9  ;;  %5174 = vmatpush3.msk.msra.mxu1 %vm187_vm1, %v6326_v7 }
 0x89e   :  { %5175 = vmatprep.mubr.msk.f32.mxu1 %vm6173_vm0, %v6172_v1  ;;  %5615 = vmatprep.subr.bf16.mxu1 %v6171_v0 }
 0x89f   :  { %5621 = vmatprep.subr.bf16.mxu0 %v6171_v0 }
 0x8a0   :  { %5171 = vmatmul.mubr.msk.f32.vlgmr.msra.gmra.mrb[10].mxu0 %vm109_vm3, %v1070_v14  ;;  %5176 = vmatmul.mubr.msk.f32.vlgmr.msra.gmra.mrb[14].mxu1 %vm183_vm2, %v4744_v15 }
 0x8a1   :  { %5617 = vmatpush3.bf16.msra.mxu1 %v6366_v30  ;;  %5623 = vmatpush3.bf16.msra.mxu0 %v6377_v34 }
 0x8a2   :  { %5618 = vmatprep.subr.bf16.mxu1 %v6171_v0  ;;  %5186 = vmatprep.mubr.msk.f32.mxu1 %vm6173_vm0, %v6172_v1 }
 0x8a3   :  { %5624 = vmatprep.subr.bf16.mxu0 %v6171_v0  ;;  %5197 = vmatprep.mubr.msk.f32.mxu0 %vm6173_vm0, %v6172_v1 }
 0x8a5   :  { %5620 = vmatpush3.bf16.msra.mxu1 %v6386_v37  ;;  %5626 = vmatpush3.bf16.msra.mxu0 %v6390_v38 }
 0x8a6   :  { %5627 = vmatprep.subr.bf16.mxu1 %v6171_v0  ;;  %5211 = vmatprep.subr.mxu0 %v6172_v1 }
 0x96b   :  { %v1064_v16 = vpop.f32.mrb[8].mxu0 }
 0x96c   :  { %v5150_v17 = vpop.f32.mrb[9].mxu0 }
 0x96f   :  { %v1139_v18 = vpop.f32.mrb[12].mxu1 }
 0x970   :  { %v1140_v19 = vadd.f32 %v1139_v18, %v1064_v16  ;;  %v5161_v20 = vpop.f32.mrb[13].mxu1 }
 0x972   :  { %v1143_v21 = vadd.f32 %v6432_v47, %v1140_v19 }
 0x973   :  { %v1236_v22 = vpop.f32.mrb[10].mxu0  ;;  %v1309_v23 = vpop.f32.mrb[14].mxu1 }
 0x974   :  { %5860 = vtanh.f32 %v1143_v21  ;;  %v5172_v24 = vpop.f32.mrb[11].mxu0  ;;  %v1310_v25 = vadd.f32 %v1309_v23, %v1236_v22  ;;  %v5177_v26 = vpop.f32.mrb[15].mxu1  ;;  %v4743_v31 = vmul.f32 -1.442695, %v1143_v21 }
 0x976   :  { %v1313_v27 = vadd.f32 %v6349_v13, %v1310_v25 }
 0x978   :  { %5862 = vtanh.f32 %v1313_v27  ;;  %v4748_v32 = vmul.f32 -1.442695, %v1313_v27 }
 0x979   :  { %5864 = vpow2.f32 %v4743_v31 }
 0x97a   :  { %5866 = vpow2.f32 %v4748_v32 }
 0x97e   :  { %v5861_v28 = vpop.eup %5860 }
 0x97f   :  { %1153 = vrot.lane.b32.xlu0 %v5861_v28, %s6174_s29 }
 0x982   :  { %v5863_v29 = vpop.eup %5862 }
 0x983   :  { %1323 = vrot.lane.b32.xlu1 %v5863_v29, %s6174_s29  ;;  %v5865_v33 = vpop.eup %5864 }
 0x984   :  { %v1147_v35 = vadd.f32 1.0, %v5865_v33  ;;  %v5867_v36 = vpop.eup %5866 }
 0x985   :  { %v1317_v39 = vadd.f32 1.0, %v5867_v36 }
 0x986   :  { %5868 = vrcp.f32 %v1147_v35 }
 0x987   :  { %5870 = vrcp.f32 %v1317_v39 }
 0x990   :  { %v5869_v40 = vpop.eup %5868 }
 0x991   :  { %v5871_v43 = vpop.eup %5870  ;;  %v1151_v46 = vmul.f32 %v5869_v40, %v6488_v61  ;;  %v4752_v61 = vld [vmem:[%s7088_s0 + $0x20] sm:$0xff] }
 0x992   :  { %v1321_v50 = vmul.f32 %v5871_v43, %v6492_v2 }
 0x9f1   :  { %v1154_v41 = vpop.permute.xlu0 %1153 }
 0x9f2   :  { %v1156_v42 = vmul.f32 %v5869_v40, %v1154_v41 }
 0x9f4   :  { %1158 = vrot.lane.b32.xlu0 %v1156_v42, %s6175_s30 }
 0x9f5   :  { %v1324_v44 = vpop.permute.xlu1 %1323 }
 0x9f6   :  { %v1326_v45 = vmul.f32 %v5871_v43, %v1324_v44 }
 0x9f8   :  { %1328 = vrot.lane.b32.xlu1 %v1326_v45, %s6175_s30 }
 0xa66   :  { %v1159_v48 = vpop.permute.xlu0 %1158 }
 0xa67   :  { %v6536_v49 = vadd.f32 %v1159_v48, %v1151_v46 }
 0xa69   :  { %5872 = vtanh.f32 %v6536_v49 }
 0xa6a   :  { %v1329_v51 = vpop.permute.xlu1 %1328 }
 0xa6b   :  { %v6540_v52 = vadd.f32 %v1329_v51, %v1321_v50 }
 0xa6d   :  { %5874 = vtanh.f32 %v6540_v52 }
 0xa73   :  { %v5873_v53 = vpop.eup %5872 }
 0xa74   :  { %1164 = vrot.lane.b32.xlu0 %v5873_v53, %s6174_s29 }
 0xa77   :  { %v5875_v54 = vpop.eup %5874 }
 0xa78   :  { %1334 = vrot.lane.b32.xlu1 %v5875_v54, %s6174_s29 }
 0xae6   :  { %v1165_v55 = vpop.permute.xlu0 %1164 }
 0xae7   :  { %v1167_v56 = vmul.f32 %v5869_v40, %v1165_v55 }
 0xae9   :  { %1339 = vrot.lane.b32.xlu0 %v1167_v56, %s6175_s30 }
 0xaea   :  { %v1335_v57 = vpop.permute.xlu1 %1334 }
 0xaeb   :  { %v1337_v58 = vmul.f32 %v5871_v43, %v1335_v57 }
 0xaed   :  { %1414 = vrot.lane.b32.xlu1 %v1337_v58, %s6175_s30 }
 0xb5b   :  { %v1340_v59 = vpop.permute.xlu0 %1339 }
 0xb5c   :  { %5187 = vmatmul.mubr.msk.f32.vlgmr.msra.gmra.mrb[16].mxu1 %vm109_vm3, %v1340_v59 }
 0xb5d   :  { %5629 = vmatpush3.bf16.msra.mxu1 %v6321_v5  ;;  %5208 = vmatprep.mubr.msk.f32.mxu1 %vm6173_vm0, %v6172_v1 }
 0xb5e   :  { %5630 = vmatprep.subr.bf16.mxu1 %v6171_v0 }
 0xb5f   :  { %v1415_v60 = vpop.permute.xlu1 %1414 }
 0xb60   :  { %5198 = vmatmul.mubr.msk.f32.vlgmr.msra.gmra.mrb[12].mxu0 %vm109_vm3, %v1415_v60 }
 0xb61   :  { %5632 = vmatpush3.bf16.msra.mxu1 %v6334_v9  ;;  %5212 = vmatpush3.msk.msra.mxu0 %vm187_vm1, %v6326_v7 }
 0xb62   :  { %5213 = vmatprep.mubr.msk.f32.mxu0 %vm6173_vm0, %v6172_v1  ;;  %5633 = vmatprep.subr.bf16.mxu0 %v6171_v0 }
 0xb63   :  { %5639 = vmatprep.subr.bf16.mxu1 %v6171_v0 }
 0xb64   :  { %5209 = vmatmul.mubr.msk.f32.vlgmr.msra.gmra.mrb[18].mxu1 %vm109_vm3, %v1415_v60  ;;  %5214 = vmatmul.mubr.msk.f32.vlgmr.msra.gmra.mrb[14].mxu0 %vm183_vm2, %v4752_v61 }
 0xb65   :  { %5635 = vmatpush3.bf16.msra.mxu0 %v6366_v30  ;;  %5641 = vmatpush3.bf16.msra.mxu1 %v6377_v34 }
 0xb66   :  { %5636 = vmatprep.subr.bf16.mxu0 %v6171_v0  ;;  %5224 = vmatprep.mubr.msk.f32.mxu0 %vm6173_vm0, %v6172_v1 }
 0xb67   :  { %5642 = vmatprep.subr.bf16.mxu1 %v6171_v0  ;;  %5235 = vmatprep.mubr.msk.f32.mxu1 %vm6173_vm0, %v6172_v1 }
 0xb69   :  { %5638 = vmatpush3.bf16.msra.mxu0 %v6386_v37  ;;  %5644 = vmatpush3.bf16.msra.mxu1 %v6390_v38 }
 0xb6a   :  { %5645 = vmatprep.subr.bf16.mxu0 %v6171_v0  ;;  %5249 = vmatprep.subr.mxu1 %v6172_v1 }
 0xc2f   :  { %v1409_v62 = vpop.f32.mrb[16].mxu1 }
 0xc30   :  { %v5188_v63 = vpop.f32.mrb[17].mxu1 }
 0xc33   :  { %v1484_v2 = vpop.f32.mrb[12].mxu0 }
 0xc34   :  { %v1485_v3 = vadd.f32 %v1484_v2, %v1409_v62  ;;  %v5199_v4 = vpop.f32.mrb[13].mxu0 }
 0xc36   :  { %v1488_v6 = vadd.f32 %v6432_v47, %v1485_v3 }
 0xc37   :  { %v1581_v8 = vpop.f32.mrb[18].mxu1  ;;  %v1654_v10 = vpop.f32.mrb[14].mxu0 }
 0xc38   :  { %5876 = vtanh.f32 %v1488_v6  ;;  %v5210_v11 = vpop.f32.mrb[19].mxu1  ;;  %v1655_v12 = vadd.f32 %v1654_v10, %v1581_v8  ;;  %v5215_v14 = vpop.f32.mrb[15].mxu0  ;;  %v4751_v18 = vmul.f32 -1.442695, %v1488_v6 }
 0xc3a   :  { %v1658_v15 = vadd.f32 %v6349_v13, %v1655_v12 }
 0xc3c   :  { %5878 = vtanh.f32 %v1658_v15  ;;  %v4756_v19 = vmul.f32 -1.442695, %v1658_v15 }
 0xc3d   :  { %5880 = vpow2.f32 %v4751_v18 }
 0xc3e   :  { %5882 = vpow2.f32 %v4756_v19 }
 0xc42   :  { %v5877_v16 = vpop.eup %5876 }
 0xc43   :  { %1498 = vrot.lane.b32.xlu0 %v5877_v16, %s6174_s29 }
 0xc46   :  { %v5879_v17 = vpop.eup %5878 }
 0xc47   :  { %1668 = vrot.lane.b32.xlu1 %v5879_v17, %s6174_s29  ;;  %v5881_v20 = vpop.eup %5880 }
 0xc48   :  { %v1492_v21 = vadd.f32 1.0, %v5881_v20  ;;  %v5883_v22 = vpop.eup %5882 }
 0xc49   :  { %v1662_v23 = vadd.f32 1.0, %v5883_v22 }
 0xc4a   :  { %5884 = vrcp.f32 %v1492_v21 }
 0xc4b   :  { %5886 = vrcp.f32 %v1662_v23 }
 0xc54   :  { %v5885_v24 = vpop.eup %5884 }
 0xc55   :  { %v5887_v27 = vpop.eup %5886  ;;  %v1496_v31 = vmul.f32 %v5885_v24, %v6536_v49  ;;  %v4760_v49 = vld [vmem:[%s7088_s0 + $0x28] sm:$0xff] }
 0xc56   :  { %v1666_v35 = vmul.f32 %v5887_v27, %v6540_v52 }
 0xcb5   :  { %v1499_v25 = vpop.permute.xlu0 %1498 }
 0xcb6   :  { %v1501_v26 = vmul.f32 %v5885_v24, %v1499_v25 }
 0xcb8   :  { %1503 = vrot.lane.b32.xlu0 %v1501_v26, %s6175_s30 }
 0xcb9   :  { %v1669_v28 = vpop.permute.xlu1 %1668 }
 0xcba   :  { %v1671_v29 = vmul.f32 %v5887_v27, %v1669_v28 }
 0xcbc   :  { %1673 = vrot.lane.b32.xlu1 %v1671_v29, %s6175_s30 }
 0xd2a   :  { %v1504_v32 = vpop.permute.xlu0 %1503 }
 0xd2b   :  { %v6584_v33 = vadd.f32 %v1504_v32, %v1496_v31 }
 0xd2d   :  { %5888 = vtanh.f32 %v6584_v33 }
 0xd2e   :  { %v1674_v36 = vpop.permute.xlu1 %1673 }
 0xd2f   :  { %v6588_v39 = vadd.f32 %v1674_v36, %v1666_v35 }
 0xd31   :  { %5890 = vtanh.f32 %v6588_v39 }
 0xd37   :  { %v5889_v40 = vpop.eup %5888 }
 0xd38   :  { %1509 = vrot.lane.b32.xlu0 %v5889_v40, %s6174_s29 }
 0xd3b   :  { %v5891_v41 = vpop.eup %5890 }
 0xd3c   :  { %1679 = vrot.lane.b32.xlu1 %v5891_v41, %s6174_s29 }
 0xdaa   :  { %v1510_v42 = vpop.permute.xlu0 %1509 }
 0xdab   :  { %v1512_v43 = vmul.f32 %v5885_v24, %v1510_v42 }
 0xdad   :  { %1684 = vrot.lane.b32.xlu0 %v1512_v43, %s6175_s30 }
 0xdae   :  { %v1680_v44 = vpop.permute.xlu1 %1679 }
 0xdaf   :  { %v1682_v45 = vmul.f32 %v5887_v27, %v1680_v44 }
 0xdb1   :  { %1759 = vrot.lane.b32.xlu1 %v1682_v45, %s6175_s30 }
 0xe1f   :  { %v1685_v46 = vpop.permute.xlu0 %1684 }
 0xe20   :  { %5225 = vmatmul.mubr.msk.f32.vlgmr.msra.gmra.mrb[16].mxu0 %vm109_vm3, %v1685_v46 }
 0xe21   :  { %5647 = vmatpush3.bf16.msra.mxu0 %v6321_v5  ;;  %5246 = vmatprep.mubr.msk.f32.mxu0 %vm6173_vm0, %v6172_v1 }
 0xe22   :  { %5648 = vmatprep.subr.bf16.mxu0 %v6171_v0 }
 0xe23   :  { %v1760_v48 = vpop.permute.xlu1 %1759 }
 0xe24   :  { %5236 = vmatmul.mubr.msk.f32.vlgmr.msra.gmra.mrb[20].mxu1 %vm109_vm3, %v1760_v48 }
 0xe25   :  { %5650 = vmatpush3.bf16.msra.mxu0 %v6334_v9  ;;  %5250 = vmatpush3.msk.msra.mxu1 %vm187_vm1, %v6326_v7 }
 0xe26   :  { %5251 = vmatprep.mubr.msk.f32.mxu1 %vm6173_vm0, %v6172_v1  ;;  %5651 = vmatprep.subr.bf16.mxu1 %v6171_v0 }
 0xe27   :  { %5657 = vmatprep.subr.bf16.mxu0 %v6171_v0 }
 0xe28   :  { %5247 = vmatmul.mubr.msk.f32.vlgmr.msra.gmra.mrb[18].mxu0 %vm109_vm3, %v1760_v48  ;;  %5252 = vmatmul.mubr.msk.f32.vlgmr.msra.gmra.mrb[22].mxu1 %vm183_vm2, %v4760_v49 }
 0xe29   :  { %5653 = vmatpush3.bf16.msra.mxu1 %v6366_v30  ;;  %5659 = vmatpush3.bf16.msra.mxu0 %v6377_v34 }
 0xe2a   :  { %5654 = vmatprep.subr.bf16.mxu1 %v6171_v0  ;;  %5262 = vmatprep.mubr.msk.f32.mxu1 %vm6173_vm0, %v6172_v1 }
 0xe2b   :  { %5660 = vmatprep.subr.bf16.mxu0 %v6171_v0  ;;  %5273 = vmatprep.mubr.msk.f32.mxu0 %vm6173_vm0, %v6172_v1 }
 0xe2d   :  { %5656 = vmatpush3.bf16.msra.mxu1 %v6386_v37  ;;  %5662 = vmatpush3.bf16.msra.mxu0 %v6390_v38 }
 0xe2e   :  { %5663 = vmatprep.subr.bf16.mxu1 %v6171_v0  ;;  %5287 = vmatprep.subr.mxu0 %v6172_v1 }
 0xef3   :  { %v1754_v50 = vpop.f32.mrb[16].mxu0 }
 0xef4   :  { %v5226_v51 = vpop.f32.mrb[17].mxu0 }
 0xef7   :  { %v1829_v52 = vpop.f32.mrb[20].mxu1 }
 0xef8   :  { %v1830_v53 = vadd.f32 %v1829_v52, %v1754_v50  ;;  %v5237_v54 = vpop.f32.mrb[21].mxu1 }
 0xefa   :  { %v1833_v55 = vadd.f32 %v6432_v47, %v1830_v53 }
 0xefb   :  { %v1926_v56 = vpop.f32.mrb[18].mxu0  ;;  %v1999_v57 = vpop.f32.mrb[22].mxu1 }
 0xefc   :  { %5892 = vtanh.f32 %v1833_v55  ;;  %v5248_v58 = vpop.f32.mrb[19].mxu0  ;;  %v2000_v59 = vadd.f32 %v1999_v57, %v1926_v56  ;;  %v5253_v60 = vpop.f32.mrb[23].mxu1  ;;  %v4759_v2 = vmul.f32 -1.442695, %v1833_v55 }
 0xefe   :  { %v2003_v61 = vadd.f32 %v6349_v13, %v2000_v59 }
 0xf00   :  { %5894 = vtanh.f32 %v2003_v61  ;;  %v4764_v3 = vmul.f32 -1.442695, %v2003_v61 }
 0xf01   :  { %5896 = vpow2.f32 %v4759_v2 }
 0xf02   :  { %5898 = vpow2.f32 %v4764_v3 }
 0xf06   :  { %v5893_v62 = vpop.eup %5892 }
 0xf07   :  { %1843 = vrot.lane.b32.xlu0 %v5893_v62, %s6174_s29 }
 0xf0a   :  { %v5895_v63 = vpop.eup %5894 }
 0xf0b   :  { %2013 = vrot.lane.b32.xlu1 %v5895_v63, %s6174_s29  ;;  %v5897_v4 = vpop.eup %5896 }
 0xf0c   :  { %v1837_v6 = vadd.f32 1.0, %v5897_v4  ;;  %v5899_v8 = vpop.eup %5898 }
 0xf0d   :  { %v2007_v10 = vadd.f32 1.0, %v5899_v8 }
 0xf0e   :  { %5900 = vrcp.f32 %v1837_v6 }
 0xf0f   :  { %5902 = vrcp.f32 %v2007_v10 }
 0xf18   :  { %v5901_v11 = vpop.eup %5900 }
 0xf19   :  { %v5903_v15 = vpop.eup %5902  ;;  %v1841_v18 = vmul.f32 %v5901_v11, %v6584_v33  ;;  %v4768_v33 = vld [vmem:[%s7088_s0 + $0x30] sm:$0xff] }
 0xf1a   :  { %v2011_v21 = vmul.f32 %v5903_v15, %v6588_v39 }
 0xf79   :  { %v1844_v12 = vpop.permute.xlu0 %1843 }
 0xf7a   :  { %v1846_v14 = vmul.f32 %v5901_v11, %v1844_v12 }
 0xf7c   :  { %1848 = vrot.lane.b32.xlu0 %v1846_v14, %s6175_s30 }
 0xf7d   :  { %v2014_v16 = vpop.permute.xlu1 %2013 }
 0xf7e   :  { %v2016_v17 = vmul.f32 %v5903_v15, %v2014_v16 }
 0xf80   :  { %2018 = vrot.lane.b32.xlu1 %v2016_v17, %s6175_s30 }
 0xfee   :  { %v1849_v19 = vpop.permute.xlu0 %1848 }
 0xfef   :  { %v6632_v20 = vadd.f32 %v1849_v19, %v1841_v18  ;;  %v6044_v18 = vld [vmem:[#allocation3] sm:$0xf]  ;;  %v6702_v19 = vld [vmem:[%s7088_s0 + $0x38] sm:$0xff] }
 0xff1   :  { %5904 = vtanh.f32 %v6632_v20 }
 0xff2   :  { %v2019_v22 = vpop.permute.xlu1 %2018 }
 0xff3   :  { %v6636_v23 = vadd.f32 %v2019_v22, %v2011_v21 }
 0xff5   :  { %5906 = vtanh.f32 %v6636_v23 }
 0xffb   :  { %v5905_v24 = vpop.eup %5904 }
 0xffc   :  { %1854 = vrot.lane.b32.xlu0 %v5905_v24, %s6174_s29 }
 0xfff   :  { %v5907_v25 = vpop.eup %5906 }
0x1000   :  { %2024 = vrot.lane.b32.xlu1 %v5907_v25, %s6174_s29 }
0x106e   :  { %v1855_v26 = vpop.permute.xlu0 %1854 }
0x106f   :  { %v1857_v27 = vmul.f32 %v5901_v11, %v1855_v26 }
0x1071   :  { %2029 = vrot.lane.b32.xlu0 %v1857_v27, %s6175_s30 }
0x1072   :  { %v2025_v28 = vpop.permute.xlu1 %2024 }
0x1073   :  { %v2027_v29 = vmul.f32 %v5903_v15, %v2025_v28 }
0x1075   :  { %2104 = vrot.lane.b32.xlu1 %v2027_v29, %s6175_s30 }
0x10e3   :  { %v2030_v31 = vpop.permute.xlu0 %2029 }
0x10e4   :  { %5263 = vmatmul.mubr.msk.f32.vlgmr.msra.gmra.mrb[24].mxu1 %vm109_vm3, %v2030_v31 }
0x10e5   :  { %5665 = vmatpush3.bf16.msra.mxu1 %v6321_v5  ;;  %5284 = vmatprep.mubr.msk.f32.mxu1 %vm6173_vm0, %v6172_v1 }
0x10e6   :  { %5666 = vmatprep.subr.bf16.mxu1 %v6171_v0 }
0x10e7   :  { %v2105_v32 = vpop.permute.xlu1 %2104 }
0x10e8   :  { %5274 = vmatmul.mubr.msk.f32.vlgmr.msra.gmra.mrb[20].mxu0 %vm109_vm3, %v2105_v32 }
0x10e9   :  { %5668 = vmatpush3.bf16.msra.mxu1 %v6334_v9  ;;  %5288 = vmatpush3.msk.msra.mxu0 %vm187_vm1, %v6326_v7 }
0x10ea   :  { %5289 = vmatprep.mubr.msk.f32.mxu0 %vm6173_vm0, %v6172_v1  ;;  %5669 = vmatprep.subr.bf16.mxu0 %v6171_v0 }
0x10eb   :  { %5675 = vmatprep.subr.bf16.mxu1 %v6171_v0 }
0x10ec   :  { %5285 = vmatmul.mubr.msk.f32.vlgmr.msra.gmra.mrb[26].mxu1 %vm109_vm3, %v2105_v32  ;;  %5290 = vmatmul.mubr.msk.f32.vlgmr.msra.gmra.mrb[22].mxu0 %vm183_vm2, %v4768_v33 }
0x10ed   :  { %5671 = vmatpush3.bf16.msra.mxu0 %v6366_v30  ;;  %5677 = vmatpush3.bf16.msra.mxu1 %v6377_v34 }
0x10ee   :  { %5672 = vmatprep.subr.bf16.mxu0 %v6171_v0  ;;  %5300 = vmatprep.mubr.msk.f32.mxu0 %vm6173_vm0, %v6172_v1 }
0x10ef   :  { %5678 = vmatprep.subr.bf16.mxu1 %v6171_v0  ;;  %5311 = vmatprep.mubr.msk.f32.mxu1 %vm6173_vm0, %v6172_v1 }
0x10f1   :  { %5674 = vmatpush3.bf16.msra.mxu0 %v6386_v37  ;;  %5680 = vmatpush3.bf16.msra.mxu1 %v6390_v38 }
0x10f2   :  { %5681 = vmatprep.subr.bf16.mxu0 %v6171_v0  ;;  %5325 = vmatprep.subr.mxu1 %v6172_v1 }
0x11b7   :  { %v2099_v7 = vpop.f32.mrb[24].mxu1 }
0x11b8   :  { %v5264_v35 = vpop.f32.mrb[25].mxu1 }
0x11bb   :  { %v2174_v36 = vpop.f32.mrb[20].mxu0 }
0x11bc   :  { %v2175_v39 = vadd.f32 %v2174_v36, %v2099_v7  ;;  %v5275_v40 = vpop.f32.mrb[21].mxu0 }
0x11be   :  { %v2178_v41 = vadd.f32 %v6432_v47, %v2175_v39 }
0x11bf   :  { %v2271_v42 = vpop.f32.mrb[26].mxu1  ;;  %v2344_v43 = vpop.f32.mrb[22].mxu0 }
0x11c0   :  { %5908 = vtanh.f32 %v2178_v41  ;;  %v5286_v44 = vpop.f32.mrb[27].mxu1  ;;  %v2345_v45 = vadd.f32 %v2344_v43, %v2271_v42  ;;  %v5291_v46 = vpop.f32.mrb[23].mxu0  ;;  %v4767_v51 = vmul.f32 -1.442695, %v2178_v41 }
0x11c2   :  { %v2348_v48 = vadd.f32 %v6349_v13, %v2345_v45 }
0x11c4   :  { %5910 = vtanh.f32 %v2348_v48  ;;  %v4772_v52 = vmul.f32 -1.442695, %v2348_v48 }
0x11c5   :  { %5912 = vpow2.f32 %v4767_v51 }
0x11c6   :  { %5914 = vpow2.f32 %v4772_v52 }
0x11ca   :  { %v5909_v49 = vpop.eup %5908 }
0x11cb   :  { %2188 = vrot.lane.b32.xlu0 %v5909_v49, %s6174_s29 }
0x11ce   :  { %v5911_v50 = vpop.eup %5910 }
0x11cf   :  { %2358 = vrot.lane.b32.xlu1 %v5911_v50, %s6174_s29  ;;  %v5913_v53 = vpop.eup %5912 }
0x11d0   :  { %v2182_v54 = vadd.f32 1.0, %v5913_v53  ;;  %v5915_v55 = vpop.eup %5914 }
0x11d1   :  { %v2352_v56 = vadd.f32 1.0, %v5915_v55 }
0x11d2   :  { %5916 = vrcp.f32 %v2182_v54 }
0x11d3   :  { %5918 = vrcp.f32 %v2352_v56  ;;  %v2897_v56 = vld [vmem:[%s7096_s8] sm:$0xff] }
0x11dc   :  { %v5917_v57 = vpop.eup %5916 }
0x11dd   :  { %v5919_v59 = vpop.eup %5918  ;;  %v2186_v62 = vmul.f32 %v5917_v57, %v6632_v20 }
0x11de   :  { %v2356_v3 = vmul.f32 %v5919_v59, %v6636_v23 }
0x123d   :  { %v2189_v58 = vpop.permute.xlu0 %2188 }
0x123e   :  { %v2191_v13 = vmul.f32 %v5917_v57, %v2189_v58 }
0x1240   :  { %2193 = vrot.lane.b32.xlu0 %v2191_v13, %s6175_s30  ;;  %v2899_v13 = vld [vmem:[%s7096_s8 + $0x10] sm:$0xff] }
0x1241   :  { %v2359_v60 = vpop.permute.xlu1 %2358 }
0x1242   :  { %v2361_v61 = vmul.f32 %v5919_v59, %v2359_v60 }
0x1244   :  { %2363 = vrot.lane.b32.xlu1 %v2361_v61, %s6175_s30 }
0x12b2   :  { %v2194_v63 = vpop.permute.xlu0 %2193 }
0x12b3   :  { %v6680_v2 = vadd.f32 %v2194_v63, %v2186_v62  ;;  %v2896_v62 = vld [vmem:[#allocation6] sm:$0xf] }
0x12b5   :  { %5920 = vtanh.f32 %v6680_v2 }
0x12b6   :  { %v2364_v4 = vpop.permute.xlu1 %2363 }
0x12b7   :  { %v6684_v6 = vadd.f32 %v2364_v4, %v2356_v3 }
0x12b9   :  { %5922 = vtanh.f32 %v6684_v6 }
0x12bf   :  { %v5921_v8 = vpop.eup %5920 }
0x12c0   :  { %2199 = vrot.lane.b32.xlu0 %v5921_v8, %s6174_s29 }
0x12c3   :  { %v5923_v10 = vpop.eup %5922 }
0x12c4   :  { %2369 = vrot.lane.b32.xlu1 %v5923_v10, %s6174_s29  ;;  %v6046_v10 = vld [vmem:[%s7094_s6] ss:$0 sm:$0xff] }
0x1332   :  { %v2200_v11 = vpop.permute.xlu0 %2199 }
0x1333   :  { %v2202_v12 = vmul.f32 %v5917_v57, %v2200_v11  ;;  %v2898_v57 = vld [vmem:[%s7096_s8 + $0x8] sm:$0xff] }
0x1334   :  { %v6749_v58 = vpack.c.bf16 %v2898_v57, %v2897_v56 }
0x1335   :  { %2374 = vrot.lane.b32.xlu0 %v2202_v12, %s6175_s30 }
0x1336   :  { %v2370_v14 = vpop.permute.xlu1 %2369 }
0x1337   :  { %v2372_v15 = vmul.f32 %v5919_v59, %v2370_v14  ;;  %v2900_v59 = vld [vmem:[%s7096_s8 + $0x18] sm:$0xff] }
0x1338   :  { %v6759_v61 = vpack.c.bf16 %v2900_v59, %v2899_v13 }
0x1339   :  { %2449 = vrot.lane.b32.xlu1 %v2372_v15, %s6175_s30  ;;  %v6784_v15 = vld [vmem:[%s7097_s9] ss:$0 sm:$0xff] }
0x13a7   :  { %v2375_v16 = vpop.permute.xlu0 %2374 }
0x13a8   :  { %5301 = vmatmul.mubr.msk.f32.vlgmr.msra.gmra.mrb[24].mxu0 %vm109_vm3, %v2375_v16 }
0x13a9   :  { %5683 = vmatpush3.bf16.msra.mxu0 %v6321_v5  ;;  %5322 = vmatprep.mubr.msk.f32.mxu0 %vm6173_vm0, %v6172_v1 }
0x13aa   :  { %5684 = vmatprep.subr.bf16.mxu0 %v6171_v0 }
0x13ab   :  { %v2450_v17 = vpop.permute.xlu1 %2449 }
0x13ac   :  { %5312 = vmatmul.mubr.msk.f32.vlgmr.msra.gmra.mrb[28].mxu1 %vm109_vm3, %v2450_v17 }
0x13ad   :  { %5686 = vmatpush3.bf16.msra.mxu0 %v6334_v9  ;;  %5326 = vmatpush3.msk.msra.mxu1 %vm187_vm1, %v6044_v18 }
0x13ae   :  { %5327 = vmatprep.mubr.msk.f32.mxu1 %vm6173_vm0, %v6172_v1  ;;  %5687 = vmatprep.subr.bf16.mxu1 %v6171_v0 }
0x13af   :  { %5693 = vmatprep.subr.bf16.mxu0 %v6171_v0 }
0x13b0   :  { %5323 = vmatmul.mubr.msk.f32.vlgmr.msra.gmra.mrb[26].mxu0 %vm109_vm3, %v2450_v17  ;;  %5328 = vmatmul.mubr.msk.f32.vlgmr.msra.gmra.mrb[30].mxu1 %vm183_vm2, %v6702_v19 }
0x13b1   :  { %5689 = vmatpush3.bf16.msra.mxu1 %v6366_v30  ;;  %5695 = vmatpush3.bf16.msra.mxu0 %v6377_v34 }
0x13b2   :  { %5690 = vmatprep.subr.bf16.mxu1 %v6171_v0  ;;  %5338 = vmatprep.mubr.msk.f32.mxu1 %vm6173_vm0, %v6172_v1 }
0x13b3   :  { %5696 = vmatprep.subr.bf16.mxu0 %v6171_v0  ;;  %5349 = vmatprep.mubr.msk.f32.mxu0 %vm6173_vm0, %v6172_v1 }
0x13b5   :  { %5692 = vmatpush3.bf16.msra.mxu1 %v6386_v37  ;;  %5698 = vmatpush3.bf16.msra.mxu0 %v6390_v38  ;;  %v6045_v37 = vld [vmem:[%s7091_s3] ss:$0 sm:$0xff] }
0x13b6   :  { %5699 = vmatprep.subr.bf16.mxu1 %v6171_v0  ;;  %5363 = vmatprep.subr.mxu0 %v6172_v1 }
0x147b   :  { %v2444_v5 = vpop.f32.mrb[24].mxu0 }
0x147c   :  { %v5302_v9 = vpop.f32.mrb[25].mxu0 }
0x147f   :  { %v2519_v30 = vpop.f32.mrb[28].mxu1 }
0x1480   :  { %v2520_v34 = vadd.f32 %v2519_v30, %v2444_v5  ;;  %v5313_v20 = vpop.f32.mrb[29].mxu1 }
0x1482   :  { %v2523_v21 = vadd.f32 %v6432_v47, %v2520_v34 }
0x1483   :  { %v2616_v22 = vpop.f32.mrb[26].mxu0  ;;  %v2689_v23 = vpop.f32.mrb[30].mxu1 }
0x1484   :  { %5924 = vtanh.f32 %v2523_v21  ;;  %v5324_v24 = vpop.f32.mrb[27].mxu0  ;;  %v2690_v25 = vadd.f32 %v2689_v23, %v2616_v22  ;;  %v5329_v26 = vpop.f32.mrb[31].mxu1  ;;  %v4775_v29 = vmul.f32 -1.442695, %v2523_v21 }
0x1486   :  { %v2693_v38 = vadd.f32 %v6045_v37, %v2690_v25 }
0x1488   :  { %5926 = vtanh.f32 %v2693_v38  ;;  %v4780_v47 = vmul.f32 -1.442695, %v2693_v38 }
0x1489   :  { %5928 = vpow2.f32 %v4775_v29 }
0x148a   :  { %5930 = vpow2.f32 %v4780_v47 }
0x148e   :  { %v5925_v27 = vpop.eup %5924 }
0x148f   :  { %2533 = vrot.lane.b32.xlu0 %v5925_v27, %s6174_s29 }
0x1492   :  { %v5927_v28 = vpop.eup %5926 }
0x1493   :  { %2703 = vrot.lane.b32.xlu1 %v5927_v28, %s6174_s29  ;;  %v5929_v31 = vpop.eup %5928 }
0x1494   :  { %v2527_v32 = vadd.f32 1.0, %v5929_v31  ;;  %v5931_v33 = vpop.eup %5930 }
0x1495   :  { %v2697_v7 = vadd.f32 1.0, %v5931_v33 }
0x1496   :  { %5932 = vrcp.f32 %v2527_v32 }
0x1497   :  { %5934 = vrcp.f32 %v2697_v7  ;;  %v3080_v7 = vld [vmem:[#allocation9] sm:$0xff] }
0x14a0   :  { %v5933_v35 = vpop.eup %5932 }
0x14a1   :  { %v5935_v40 = vpop.eup %5934  ;;  %v2531_v43 = vmul.f32 %v5933_v35, %v6680_v2 }
0x14a2   :  { %v2701_v46 = vmul.f32 %v5935_v40, %v6684_v6 }
0x1501   :  { %v2534_v36 = vpop.permute.xlu0 %2533 }
0x1502   :  { %v2536_v39 = vmul.f32 %v5933_v35, %v2534_v36  ;;  %v3082_v36 = vld [vmem:[#allocation9 + $0x10] sm:$0xff] }
0x1504   :  { %2538 = vrot.lane.b32.xlu0 %v2536_v39, %s6175_s30 }
0x1505   :  { %v2704_v41 = vpop.permute.xlu1 %2703 }
0x1506   :  { %v2706_v42 = vmul.f32 %v5935_v40, %v2704_v41  ;;  %v3076_v41 = vld [vmem:[#allocation8] sm:$0xff] }
0x1508   :  { %2708 = vrot.lane.b32.xlu1 %v2706_v42, %s6175_s30  ;;  %v3077_v42 = vld [vmem:[#allocation8 + $0x8] sm:$0xff] }
0x1576   :  { %v2539_v44 = vpop.permute.xlu0 %2538 }
0x1577   :  { %v6732_v45 = vadd.f32 %v2539_v44, %v2531_v43  ;;  %v6801_v43 = vpack.c.bf16 %v3077_v42, %v3076_v41 }
0x1579   :  { %5936 = vtanh.f32 %v6732_v45 }
0x157a   :  { %v2709_v48 = vpop.permute.xlu1 %2708 }
0x157b   :  { %v6736_v49 = vadd.f32 %v2709_v48, %v2701_v46  ;;  %v3078_v48 = vld [vmem:[#allocation8 + $0x10] sm:$0xff] }
0x157d   :  { %5938 = vtanh.f32 %v6736_v49 }
0x1583   :  { %v5937_v50 = vpop.eup %5936 }
0x1584   :  { %2544 = vrot.lane.b32.xlu0 %v5937_v50, %s6174_s29 }
0x1587   :  { %v5939_v51 = vpop.eup %5938 }
0x1588   :  { %2714 = vrot.lane.b32.xlu1 %v5939_v51, %s6174_s29 }
0x15f6   :  { %v2545_v52 = vpop.permute.xlu0 %2544 }
0x15f7   :  { %v2547_v53 = vmul.f32 %v5933_v35, %v2545_v52  ;;  %v3081_v35 = vld [vmem:[#allocation9 + $0x8] sm:$0xff] }
0x15f8   :  { %v6799_v39 = vpack.c.bf16 %v3081_v35, %v3080_v7 }
0x15f9   :  { %2719 = vrot.lane.b32.xlu0 %v2547_v53, %s6175_s30 }
0x15fa   :  { %v2715_v54 = vpop.permute.xlu1 %2714 }
0x15fb   :  { %v2717_v55 = vmul.f32 %v5935_v40, %v2715_v54  ;;  %v3083_v40 = vld [vmem:[#allocation9 + $0x18] sm:$0xff] }
0x15fc   :  { %v6804_v44 = vpack.c.bf16 %v3083_v40, %v3082_v36 }
0x15fd   :  { %2794 = vrot.lane.b32.xlu1 %v2717_v55, %s6175_s30 }
0x166b   :  { %v2720_v60 = vpop.permute.xlu0 %2719 }
0x166c   :  { %5339 = vmatmul.mubr.msk.f32.vlgmr.msra.gmra.mrb[32].mxu1 %vm109_vm3, %v2720_v60  ;;  %v6843_v60 = vld [vmem:[%s7100_s12] ss:$0 sm:$0xff] }
0x166d   :  { %5701 = vmatpush3.bf16.msra.mxu1 %v6749_v58  ;;  %5360 = vmatprep.mubr.msk.f32.mxu1 %vm6173_vm0, %v6172_v1 }
0x166e   :  { %5702 = vmatprep.subr.bf16.mxu1 %v6171_v0 }
0x166f   :  { %v2795_v63 = vpop.permute.xlu1 %2794 }
0x1670   :  { %5350 = vmatmul.mubr.msk.f32.vlgmr.msra.gmra.mrb[28].mxu0 %vm109_vm3, %v2795_v63 }
0x1671   :  { %5704 = vmatpush3.bf16.msra.mxu1 %v6759_v61  ;;  %5364 = vmatpush3.msk.msra.mxu0 %vm187_vm1, %v2896_v62 }
0x1672   :  { %5365 = vmatprep.mubr.msk.f32.mxu0 %vm6173_vm0, %v6172_v1  ;;  %5705 = vmatprep.subr.bf16.mxu0 %v6171_v0 }
0x1673   :  { %5711 = vmatprep.subr.bf16.mxu1 %v6171_v0 }
0x1674   :  { %5361 = vmatmul.mubr.msk.f32.vlgmr.msra.gmra.mrb[34].mxu1 %vm109_vm3, %v2795_v63  ;;  %5366 = vmatmul.mubr.msk.f32.vlgmr.msra.gmra.mrb[30].mxu0 %vm183_vm2, %v6702_v19 }
0x1675   :  { %5376 = vmatprep.mubr.msk.f32.mxu0 %vm6173_vm0, %v6172_v1  ;;  %5387 = vmatprep.mubr.msk.f32.mxu1 %vm6173_vm0, %v6172_v1 }
0x1676   :  { %5707 = vmatpush3.bf16.msra.mxu0 %v6799_v39  ;;  %5713 = vmatpush3.bf16.msra.mxu1 %v6801_v43 }
0x1677   :  { %5708 = vmatprep.subr.bf16.mxu0 %v6171_v0  ;;  %5714 = vmatprep.subr.bf16.mxu1 %v6171_v0 }
0x167a   :  { %5710 = vmatpush3.bf16.msra.mxu0 %v6804_v44 }
0x167b   :  { %5717 = vmatprep.subr.bf16.mxu0 %v6171_v0 }
0x173f   :  { %v2789_v2 = vpop.f32.mrb[32].mxu1 }
0x1740   :  { %v5340_v3 = vpop.f32.mrb[33].mxu1 }
0x1743   :  { %v2864_v4 = vpop.f32.mrb[28].mxu0 }
0x1744   :  { %v2865_v6 = vadd.f32 %v2864_v4, %v2789_v2  ;;  %v5351_v8 = vpop.f32.mrb[29].mxu0 }
0x1746   :  { %v2868_v11 = vadd.f32 %v6046_v10, %v2865_v6 }
0x1747   :  { %v2967_v12 = vpop.f32.mrb[34].mxu1  ;;  %v3040_v14 = vpop.f32.mrb[30].mxu0 }
0x1748   :  { %5940 = vtanh.f32 %v2868_v11  ;;  %v5362_v16 = vpop.f32.mrb[35].mxu1  ;;  %v3041_v17 = vadd.f32 %v3040_v14, %v2967_v12  ;;  %v5367_v18 = vpop.f32.mrb[31].mxu0  ;;  %v4783_v30 = vmul.f32 -1.442695, %v2868_v11 }
0x174a   :  { %v3051_v19 = vadd.f32 %v6784_v15, %v3041_v17  ;;  %v4793_v17 = vld [vmem:[%s7101_s13] ss:$0 sm:$0xff] }
0x174c   :  { %5942 = vtanh.f32 %v3051_v19  ;;  %v4788_v34 = vmul.f32 -1.442695, %v3051_v19 }
0x174d   :  { %5944 = vpow2.f32 %v4783_v30 }
0x174e   :  { %5946 = vpow2.f32 %v4788_v34 }
0x1752   :  { %v5941_v5 = vpop.eup %5940 }
0x1753   :  { %2878 = vrot.lane.b32.xlu0 %v5941_v5, %s6174_s29 }
0x1756   :  { %v5943_v9 = vpop.eup %5942 }
0x1757   :  { %3061 = vrot.lane.b32.xlu1 %v5943_v9, %s6174_s29  ;;  %v5945_v20 = vpop.eup %5944 }
0x1758   :  { %v2872_v21 = vadd.f32 1.0, %v5945_v20  ;;  %v5947_v22 = vpop.eup %5946 }
0x1759   :  { %v3055_v23 = vadd.f32 1.0, %v5947_v22 }
0x175a   :  { %5948 = vrcp.f32 %v2872_v21 }
0x175b   :  { %5950 = vrcp.f32 %v3055_v23 }
0x1764   :  { %v5949_v24 = vpop.eup %5948 }
0x1765   :  { %v5951_v37 = vpop.eup %5950  ;;  %v2876_v28 = vmul.f32 %v5949_v24, %v6732_v45 }
0x1766   :  { %v3059_v31 = vmul.f32 %v5951_v37, %v6736_v49  ;;  %v3079_v49 = vld [vmem:[#allocation8 + $0x18] sm:$0xff] }
0x1767   :  { %v6813_v50 = vpack.c.bf16 %v3079_v49, %v3078_v48 }
0x1769   :  { %5716 = vmatpush3.bf16.msra.mxu1 %v6813_v50 }
0x176a   :  { %5723 = vmatprep.subr.bf16.mxu1 %v6171_v0 }
0x17c5   :  { %v2879_v25 = vpop.permute.xlu0 %2878 }
0x17c6   :  { %v2881_v26 = vmul.f32 %v5949_v24, %v2879_v25  ;;  %v6866_v25 = vld [vmem:[#allocation6] ss:$0 sm:$0xff] }
0x17c8   :  { %2883 = vrot.lane.b32.xlu0 %v2881_v26, %s6175_s30 }
0x17c9   :  { %v3062_v38 = vpop.permute.xlu1 %3061 }
0x17ca   :  { %v3064_v27 = vmul.f32 %v5951_v37, %v3062_v38 }
0x17cc   :  { %3066 = vrot.lane.b32.xlu1 %v3064_v27, %s6175_s30 }
0x183a   :  { %v2884_v29 = vpop.permute.xlu0 %2883 }
0x183b   :  { %v6792_v47 = vadd.f32 %v2884_v29, %v2876_v28 }
0x183d   :  { %5952 = vtanh.f32 %v6792_v47 }
0x183e   :  { %v3067_v32 = vpop.permute.xlu1 %3066 }
0x183f   :  { %v6796_v33 = vadd.f32 %v3067_v32, %v3059_v31 }
0x1841   :  { %5954 = vtanh.f32 %v6796_v33 }
0x1847   :  { %v5953_v45 = vpop.eup %5952 }
0x1848   :  { %2889 = vrot.lane.b32.xlu0 %v5953_v45, %s6174_s29 }
0x184b   :  { %v5955_v46 = vpop.eup %5954 }
0x184c   :  { %3072 = vrot.lane.b32.xlu1 %v5955_v46, %s6174_s29 }
0x18ba   :  { %v2890_v51 = vpop.permute.xlu0 %2889 }
0x18bb   :  { %v2892_v52 = vmul.f32 %v5949_v24, %v2890_v51  ;;  %v6864_v24 = vstv %s7102_s14  ;;  %s6177_s14 = smov [#allocation11]  }
0x18bc   :  { %s4710_s11 = sshll.u32 %s6177_s14, 4  ;;  %s4711_s11 = int_to_ptr.vmem [resolvable:$true] %s4710_s11 }
0x18bd   :  { %3085 = vrot.lane.b32.xlu0 %v2892_v52, %s6175_s30  ;;  %p6140_p5 = scmp.lt.s32.totalorder %s4711_s11, %s4711_s11 }
0x18be   :  { %v3073_v53 = vpop.permute.xlu1 %3072 }
0x18bf   :  { %v3075_v54 = vmul.f32 %v5951_v37, %v3073_v53 }
0x18c1   :  { %3160 = vrot.lane.b32.xlu1 %v3075_v54, %s6175_s30 }
0x192f   :  { %v3086_v55 = vpop.permute.xlu0 %3085 }
0x1930   :  { %5377 = vmatmul.mubr.msk.f32.vlgmr.msra.gmra.mrb[32].mxu0 %vm109_vm3, %v3086_v55 }
0x1931   :  { %5719 = vmatpush3.bf16.msra.mxu0 %v6749_v58  ;;  %5398 = vmatprep.mubr.msk.f32.mxu0 %vm6173_vm0, %v6172_v1 }
0x1932   :  { %5720 = vmatprep.subr.bf16.mxu0 %v6171_v0 }
0x1933   :  { %v3161_v56 = vpop.permute.xlu1 %3160 }
0x1934   :  { %5388 = vmatmul.mubr.msk.f32.vlgmr.msra.gmra.mrb[36].mxu1 %vm109_vm3, %v3161_v56 }
0x1935   :  { %5722 = vmatpush3.bf16.msra.mxu0 %v6759_v61  ;;  %5725 = vmatpush3.bf16.msra.mxu1 %v6799_v39 }
0x1936   :  { %5726 = vmatprep.subr.bf16.mxu1 %v6171_v0  ;;  %5409 = vmatprep.mubr.msk.f32.mxu1 %vm6173_vm0, %v6172_v1 }
0x1937   :  { %5729 = vmatprep.subr.bf16.mxu0 %v6171_v0 }
0x1938   :  { %5399 = vmatmul.mubr.msk.f32.vlgmr.msra.gmra.mrb[34].mxu0 %vm109_vm3, %v3161_v56 }
0x1939   :  { %5728 = vmatpush3.bf16.msra.mxu1 %v6804_v44  ;;  %5731 = vmatpush3.bf16.msra.mxu0 %v6801_v43 }
0x193a   :  { %5735 = vmatprep.subr.bf16.mxu1 %v6171_v0  ;;  %5732 = vmatprep.subr.bf16.mxu0 %v6171_v0 }
0x193b   :  { %5420 = vmatprep.mubr.msk.f32.mxu0 %vm6173_vm0, %v6172_v1 }
0x193d   :  { %5734 = vmatpush3.bf16.msra.mxu0 %v6813_v50 }
0x193e   :  { %5741 = vmatprep.subr.bf16.mxu0 %v6171_v0 }
0x1a03   :  { %v3155_v57 = vpop.f32.mrb[32].mxu0 }
0x1a04   :  { %v5378_v13 = vpop.f32.mrb[33].mxu0 }
0x1a07   :  { %v3230_v59 = vpop.f32.mrb[36].mxu1 }
0x1a08   :  { %v3231_v62 = vadd.f32 %v3230_v59, %v3155_v57  ;;  %v5389_v63 = vpop.f32.mrb[37].mxu1 }
0x1a0a   :  { %v3241_v2 = vadd.f32 %v6843_v60, %v3231_v62 }
0x1a0b   :  { %v3355_v3 = vpop.f32.mrb[34].mxu0 }
0x1a0c   :  { %5956 = vtanh.f32 %v3241_v2  ;;  %v5400_v4 = vpop.f32.mrb[35].mxu0  ;;  %v4792_v8 = vmul.f32 -1.442695, %v3241_v2 }
0x1a0e   :  { %5958 = vpow2.f32 %v4792_v8 }
0x1a16   :  { %v5957_v6 = vpop.eup %5956 }
0x1a17   :  { %3251 = vrot.lane.b32.xlu0 %v5957_v6, %s6174_s29 }
0x1a18   :  { %v5959_v10 = vpop.eup %5958 }
0x1a19   :  { %v3245_v11 = vadd.f32 1.0, %v5959_v10 }
0x1a1b   :  { %5960 = vrcp.f32 %v3245_v11 }
0x1a25   :  { %v5961_v12 = vpop.eup %5960 }
0x1a26   :  { %v3249_v18 = vmul.f32 %v5961_v12, %v6792_v47 }
0x1a89   :  { %v3252_v14 = vpop.permute.xlu0 %3251 }
0x1a8a   :  { %v3254_v16 = vmul.f32 %v5961_v12, %v3252_v14 }
0x1a8c   :  { %3256 = vrot.lane.b32.xlu1 %v3254_v16, %s6175_s30 }
0x1a90   :  { %3271 = vrot.lane.b32.xlu1 %v4793_v17, %s6176_s10 }
0x1afe   :  { %v3257_v19 = vpop.permute.xlu1 %3256 }
0x1aff   :  { %v6852_v5 = vadd.f32 %v3257_v19, %v3249_v18 }
0x1b01   :  { %5962 = vtanh.f32 %v6852_v5 }
0x1b02   :  { %v6856_v34 = vpop.permute.xlu1 %3271 }
0x1b0b   :  { %v5963_v9 = vpop.eup %5962 }
0x1b0c   :  { %3262 = vrot.lane.b32.xlu0 %v5963_v9, %s6174_s29 }
0x1b7e   :  { %v3263_v30 = vpop.permute.xlu0 %3262 }
0x1b7f   :  { %v3265_v20 = vmul.f32 %v5961_v12, %v3263_v30 }
0x1b81   :  { %v3274_v21 = vmul.f32 %v6856_v34, %v3265_v20 }
0x1b83   :  { %3276 = vrot.lane.b32.xlu0 %v3274_v21, %s6175_s30 }
0x1bf5   :  { %v3277_v22 = vpop.permute.xlu0 %3276 }
0x1bf6   :  { %v3279_v23 = vsel %vm109_vm3, %v3277_v22, 0.0 }
0x1bf7   :  { %3280 = vadd.xlane.f32.xlu1 %v3279_v23 }
0x1c84   :  { %v3281_v26 = vpop.xlane.xlu1 %3280 }
0x1c85   :  { %v6869_v37 = vadd.f32 %v6864_v24, %v3281_v26 }
0x1c87   :  { %v3288_v38 = vmul.f32 %v6866_v25, %v6869_v37 }
0x1c89   :  { %v3359_v27 = vadd.f32 %v3355_v3, %v3288_v38 }
0x1c8b   :  { %v3360_v28 = vadd.f32 %v6784_v15, %v3359_v27 }
0x1c8d   :  { %5964 = vtanh.f32 %v3360_v28  ;;  %v4796_v47 = vmul.f32 -1.442695, %v3360_v28 }
0x1c8f   :  { %5966 = vpow2.f32 %v4796_v47 }
0x1c97   :  { %v5965_v29 = vpop.eup %5964 }
0x1c98   :  { %3370 = vrot.lane.b32.xlu0 %v5965_v29, %s6174_s29 }
0x1c99   :  { %v5967_v31 = vpop.eup %5966 }
0x1c9a   :  { %v3364_v32 = vadd.f32 1.0, %v5967_v31 }
0x1c9c   :  { %5968 = vrcp.f32 %v3364_v32 }
0x1ca6   :  { %v5969_v7 = vpop.eup %5968 }
0x1ca7   :  { %v3368_v40 = vmul.f32 %v5969_v7, %v6796_v33 }
0x1d0a   :  { %v3371_v35 = vpop.permute.xlu0 %3370 }
0x1d0b   :  { %v3373_v36 = vmul.f32 %v5969_v7, %v3371_v35 }
0x1d0d   :  { %3375 = vrot.lane.b32.xlu0 %v3373_v36, %s6175_s30 }
0x1d7f   :  { %v3376_v41 = vpop.permute.xlu0 %3375 }
0x1d80   :  { %v6877_v42 = vadd.f32 %v3376_v41, %v3368_v40 }
0x1d82   :  { %5970 = vtanh.f32 %v6877_v42 }
0x1d8c   :  { %v5971_v45 = vpop.eup %5970 }
0x1d8d   :  { %3381 = vrot.lane.b32.xlu0 %v5971_v45, %s6174_s29 }
0x1d91   :  { %3386 = vrot.lane.b32.xlu0 %v3265_v20, %s6175_s30 }
0x1dff   :  { %v3382_v46 = vpop.permute.xlu0 %3381 }
0x1e00   :  { %v3384_v48 = vmul.f32 %v5969_v7, %v3382_v46 }
0x1e02   :  { %3461 = vrot.lane.b32.xlu0 %v3384_v48, %s6175_s30 }
0x1e03   :  { %v3387_v49 = vpop.permute.xlu0 %3386 }
0x1e04   :  { %5410 = vmatmul.mubr.msk.f32.vlgmr.msra.gmra.mrb[38].mxu1 %vm109_vm3, %v3387_v49 }
0x1e05   :  { %5737 = vmatpush3.bf16.msra.mxu1 %v6749_v58  ;;  %5431 = vmatprep.mubr.msk.f32.mxu1 %vm6173_vm0, %v6172_v1 }
0x1e06   :  { %5738 = vmatprep.subr.bf16.mxu1 %v6171_v0 }
0x1e09   :  { %5740 = vmatpush3.bf16.msra.mxu1 %v6759_v61 }
0x1e0a   :  { %5747 = vmatprep.subr.bf16.mxu1 %v6171_v0 }
0x1e74   :  { %v3462_v33 = vpop.permute.xlu0 %3461 }
0x1e75   :  { %5421 = vmatmul.mubr.msk.f32.vlgmr.msra.gmra.mrb[36].mxu0 %vm109_vm3, %v3462_v33  ;;  %5432 = vmatmul.mubr.msk.f32.vlgmr.msra.gmra.mrb[40].mxu1 %vm109_vm3, %v3462_v33 }
0x1e76   :  { %5743 = vmatpush3.bf16.msra.mxu0 %v6799_v39  ;;  %5442 = vmatprep.mubr.msk.f32.mxu0 %vm6173_vm0, %v6172_v1 }
0x1e77   :  { %5744 = vmatprep.subr.bf16.mxu0 %v6171_v0  ;;  %5749 = vmatpush3.bf16.msra.mxu1 %v6801_v43 }
0x1e78   :  { %5750 = vmatprep.subr.bf16.mxu1 %v6171_v0  ;;  %5453 = vmatprep.mubr.msk.f32.mxu1 %vm6173_vm0, %v6172_v1 }
0x1e7a   :  { %5746 = vmatpush3.bf16.msra.mxu0 %v6804_v44 }
0x1e7b   :  { %5753 = vmatprep.subr.bf16.mxu0 %v6171_v0  ;;  %5752 = vmatpush3.bf16.msra.mxu1 %v6813_v50 }
0x1e7c   :  { %5759 = vmatprep.subr.bf16.mxu1 %v6171_v0 }
0x1ed7   :  { %v3456_v51 = vpop.f32.mrb[38].mxu1 }
0x1ed8   :  { %v5411_v52 = vpop.f32.mrb[39].mxu1 }
0x1f48   :  { %v3531_v53 = vpop.f32.mrb[36].mxu0  ;;  %v3636_v54 = vpop.f32.mrb[40].mxu1 }
0x1f49   :  { %v3532_v55 = vadd.f32 %v3531_v53, %v3456_v51  ;;  %v5422_v56 = vpop.f32.mrb[37].mxu0  ;;  %v5433_v57 = vpop.f32.mrb[41].mxu1 }
0x1f4b   :  { %v3535_v13 = vadd.f32 %v6843_v60, %v3532_v55 }
0x1f4d   :  { %5972 = vtanh.f32 %v3535_v13  ;;  %v4799_v62 = vmul.f32 -1.442695, %v3535_v13 }
0x1f4f   :  { %5974 = vpow2.f32 %v4799_v62 }
0x1f57   :  { %v5973_v59 = vpop.eup %5972 }
0x1f58   :  { %3545 = vrot.lane.b32.xlu0 %v5973_v59, %s6174_s29 }
0x1f59   :  { %v5975_v63 = vpop.eup %5974 }
0x1f5a   :  { %v3539_v2 = vadd.f32 1.0, %v5975_v63 }
0x1f5c   :  { %5976 = vrcp.f32 %v3539_v2 }
0x1f66   :  { %v5977_v3 = vpop.eup %5976 }
0x1f67   :  { %v3543_v8 = vmul.f32 %v5977_v3, %v6852_v5 }
0x1fca   :  { %v3546_v4 = vpop.permute.xlu0 %3545 }
0x1fcb   :  { %v3548_v6 = vmul.f32 %v5977_v3, %v3546_v4 }
0x1fcd   :  { %3550 = vrot.lane.b32.xlu0 %v3548_v6, %s6175_s30 }
0x203f   :  { %v3551_v10 = vpop.permute.xlu0 %3550 }
0x2040   :  { %v6908_v11 = vadd.f32 %v3551_v10, %v3543_v8 }
0x2042   :  { %5978 = vtanh.f32 %v6908_v11 }
0x204c   :  { %v5979_v12 = vpop.eup %5978 }
0x204d   :  { %3556 = vrot.lane.b32.xlu0 %v5979_v12, %s6174_s29 }
0x20bf   :  { %v3557_v14 = vpop.permute.xlu0 %3556 }
0x20c0   :  { %v3559_v16 = vmul.f32 %v5977_v3, %v3557_v14 }
0x20c2   :  { %v3560_v17 = vmul.f32 %v3559_v16, %v6856_v34 }
0x20c4   :  { %3562 = vrot.lane.b32.xlu0 %v3560_v17, %s6175_s30 }
0x2136   :  { %v3563_v18 = vpop.permute.xlu0 %3562 }
0x2137   :  { %v3565_v19 = vsel %vm109_vm3, %v3563_v18, 0.0 }
0x2138   :  { %3566 = vadd.xlane.f32.xlu1 %v3565_v19 }
0x21c5   :  { %v3567_v9 = vpop.xlane.xlu1 %3566 }
0x21c6   :  { %v6916_v5 = vadd.f32 %v3567_v9, %v6864_v24 }
0x21c8   :  { %v3569_v30 = vmul.f32 %v6866_v25, %v6916_v5 }
0x21ca   :  { %v3640_v20 = vadd.f32 %v3636_v54, %v3569_v30 }
0x21cc   :  { %v3641_v21 = vadd.f32 %v6784_v15, %v3640_v20 }
0x21ce   :  { %5980 = vtanh.f32 %v3641_v21  ;;  %v4801_v23 = vmul.f32 -1.442695, %v3641_v21 }
0x21d0   :  { %5982 = vpow2.f32 %v4801_v23 }
0x21d8   :  { %v5981_v22 = vpop.eup %5980 }
0x21d9   :  { %3651 = vrot.lane.b32.xlu0 %v5981_v22, %s6174_s29 }
0x21da   :  { %v5983_v26 = vpop.eup %5982 }
0x21db   :  { %v3645_v38 = vadd.f32 1.0, %v5983_v26 }
0x21dd   :  { %5984 = vrcp.f32 %v3645_v38 }
0x21e7   :  { %v5985_v27 = vpop.eup %5984 }
0x21e8   :  { %v3649_v47 = vmul.f32 %v5985_v27, %v6877_v42 }
0x224b   :  { %v3652_v28 = vpop.permute.xlu0 %3651 }
0x224c   :  { %v3654_v29 = vmul.f32 %v5985_v27, %v3652_v28 }
0x224e   :  { %3656 = vrot.lane.b32.xlu1 %v3654_v29, %s6175_s30 }
0x22c0   :  { %v3657_v31 = vpop.permute.xlu1 %3656 }
0x22c1   :  { %v6924_v32 = vadd.f32 %v3657_v31, %v3649_v47 }
0x22c3   :  { %5986 = vtanh.f32 %v6924_v32 }
0x22cd   :  { %v5987_v7 = vpop.eup %5986 }
0x22ce   :  { %3662 = vrot.lane.b32.xlu0 %v5987_v7, %s6174_s29 }
0x22d2   :  { %3667 = vrot.lane.b32.xlu0 %v3559_v16, %s6175_s30  ;;  %v4694_v16 = vsel %vm4693_vm4, %v6869_v37, %v6916_v5 }
0x2340   :  { %v3663_v35 = vpop.permute.xlu0 %3662 }
0x2341   :  { %v3665_v36 = vmul.f32 %v5985_v27, %v3663_v35 }
0x2343   :  { %3742 = vrot.lane.b32.xlu0 %v3665_v36, %s6175_s30 }
0x2344   :  { %v3668_v40 = vpop.permute.xlu0 %3667 }
0x2345   :  { %5443 = vmatmul.mubr.msk.f32.vlgmr.msra.gmra.mrb[38].mxu0 %vm109_vm3, %v3668_v40 }
0x2346   :  { %5755 = vmatpush3.bf16.msra.mxu0 %v6749_v58  ;;  %5464 = vmatprep.mubr.msk.f32.mxu0 %vm6173_vm0, %v6172_v1 }
0x2347   :  { %5756 = vmatprep.subr.bf16.mxu0 %v6171_v0 }
0x234a   :  { %5758 = vmatpush3.bf16.msra.mxu0 %v6759_v61 }
0x234b   :  { %5765 = vmatprep.subr.bf16.mxu0 %v6171_v0 }
0x23b5   :  { %v3743_v41 = vpop.permute.xlu0 %3742 }
0x23b6   :  { %5454 = vmatmul.mubr.msk.f32.vlgmr.msra.gmra.mrb[42].mxu1 %vm109_vm3, %v3743_v41  ;;  %5465 = vmatmul.mubr.msk.f32.vlgmr.msra.gmra.mrb[40].mxu0 %vm109_vm3, %v3743_v41 }
0x23b7   :  { %5761 = vmatpush3.bf16.msra.mxu1 %v6799_v39  ;;  %5475 = vmatprep.mubr.msk.f32.mxu1 %vm6173_vm0, %v6172_v1 }
0x23b8   :  { %5762 = vmatprep.subr.bf16.mxu1 %v6171_v0  ;;  %5767 = vmatpush3.bf16.msra.mxu0 %v6801_v43 }
0x23b9   :  { %5768 = vmatprep.subr.bf16.mxu0 %v6171_v0  ;;  %5486 = vmatprep.mubr.msk.f32.mxu0 %vm6173_vm0, %v6172_v1 }
0x23bb   :  { %5764 = vmatpush3.bf16.msra.mxu1 %v6804_v44 }
0x23bc   :  { %5771 = vmatprep.subr.bf16.mxu1 %v6171_v0  ;;  %5770 = vmatpush3.bf16.msra.mxu0 %v6813_v50 }
0x23bd   :  { %5777 = vmatprep.subr.bf16.mxu0 %v6171_v0 }
0x2418   :  { %v3737_v42 = vpop.f32.mrb[38].mxu0 }
0x2419   :  { %v5444_v45 = vpop.f32.mrb[39].mxu0 }
0x2489   :  { %v3812_v46 = vpop.f32.mrb[42].mxu1  ;;  %v3917_v48 = vpop.f32.mrb[40].mxu0 }
0x248a   :  { %v3813_v49 = vadd.f32 %v3812_v46, %v3737_v42  ;;  %v5455_v33 = vpop.f32.mrb[43].mxu1  ;;  %v5466_v51 = vpop.f32.mrb[41].mxu0 }
0x248c   :  { %v3816_v52 = vadd.f32 %v6843_v60, %v3813_v49 }
0x248e   :  { %5988 = vtanh.f32 %v3816_v52  ;;  %v4804_v54 = vmul.f32 -1.442695, %v3816_v52 }
0x2490   :  { %5990 = vpow2.f32 %v4804_v54 }
0x2498   :  { %v5989_v53 = vpop.eup %5988 }
0x2499   :  { %3826 = vrot.lane.b32.xlu0 %v5989_v53, %s6174_s29 }
0x249a   :  { %v5991_v55 = vpop.eup %5990 }
0x249b   :  { %v3820_v56 = vadd.f32 1.0, %v5991_v55 }
0x249d   :  { %5992 = vrcp.f32 %v3820_v56 }
0x24a7   :  { %v5993_v57 = vpop.eup %5992 }
0x24a8   :  { %v3824_v62 = vmul.f32 %v5993_v57, %v6908_v11 }
0x250b   :  { %v3827_v13 = vpop.permute.xlu0 %3826 }
0x250c   :  { %v3829_v59 = vmul.f32 %v5993_v57, %v3827_v13 }
0x250e   :  { %3831 = vrot.lane.b32.xlu1 %v3829_v59, %s6175_s30 }
0x2580   :  { %v3832_v63 = vpop.permute.xlu1 %3831 }
0x2581   :  { %v6955_v2 = vadd.f32 %v3832_v63, %v3824_v62 }
0x2583   :  { %5994 = vtanh.f32 %v6955_v2 }
0x258d   :  { %v5995_v3 = vpop.eup %5994 }
0x258e   :  { %3837 = vrot.lane.b32.xlu0 %v5995_v3, %s6174_s29 }
0x2600   :  { %v3838_v4 = vpop.permute.xlu0 %3837 }
0x2601   :  { %v3840_v6 = vmul.f32 %v5993_v57, %v3838_v4 }
0x2603   :  { %v3841_v8 = vmul.f32 %v3840_v6, %v6856_v34 }
0x2605   :  { %3843 = vrot.lane.b32.xlu1 %v3841_v8, %s6175_s30 }
0x2677   :  { %v3844_v10 = vpop.permute.xlu1 %3843 }
0x2678   :  { %v3846_v12 = vsel %vm109_vm3, %v3844_v10, 0.0 }
0x2679   :  { %3847 = vadd.xlane.f32.xlu0 %v3846_v12 }
0x2706   :  { %v3848_v11 = vpop.xlane.xlu0 %3847 }
0x2707   :  { %v3849_v14 = vadd.f32 %v3848_v11, %v6864_v24 }
0x2709   :  { %v3850_v17 = vmul.f32 %v6866_v25, %v3849_v14  ;;  %v6966_v18 = vsel %vm4695_vm5, %v4694_v16, %v3849_v14 }
0x270b   :  { %v3921_v19 = vadd.f32 %v3917_v48, %v3850_v17 }
0x270d   :  { %v3922_v9 = vadd.f32 %v6784_v15, %v3921_v19 }
0x270f   :  { %5996 = vtanh.f32 %v3922_v9  ;;  %v4806_v20 = vmul.f32 -1.442695, %v3922_v9 }
0x2711   :  { %5998 = vpow2.f32 %v4806_v20 }
0x2719   :  { %v5997_v30 = vpop.eup %5996 }
0x271a   :  { %3932 = vrot.lane.b32.xlu1 %v5997_v30, %s6174_s29 }
0x271b   :  { %v5999_v21 = vpop.eup %5998 }
0x271c   :  { %v3926_v22 = vadd.f32 1.0, %v5999_v21 }
0x271e   :  { %6000 = vrcp.f32 %v3926_v22 }
0x2728   :  { %v6001_v23 = vpop.eup %6000 }
0x2729   :  { %v3930_v37 = vmul.f32 %v6001_v23, %v6924_v32 }
0x278c   :  { %v3933_v26 = vpop.permute.xlu1 %3932 }
0x278d   :  { %v3935_v38 = vmul.f32 %v6001_v23, %v3933_v26 }
0x278f   :  { %3937 = vrot.lane.b32.xlu1 %v3935_v38, %s6175_s30 }
0x2801   :  { %v3938_v5 = vpop.permute.xlu1 %3937 }
0x2802   :  { %v6972_v27 = vadd.f32 %v3938_v5, %v3930_v37 }
0x2804   :  { %6002 = vtanh.f32 %v6972_v27 }
0x280e   :  { %v6003_v28 = vpop.eup %6002 }
0x280f   :  { %3943 = vrot.lane.b32.xlu1 %v6003_v28, %s6174_s29 }
0x2813   :  { %3948 = vrot.lane.b32.xlu1 %v3840_v6, %s6175_s30 }
0x2881   :  { %v3944_v29 = vpop.permute.xlu1 %3943 }
0x2882   :  { %v3946_v47 = vmul.f32 %v6001_v23, %v3944_v29 }
0x2884   :  { %4023 = vrot.lane.b32.xlu1 %v3946_v47, %s6175_s30 }
0x2885   :  { %v3949_v31 = vpop.permute.xlu1 %3948 }
0x2886   :  { %5476 = vmatmul.mubr.msk.f32.vlgmr.msra.gmra.mrb[44].mxu1 %vm109_vm3, %v3949_v31 }
0x2887   :  { %5773 = vmatpush3.bf16.msra.mxu1 %v6749_v58  ;;  %5497 = vmatprep.mubr.msk.f32.mxu1 %vm6173_vm0, %v6172_v1 }
0x2888   :  { %5774 = vmatprep.subr.bf16.mxu1 %v6171_v0 }
0x288b   :  { %5776 = vmatpush3.bf16.msra.mxu1 %v6759_v61 }
0x288c   :  { %5783 = vmatprep.subr.bf16.mxu1 %v6171_v0 }
0x28f6   :  { %v4024_v32 = vpop.permute.xlu1 %4023 }
0x28f7   :  { %5487 = vmatmul.mubr.msk.f32.vlgmr.msra.gmra.mrb[42].mxu0 %vm109_vm3, %v4024_v32  ;;  %5498 = vmatmul.mubr.msk.f32.vlgmr.msra.gmra.mrb[46].mxu1 %vm109_vm3, %v4024_v32 }
0x28f8   :  { %5779 = vmatpush3.bf16.msra.mxu0 %v6799_v39  ;;  %5508 = vmatprep.mubr.msk.f32.mxu0 %vm6173_vm0, %v6172_v1 }
0x28f9   :  { %5780 = vmatprep.subr.bf16.mxu0 %v6171_v0  ;;  %5785 = vmatpush3.bf16.msra.mxu1 %v6801_v43 }
0x28fa   :  { %5786 = vmatprep.subr.bf16.mxu1 %v6171_v0  ;;  %5519 = vmatprep.mubr.msk.f32.mxu1 %vm6173_vm0, %v6172_v1 }
0x28fc   :  { %5782 = vmatpush3.bf16.msra.mxu0 %v6804_v44 }
0x28fd   :  { %5789 = vmatprep.subr.bf16.mxu0 %v6171_v0  ;;  %5788 = vmatpush3.bf16.msra.mxu1 %v6813_v50 }
0x28fe   :  { %5795 = vmatprep.subr.bf16.mxu1 %v6171_v0 }
0x2959   :  { %v4018_v7 = vpop.f32.mrb[44].mxu1 }
0x295a   :  { %v5477_v35 = vpop.f32.mrb[45].mxu1 }
0x29ca   :  { %v4093_v36 = vpop.f32.mrb[42].mxu0  ;;  %v4198_v40 = vpop.f32.mrb[46].mxu1 }
0x29cb   :  { %v4094_v41 = vadd.f32 %v4093_v36, %v4018_v7  ;;  %v5488_v42 = vpop.f32.mrb[43].mxu0  ;;  %v5499_v45 = vpop.f32.mrb[47].mxu1 }
0x29cd   :  { %v4097_v46 = vadd.f32 %v6843_v60, %v4094_v41 }
0x29cf   :  { %6004 = vtanh.f32 %v4097_v46  ;;  %v4809_v49 = vmul.f32 -1.442695, %v4097_v46 }
0x29d1   :  { %6006 = vpow2.f32 %v4809_v49 }
0x29d9   :  { %v6005_v48 = vpop.eup %6004 }
0x29da   :  { %4107 = vrot.lane.b32.xlu1 %v6005_v48, %s6174_s29 }
0x29db   :  { %v6007_v33 = vpop.eup %6006 }
0x29dc   :  { %v4101_v51 = vadd.f32 1.0, %v6007_v33 }
0x29de   :  { %6008 = vrcp.f32 %v4101_v51 }
0x29e8   :  { %v6009_v52 = vpop.eup %6008 }
0x29e9   :  { %v4105_v55 = vmul.f32 %v6009_v52, %v6955_v2 }
0x2a4c   :  { %v4108_v53 = vpop.permute.xlu1 %4107 }
0x2a4d   :  { %v4110_v54 = vmul.f32 %v6009_v52, %v4108_v53 }
0x2a4f   :  { %4112 = vrot.lane.b32.xlu1 %v4110_v54, %s6175_s30 }
0x2ac1   :  { %v4113_v56 = vpop.permute.xlu1 %4112 }
0x2ac2   :  { %v7003_v57 = vadd.f32 %v4113_v56, %v4105_v55 }
0x2ac4   :  { %6010 = vtanh.f32 %v7003_v57 }
0x2ace   :  { %v6011_v13 = vpop.eup %6010 }
0x2acf   :  { %4118 = vrot.lane.b32.xlu1 %v6011_v13, %s6174_s29 }
0x2b41   :  { %v4119_v59 = vpop.permute.xlu1 %4118 }
0x2b42   :  { %v4121_v62 = vmul.f32 %v6009_v52, %v4119_v59 }
0x2b44   :  { %v4122_v63 = vmul.f32 %v4121_v62, %v6856_v34 }
0x2b46   :  { %4124 = vrot.lane.b32.xlu0 %v4122_v63, %s6175_s30 }
0x2bb8   :  { %v4125_v3 = vpop.permute.xlu0 %4124 }
0x2bb9   :  { %v4127_v4 = vsel %vm109_vm3, %v4125_v3, 0.0 }
0x2bba   :  { %4128 = vadd.xlane.f32.xlu1 %v4127_v4 }
0x2c47   :  { %v4129_v2 = vpop.xlane.xlu1 %4128 }
0x2c48   :  { %v4130_v6 = vadd.f32 %v4129_v2, %v6864_v24 }
0x2c4a   :  { %v4131_v8 = vmul.f32 %v6866_v25, %v4130_v6  ;;  %v7013_v10 = vsel %vm4697_vm6, %v6966_v18, %v4130_v6 }
0x2c4c   :  { %v4202_v12 = vadd.f32 %v4198_v40, %v4131_v8 }
0x2c4e   :  { %v4203_v11 = vadd.f32 %v6784_v15, %v4202_v12 }
0x2c50   :  { %6012 = vtanh.f32 %v4203_v11  ;;  %v4811_v16 = vmul.f32 -1.442695, %v4203_v11 }
0x2c52   :  { %6014 = vpow2.f32 %v4811_v16 }
0x2c5a   :  { %v6013_v14 = vpop.eup %6012 }
0x2c5b   :  { %4213 = vrot.lane.b32.xlu0 %v6013_v14, %s6174_s29 }
0x2c5c   :  { %v6015_v17 = vpop.eup %6014 }
0x2c5d   :  { %v4207_v19 = vadd.f32 1.0, %v6015_v17 }
0x2c5f   :  { %6016 = vrcp.f32 %v4207_v19 }
0x2c69   :  { %v6017_v9 = vpop.eup %6016 }
0x2c6a   :  { %v4211_v18 = vmul.f32 %v6017_v9, %v6972_v27 }
0x2ccd   :  { %v4214_v30 = vpop.permute.xlu0 %4213 }
0x2cce   :  { %v4216_v20 = vmul.f32 %v6017_v9, %v4214_v30 }
0x2cd0   :  { %4218 = vrot.lane.b32.xlu0 %v4216_v20, %s6175_s30 }
0x2d42   :  { %v4219_v21 = vpop.permute.xlu0 %4218 }
0x2d43   :  { %v7019_v22 = vadd.f32 %v4219_v21, %v4211_v18 }
0x2d45   :  { %6018 = vtanh.f32 %v7019_v22 }
0x2d4f   :  { %v6019_v23 = vpop.eup %6018 }
0x2d50   :  { %4224 = vrot.lane.b32.xlu0 %v6019_v23, %s6174_s29 }
0x2d54   :  { %4229 = vrot.lane.b32.xlu0 %v4121_v62, %s6175_s30 }
0x2dc2   :  { %v4225_v26 = vpop.permute.xlu0 %4224 }
0x2dc3   :  { %v4227_v38 = vmul.f32 %v6017_v9, %v4225_v26 }
0x2dc5   :  { %4304 = vrot.lane.b32.xlu0 %v4227_v38, %s6175_s30 }
0x2dc6   :  { %v4230_v37 = vpop.permute.xlu0 %4229 }
0x2dc7   :  { %5509 = vmatmul.mubr.msk.f32.vlgmr.msra.gmra.mrb[44].mxu0 %vm109_vm3, %v4230_v37 }
0x2dc8   :  { %5791 = vmatpush3.bf16.msra.mxu0 %v6749_v58  ;;  %5530 = vmatprep.mubr.msk.f32.mxu0 %vm6173_vm0, %v6172_v1 }
0x2dc9   :  { %5792 = vmatprep.subr.bf16.mxu0 %v6171_v0 }
0x2dcc   :  { %5794 = vmatpush3.bf16.msra.mxu0 %v6759_v61 }
0x2dcd   :  { %5801 = vmatprep.subr.bf16.mxu0 %v6171_v0 }
0x2e37   :  { %v4305_v5 = vpop.permute.xlu0 %4304 }
0x2e38   :  { %5520 = vmatmul.mubr.msk.f32.vlgmr.msra.gmra.mrb[48].mxu1 %vm109_vm3, %v4305_v5  ;;  %5531 = vmatmul.mubr.msk.f32.vlgmr.msra.gmra.mrb[46].mxu0 %vm109_vm3, %v4305_v5 }
0x2e39   :  { %5797 = vmatpush3.bf16.msra.mxu1 %v6799_v39  ;;  %5541 = vmatprep.mubr.msk.f32.mxu1 %vm6173_vm0, %v6172_v1 }
0x2e3a   :  { %5798 = vmatprep.subr.bf16.mxu1 %v6171_v0  ;;  %5803 = vmatpush3.bf16.msra.mxu0 %v6801_v43 }
0x2e3b   :  { %5804 = vmatprep.subr.bf16.mxu0 %v6171_v0  ;;  %5552 = vmatprep.mubr.msk.f32.mxu0 %vm6173_vm0, %v6172_v1 }
0x2e3d   :  { %5800 = vmatpush3.bf16.msra.mxu1 %v6804_v44 }
0x2e3e   :  { %5806 = vmatpush3.bf16.msra.mxu0 %v6813_v50 }
0x2e9a   :  { %v4299_v58 = vpop.f32.mrb[44].mxu0 }
0x2e9b   :  { %v5510_v61 = vpop.f32.mrb[45].mxu0 }
0x2f0b   :  { %v4374_v27 = vpop.f32.mrb[48].mxu1  ;;  %v4479_v39 = vpop.f32.mrb[46].mxu0 }
0x2f0c   :  { %v4375_v28 = vadd.f32 %v4374_v27, %v4299_v58  ;;  %v5521_v29 = vpop.f32.mrb[49].mxu1  ;;  %v5532_v47 = vpop.f32.mrb[47].mxu0 }
0x2f0e   :  { %v4378_v31 = vadd.f32 %v6843_v60, %v4375_v28 }
0x2f10   :  { %6020 = vtanh.f32 %v4378_v31  ;;  %v4814_v0 = vmul.f32 -1.442695, %v4378_v31 }
0x2f12   :  { %6022 = vpow2.f32 %v4814_v0 }
0x2f1a   :  { %v6021_v43 = vpop.eup %6020 }
0x2f1b   :  { %4388 = vrot.lane.b32.xlu1 %v6021_v43, %s6174_s29 }
0x2f1c   :  { %v6023_v1 = vpop.eup %6022 }
0x2f1d   :  { %v4382_v32 = vadd.f32 1.0, %v6023_v1 }
0x2f1f   :  { %6024 = vrcp.f32 %v4382_v32 }
0x2f29   :  { %v6025_v44 = vpop.eup %6024 }
0x2f2a   :  { %v4386_v35 = vmul.f32 %v6025_v44, %v7003_v57 }
0x2f8d   :  { %v4389_v50 = vpop.permute.xlu1 %4388 }
0x2f8e   :  { %v4391_v7 = vmul.f32 %v6025_v44, %v4389_v50 }
0x2f90   :  { %4393 = vrot.lane.b32.xlu0 %v4391_v7, %s6175_s30 }
0x3002   :  { %v4394_v36 = vpop.permute.xlu0 %4393 }
0x3003   :  { %v4396_v40 = vadd.f32 %v4394_v36, %v4386_v35 }
0x3005   :  { %6026 = vtanh.f32 %v4396_v40 }
0x300f   :  { %v6027_v41 = vpop.eup %6026 }
0x3010   :  { %4399 = vrot.lane.b32.xlu0 %v6027_v41, %s6174_s29 }
0x3082   :  { %v4400_v42 = vpop.permute.xlu0 %4399 }
0x3083   :  { %v4402_v45 = vmul.f32 %v6025_v44, %v4400_v42 }
0x3085   :  { %v4403_v46 = vmul.f32 %v4402_v45, %v6856_v34 }
0x3087   :  { %4405 = vrot.lane.b32.xlu0 %v4403_v46, %s6175_s30 }
0x30f9   :  { %v4406_v48 = vpop.permute.xlu0 %4405 }
0x30fa   :  { %v4408_v49 = vsel %vm109_vm3, %v4406_v48, 0.0 }
0x30fb   :  { %4409 = vadd.xlane.f32.xlu0 %v4408_v49 }
0x3188   :  { %v4410_v33 = vpop.xlane.xlu0 %4409 }
0x3189   :  { %v4411_v51 = vadd.f32 %v4410_v33, %v6864_v24 }
0x318b   :  { %v4412_v52 = vmul.f32 %v6866_v25, %v4411_v51  ;;  %v7056_v53 = vsel %vm183_vm2, %v7013_v10, %v4411_v51 }
0x318d   :  { %v4483_v54 = vadd.f32 %v4479_v39, %v4412_v52 }
0x318f   :  { %v4484_v55 = vadd.f32 %v6784_v15, %v4483_v54 }
0x3191   :  { %6028 = vtanh.f32 %v4484_v55  ;;  %v4816_v57 = vmul.f32 -1.442695, %v4484_v55 }
0x3193   :  { %6030 = vpow2.f32 %v4816_v57 }
0x319b   :  { %v6029_v56 = vpop.eup %6028 }
0x319c   :  { %4494 = vrot.lane.b32.xlu1 %v6029_v56, %s6174_s29 }
0x319d   :  { %v6031_v13 = vpop.eup %6030 }
0x319e   :  { %v4488_v59 = vadd.f32 1.0, %v6031_v13 }
0x31a0   :  { %6032 = vrcp.f32 %v4488_v59 }
0x31aa   :  { %v6033_v62 = vpop.eup %6032 }
0x31ab   :  { %v4492_v25 = vmul.f32 %v6033_v62, %v7019_v22 }
0x320e   :  { %v4495_v63 = vpop.permute.xlu1 %4494 }
0x320f   :  { %v4497_v3 = vmul.f32 %v6033_v62, %v4495_v63 }
0x3211   :  { %4499 = vrot.lane.b32.xlu1 %v4497_v3, %s6175_s30 }
0x3283   :  { %v4500_v4 = vpop.permute.xlu1 %4499 }
0x3284   :  { %v4502_v2 = vadd.f32 %v4500_v4, %v4492_v25 }
0x3286   :  { %6034 = vtanh.f32 %v4502_v2 }
0x3290   :  { %v6035_v15 = vpop.eup %6034 }
0x3291   :  { %4505 = vrot.lane.b32.xlu1 %v6035_v15, %s6174_s29 }
0x3295   :  { %4510 = vrot.lane.b32.xlu1 %v4402_v45, %s6175_s30 }
0x3303   :  { %v4506_v6 = vpop.permute.xlu1 %4505 }
0x3304   :  { %v4508_v8 = vmul.f32 %v6033_v62, %v4506_v6 }
0x3306   :  { %4585 = vrot.lane.b32.xlu1 %v4508_v8, %s6175_s30 }
0x3307   :  { %v4511_v10 = vpop.permute.xlu1 %4510 }
0x3308   :  { %5542 = vmatmul.mubr.msk.f32.vlgmr.msra.gmra.mrb[50].mxu1 %vm109_vm3, %v4511_v10 }
0x3378   :  { %v4586_v12 = vpop.permute.xlu1 %4585 }
0x3379   :  { %5553 = vmatmul.mubr.msk.f32.vlgmr.msra.gmra.mrb[48].mxu0 %vm109_vm3, %v4586_v12 }
0x33db   :  { %v4580_v11 = vpop.f32.mrb[50].mxu1 }
0x33dc   :  { %v5543_v14 = vpop.f32.mrb[51].mxu1 }
0x344c   :  { %v4655_v16 = vpop.f32.mrb[48].mxu0 }
0x344d   :  { %v4656_v17 = vadd.f32 %v4655_v16, %v4580_v11  ;;  %v5554_v19 = vpop.f32.mrb[49].mxu0 }
0x344f   :  { %v4659_v9 = vadd.f32 %v6843_v60, %v4656_v17 }
0x3451   :  { %6036 = vtanh.f32 %v4659_v9  ;;  %v4819_v20 = vmul.f32 -1.442695, %v4659_v9 }
0x3453   :  { %6038 = vpow2.f32 %v4819_v20 }
0x345b   :  { %v6037_v30 = vpop.eup %6036 }
0x345c   :  { %4669 = vrot.lane.b32.xlu1 %v6037_v30, %s6174_s29 }
0x345d   :  { %v6039_v18 = vpop.eup %6038 }
0x345e   :  { %v4663_v21 = vadd.f32 1.0, %v6039_v18 }
0x3460   :  { %6040 = vrcp.f32 %v4663_v21 }
0x346a   :  { %v6041_v22 = vpop.eup %6040 }
0x346b   :  { %v4667_v38 = vmul.f32 %v6041_v22, %v4396_v40 }
0x34ce   :  { %v4670_v23 = vpop.permute.xlu1 %4669 }
0x34cf   :  { %v4672_v26 = vmul.f32 %v6041_v22, %v4670_v23 }
0x34d1   :  { %4674 = vrot.lane.b32.xlu1 %v4672_v26, %s6175_s30 }
0x3543   :  { %v4675_v37 = vpop.permute.xlu1 %4674 }
0x3544   :  { %v4677_v5 = vadd.f32 %v4675_v37, %v4667_v38 }
0x3546   :  { %6042 = vtanh.f32 %v4677_v5 }
0x3550   :  { %v6043_v58 = vpop.eup %6042 }
0x3551   :  { %4680 = vrot.lane.b32.xlu1 %v6043_v58, %s6174_s29  ;;  %s6135_s29 = scalar_lea.vmem %s4711_s11, 128 }
0x3552   :  { %p6136_p4 = scmp.ne.s32.totalorder %s4711_s11, %s6135_s29  ;;  %p6141_p6 = scmp.lt.s32.totalorder %s6135_s29, %s6135_s29 }
0x3554   :  { %p6142_p7 = por %p6141_p6, %p6140_p5 }
0x3556   :  { %p6143_p8 = pnand %p6142_p7, %p6136_p4 }
0x35c3   :  { %v4681_v60 = vpop.permute.xlu1 %4680 }
0x35c4   :  { %v4683_v61 = vmul.f32 %v6041_v22, %v4681_v60 }
0x35c6   :  { %v4684_v27 = vmul.f32 %v4683_v61, %v6856_v34 }
0x35c8   :  { %4686 = vrot.lane.b32.xlu0 %v4684_v27, %s6175_s30 }
0x363a   :  { %v4687_v39 = vpop.permute.xlu0 %4686 }
0x363b   :  { %v4689_v28 = vsel %vm109_vm3, %v4687_v39, 0.0 }
0x363c   :  { %4690 = vadd.xlane.f32.xlu1 %v4689_v28 }
0x36c9   :  { %v4691_v29 = vpop.xlane.xlu1 %4690 }
0x36ca   :  { %v4692_v47 = vadd.f32 %v4691_v29, %v6864_v24 }
0x36cc   :  { %v4701_v31 = vsel %vm4700_vm7, %v7056_v53, %v4692_v47 }
0x36cd   :  { %4703 = vst.msk [vmem:[#allocation11] sm:$0xff] %vm4702_vm8, %v4701_v31 }
0x36ce   :  { %6146 = shalt.err (!%p6143_p8)
}
0x36cf   :  { %s6147_s23 = scalar_lea.hbm %s7103_s15, 128 }
0x36d0   :  { %p6148_p9 = scmp.ne.s32.totalorder %s7103_s15, %s6147_s23  ;;  %p6151_p10 = scmp.lt.u32.totalorder %s6147_s23, %s7103_s15 }
0x36d2   :  { %p6153_p11 = pnand %p6151_p10, %p6148_p9 }
0x36d4   :  { %6156 = shalt.err (!%p6153_p11)
}
0x36d5   :  { %4713 = dma.vmem_to_hbm [thread:$0]  %s4711_s11, 128, %s7103_s15, [#allocation5]  }
0x36d6   :  { %6163 = dma.done.wait [#allocation5], 128  }
0x36d7   :  { %6164 = vsyncadd [#allocation5], 4294967168 }
0x36d8   :  { %4717 = vsyncpa [#allocation4], 1 }
0x36d9   :  { %4718 = vsyncpa [#allocation7], 1 }
0x36da   :  { %4719 = vsyncpa [#allocation10], 1 }
0x36db   :  { %4720 = vsyncpa [#allocation5], 1 }

</bundles_post_ra>
